<compile_context>
chip_gen: v7x
topology: tpu7x:2x2x1
jax: 0.10.0
libtpu: 0.0.40
codegen_flags: <defaults>
</compile_context>

<pallas_src>
import jax
import jax.numpy as jnp
from jax.experimental import pallas as pl
from jax.experimental.pallas import tpu as pltpu

LANE = 128


def _round_up(x, m):
    return (x + m - 1) // m * m


# ----------------------------- Pallas kernel ------------------------------ #

def _block_body(xpad_ref, w1_ref, b1_ref, w2_ref, b2_ref,
                wsc_ref, bsc_ref, out_ref, ypad_ref, *, identity_shortcut):
    """Fused BasicBlock forward for one batch element.

    xpad_ref : (1, H+2, W+2, Cp)  zero-padded input plane (channels padded)
    w1_ref   : (3, 3, Cp, Pp)     conv1 weight, BN1 scale folded in
    b1_ref   : (1, Pp)            BN1 folded bias
    w2_ref   : (3, 3, Pp, Pp)     conv2 weight, BN2 scale folded in
    b2_ref   : (1, Pp)            BN2 folded bias
    wsc_ref  : (Cp, Pp) | None    1x1 projection weight, BN_sc scale folded in
    bsc_ref  : (1, Pp) | None     BN_sc folded bias
    out_ref  : (1, H, W, Pp)
    ypad_ref : VMEM (H+2, W+2, Pp) scratch: padded stage-1 output (zero halo)
    """
    H, W, Pp = out_ref.shape[1], out_ref.shape[2], out_ref.shape[3]
    Cp = xpad_ref.shape[3]

    # ---- stage 1: conv1 (3x3, SAME) + folded BN1 + relu ----
    acc1 = jnp.zeros((H * W, Pp), jnp.float32)
    for kh in range(3):
        for kw in range(3):
            patch = xpad_ref[0, kh:kh + H, kw:kw + W, :].reshape(H * W, Cp)
            acc1 = acc1 + jnp.dot(patch, w1_ref[kh, kw],
                                  preferred_element_type=jnp.float32)
    y1 = jnp.maximum(acc1 + b1_ref[...], 0.0)

    # Keep the stage-1 result (with a zero halo) in VMEM for conv2.
    ypad_ref[...] = jnp.zeros_like(ypad_ref)
    ypad_ref[1:H + 1, 1:W + 1, :] = y1.reshape(H, W, Pp).astype(ypad_ref.dtype)

    # ---- stage 2: conv2 (3x3, SAME) + folded BN2 ----
    acc2 = jnp.zeros((H * W, Pp), jnp.float32)
    for kh in range(3):
        for kw in range(3):
            patch = ypad_ref[kh:kh + H, kw:kw + W, :].reshape(H * W, Pp)
            acc2 = acc2 + jnp.dot(patch, w2_ref[kh, kw],
                                  preferred_element_type=jnp.float32)
    main = acc2 + b2_ref[...]

    # ---- shortcut ----
    xc = xpad_ref[0, 1:H + 1, 1:W + 1, :].reshape(H * W, Cp)
    if identity_shortcut:
        sc = xc                                   # Cp == Pp (wrapper asserts)
    else:
        sc = jnp.dot(xc, wsc_ref[...],
                     preferred_element_type=jnp.float32) + bsc_ref[...]

    out_ref[0] = (jnp.maximum(main + sc, 0.0)
                  .reshape(H, W, Pp).astype(out_ref.dtype))


def _make_kernel(identity_shortcut):
    if identity_shortcut:
        def kernel(xpad_ref, w1_ref, b1_ref, w2_ref, b2_ref, out_ref, ypad_ref):
            _block_body(xpad_ref, w1_ref, b1_ref, w2_ref, b2_ref,
                        None, None, out_ref, ypad_ref, identity_shortcut=True)
    else:
        def kernel(xpad_ref, w1_ref, b1_ref, w2_ref, b2_ref,
                   wsc_ref, bsc_ref, out_ref, ypad_ref):
            _block_body(xpad_ref, w1_ref, b1_ref, w2_ref, b2_ref,
                        wsc_ref, bsc_ref, out_ref, ypad_ref,
                        identity_shortcut=False)
    return kernel


# ------------------------------ host wrapper ------------------------------- #

def _fold_bn(gamma, beta, mean, var, eps=1e-5):
    scale = gamma.astype(jnp.float32) / jnp.sqrt(var.astype(jnp.float32) + eps)
    bias = beta.astype(jnp.float32) - mean.astype(jnp.float32) * scale
    return scale, bias


def basic_block_forward(x_nchw, params, stride=1, compute_dtype=jnp.float32):
    """BasicBlock forward (inference-mode BN). NCHW in / NCHW out.

    compute_dtype=jnp.bfloat16 runs the MXU inputs in bf16 (f32 accumulation);
    default f32 matches the reference within tight tolerance.
    """
    assert stride == 1, "TODO(synk): strided 3x3 conv (stride>1) not implemented"

    x = jnp.transpose(x_nchw, (0, 2, 3, 1)).astype(jnp.float32)   # NCHW -> NHWC
    N, H, W, Cin = x.shape
    P = params["w1"].shape[-1]
    Cp = _round_up(Cin, LANE)          # lane-dense input channels
    Pp = _round_up(P, LANE)            # lane-dense output channels

    s1, b1 = _fold_bn(*params["bn1"])
    s2, b2 = _fold_bn(*params["bn2"])

    # Fold BN scale into the conv weights; zero-pad channels to the lane width.
    w1 = params["w1"].astype(jnp.float32) * s1
    w2 = params["w2"].astype(jnp.float32) * s2
    w1p = jnp.pad(w1, ((0, 0), (0, 0), (0, Cp - Cin), (0, Pp - P))).astype(compute_dtype)
    w2p = jnp.pad(w2, ((0, 0), (0, 0), (0, Pp - P), (0, Pp - P))).astype(compute_dtype)
    b1p = jnp.pad(b1, (0, Pp - P)).reshape(1, Pp)
    b2p = jnp.pad(b2, (0, Pp - P)).reshape(1, Pp)

    identity = params.get("wsc") is None
    if identity:
        assert Cin == P, "identity shortcut requires in_planes == planes"
    else:
        ssc, bsc = _fold_bn(*params["bnsc"])
        wsc = params["wsc"].astype(jnp.float32) * ssc
        wscp = jnp.pad(wsc, ((0, Cp - Cin), (0, Pp - P))).astype(compute_dtype)
        bscp = jnp.pad(bsc, (0, Pp - P)).reshape(1, Pp)

    # One-time spatial (+ channel) zero pad of the input in HBM.
    xpad = jnp.pad(x, ((0, 0), (1, 1), (1, 1), (0, Cp - Cin))).astype(compute_dtype)
    Hp, Wp = H + 2, W + 2

    in_specs = [
        pl.BlockSpec((1, Hp, Wp, Cp), lambda n: (n, 0, 0, 0)),
        pl.BlockSpec((3, 3, Cp, Pp),  lambda n: (0, 0, 0, 0)),
        pl.BlockSpec((1, Pp),         lambda n: (0, 0)),
        pl.BlockSpec((3, 3, Pp, Pp),  lambda n: (0, 0, 0, 0)),
        pl.BlockSpec((1, Pp),         lambda n: (0, 0)),
    ]
    args = [xpad, w1p, b1p, w2p, b2p]
    if not identity:
        in_specs += [
            pl.BlockSpec((Cp, Pp), lambda n: (0, 0)),
            pl.BlockSpec((1, Pp),  lambda n: (0, 0)),
        ]
        args += [wscp, bscp]

    out = pl.pallas_call(
        _make_kernel(identity),
        out_shape=jax.ShapeDtypeStruct((N, H, W, Pp), jnp.float32),
        grid=(N,),
        in_specs=in_specs,
        out_specs=pl.BlockSpec((1, H, W, Pp), lambda n: (n, 0, 0, 0)),
        scratch_shapes=[pltpu.VMEM((Hp, Wp, Pp), compute_dtype)],
        compiler_params=pltpu.CompilerParams(
            dimension_semantics=("parallel",)),   # batch across TCs on v7x
    )(*args)

    out = out[..., :P]                            # drop padded lanes
    return jnp.transpose(out, (0, 3, 1, 2))       # NHWC -> NCHW


# --------------------------- pure-JAX reference ---------------------------- #

def _ref_forward(x_nchw, params):
    x = jnp.transpose(x_nchw, (0, 2, 3, 1)).astype(jnp.float32)

    def conv(z, w):
        return jax.lax.conv_general_dilated(
            z, w, (1, 1), 'SAME',
            dimension_numbers=('NHWC', 'HWIO', 'NHWC'))

    def bn(z, g, b, m, v, eps=1e-5):
        return (z - m) / jnp.sqrt(v + eps) * g + b

    o = jax.nn.relu(bn(conv(x, params["w1"]), *params["bn1"]))
    o = bn(conv(o, params["w2"]), *params["bn2"])
    if params.get("wsc") is not None:
        sc = bn(conv(x, params["wsc"][None, None]), *params["bnsc"])
    else:
        sc = x
    o = jax.nn.relu(o + sc)
    return jnp.transpose(o, (0, 3, 1, 2))


# ---------------------------------- main ----------------------------------- #

if __name__ == "__main__":
    root = jax.random.PRNGKey(0)

    def bn_params(key, c):
        k0, k1, k2, k3 = jax.random.split(key, 4)
        gamma = jax.random.uniform(k0, (c,), jnp.float32, 0.5, 1.5)
        beta = 0.1 * jax.random.normal(k1, (c,), jnp.float32)
        mean = 0.1 * jax.random.normal(k2, (c,), jnp.float32)
        var = jax.random.uniform(k3, (c,), jnp.float32, 0.5, 1.5)
        return (gamma, beta, mean, var)

    def make_params(key, cin, planes, projection):
        k = jax.random.split(key, 6)
        p = {
            "w1": 0.1 * jax.random.normal(k[0], (3, 3, cin, planes), jnp.float32),
            "bn1": bn_params(k[1], planes),
            "w2": 0.1 * jax.random.normal(k[2], (3, 3, planes, planes), jnp.float32),
            "bn2": bn_params(k[3], planes),
            "wsc": None,
            "bnsc": None,
        }
        if projection:
            p["wsc"] = 0.1 * jax.random.normal(k[4], (cin, planes), jnp.float32)
            p["bnsc"] = bn_params(k[5], planes)
        return p

    k_proj, k_id, k_x1, k_x2 = jax.random.split(root, 4)

    # Case 1: projection shortcut (in_planes != planes), like the PyTorch module
    # when a 1x1 conv + BN shortcut is created.
    N, Cin, H, W, P = 2, 4, 16, 16, 8
    params = make_params(k_proj, Cin, P, projection=True)
    x = jax.random.normal(k_x1, (N, Cin, H, W), jnp.float32)
    out = jax.block_until_ready(basic_block_forward(x, params))
    ref = jax.block_until_ready(_ref_forward(x, params))
    assert out.shape == (N, P, H, W), out.shape
    assert jnp.allclose(out, ref, atol=2e-4, rtol=2e-4), \
        f"projection: max abs diff {jnp.max(jnp.abs(out - ref))}"

    # Case 2: identity shortcut (in_planes == planes) -- skips the 1x1 matmul.
    Cin2 = P2 = 8
    params_id = make_params(k_id, Cin2, P2, projection=False)
    x2 = jax.random.normal(k_x2, (N, Cin2, H, W), jnp.float32)
    out2 = jax.block_until_ready(basic_block_forward(x2, params_id))
    ref2 = jax.block_until_ready(_ref_forward(x2, params_id))
    assert out2.shape == (N, P2, H, W), out2.shape
    assert jnp.allclose(out2, ref2, atol=2e-4, rtol=2e-4), \
        f"identity: max abs diff {jnp.max(jnp.abs(out2 - ref2))}"

    print("KERNEL_OK")
</pallas_src>

<mosaic_0001>
module attributes {stable_mosaic.version = 11 : i64} {
  func.func @kernel(%arg0: i32, %arg1: memref<1x18x18x128xf32, #tpu.memory_space<vmem>>, %arg2: memref<3x3x128x128xf32, #tpu.memory_space<vmem>>, %arg3: memref<1x128xf32, #tpu.memory_space<vmem>>, %arg4: memref<3x3x128x128xf32, #tpu.memory_space<vmem>>, %arg5: memref<1x128xf32, #tpu.memory_space<vmem>>, %arg6: memref<128x128xf32, #tpu.memory_space<vmem>>, %arg7: memref<1x128xf32, #tpu.memory_space<vmem>>, %arg8: memref<1x16x16x128xf32, #tpu.memory_space<vmem>>, %arg9: memref<18x18x128xf32, #tpu.memory_space<vmem>>) attributes {dimension_semantics = [#tpu.dimension_semantics<parallel>], iteration_bounds = array<i64: 2>, scalar_prefetch = 0 : i64, scratch_operands = 1 : i64, tpu.core_type = #tpu.core_type<tc>, window_params = [{transform_indices = @transform_0, window_bounds = array<i64: 1, 18, 18, 128>}, {pipeline_mode = #tpu.pipeline_mode<synchronous>, transform_indices = @transform_1, window_bounds = array<i64: 3, 3, 128, 128>}, {pipeline_mode = #tpu.pipeline_mode<synchronous>, transform_indices = @transform_2, window_bounds = array<i64: 1, 128>}, {pipeline_mode = #tpu.pipeline_mode<synchronous>, transform_indices = @transform_3, window_bounds = array<i64: 3, 3, 128, 128>}, {pipeline_mode = #tpu.pipeline_mode<synchronous>, transform_indices = @transform_4, window_bounds = array<i64: 1, 128>}, {pipeline_mode = #tpu.pipeline_mode<synchronous>, transform_indices = @transform_5, window_bounds = array<i64: 128, 128>}, {pipeline_mode = #tpu.pipeline_mode<synchronous>, transform_indices = @transform_6, window_bounds = array<i64: 1, 128>}, {transform_indices = @transform_7, window_bounds = array<i64: 1, 16, 16, 128>}]} {
    %cst = arith.constant 0.000000e+00 : f32
    %0 = vector.broadcast %cst : f32 to vector<256x128xf32>
    %c0 = arith.constant 0 : index
    %c0_0 = arith.constant 0 : index
    %c0_1 = arith.constant 0 : index
    %c0_2 = arith.constant 0 : index
    %1 = vector.load %arg1[%c0, %c0_0, %c0_1, %c0_2] : memref<1x18x18x128xf32, #tpu.memory_space<vmem>>, vector<1x16x16x128xf32>
    %2 = vector.shape_cast %1 : vector<1x16x16x128xf32> to vector<16x16x128xf32>
    %3 = vector.shape_cast %2 : vector<16x16x128xf32> to vector<256x128xf32>
    %c0_3 = arith.constant 0 : index
    %c0_4 = arith.constant 0 : index
    %c0_5 = arith.constant 0 : index
    %c0_6 = arith.constant 0 : index
    %4 = vector.load %arg2[%c0_3, %c0_4, %c0_5, %c0_6] : memref<3x3x128x128xf32, #tpu.memory_space<vmem>>, vector<1x1x128x128xf32>
    %5 = vector.shape_cast %4 : vector<1x1x128x128xf32> to vector<128x128xf32>
    %cst_7 = arith.constant dense<0.000000e+00> : vector<256x128xf32>
    %6 = tpu.matmul %3, %5, %cst_7 {dimension_numbers = #tpu.dot_dimension_numbers<[1], [0], [0], [1], [0, 0, 1, 1], [], []>} : vector<256x128xf32>, vector<128x128xf32>, vector<256x128xf32> -> vector<256x128xf32>
    %7 = arith.addf %0, %6 : vector<256x128xf32>
    %c0_8 = arith.constant 0 : index
    %c0_9 = arith.constant 0 : index
    %c1 = arith.constant 1 : index
    %c0_10 = arith.constant 0 : index
    %8 = vector.load %arg1[%c0_8, %c0_9, %c1, %c0_10] : memref<1x18x18x128xf32, #tpu.memory_space<vmem>>, vector<1x16x16x128xf32>
    %9 = vector.shape_cast %8 : vector<1x16x16x128xf32> to vector<16x16x128xf32>
    %10 = vector.shape_cast %9 : vector<16x16x128xf32> to vector<256x128xf32>
    %c0_11 = arith.constant 0 : index
    %c1_12 = arith.constant 1 : index
    %c0_13 = arith.constant 0 : index
    %c0_14 = arith.constant 0 : index
    %11 = vector.load %arg2[%c0_11, %c1_12, %c0_13, %c0_14] : memref<3x3x128x128xf32, #tpu.memory_space<vmem>>, vector<1x1x128x128xf32>
    %12 = vector.shape_cast %11 : vector<1x1x128x128xf32> to vector<128x128xf32>
    %cst_15 = arith.constant dense<0.000000e+00> : vector<256x128xf32>
    %13 = tpu.matmul %10, %12, %cst_15 {dimension_numbers = #tpu.dot_dimension_numbers<[1], [0], [0], [1], [0, 0, 1, 1], [], []>} : vector<256x128xf32>, vector<128x128xf32>, vector<256x128xf32> -> vector<256x128xf32>
    %14 = arith.addf %7, %13 : vector<256x128xf32>
    %c0_16 = arith.constant 0 : index
    %c0_17 = arith.constant 0 : index
    %c2 = arith.constant 2 : index
    %c0_18 = arith.constant 0 : index
    %15 = vector.load %arg1[%c0_16, %c0_17, %c2, %c0_18] : memref<1x18x18x128xf32, #tpu.memory_space<vmem>>, vector<1x16x16x128xf32>
    %16 = vector.shape_cast %15 : vector<1x16x16x128xf32> to vector<16x16x128xf32>
    %17 = vector.shape_cast %16 : vector<16x16x128xf32> to vector<256x128xf32>
    %c0_19 = arith.constant 0 : index
    %c2_20 = arith.constant 2 : index
    %c0_21 = arith.constant 0 : index
    %c0_22 = arith.constant 0 : index
    %18 = vector.load %arg2[%c0_19, %c2_20, %c0_21, %c0_22] : memref<3x3x128x128xf32, #tpu.memory_space<vmem>>, vector<1x1x128x128xf32>
    %19 = vector.shape_cast %18 : vector<1x1x128x128xf32> to vector<128x128xf32>
    %cst_23 = arith.constant dense<0.000000e+00> : vector<256x128xf32>
    %20 = tpu.matmul %17, %19, %cst_23 {dimension_numbers = #tpu.dot_dimension_numbers<[1], [0], [0], [1], [0, 0, 1, 1], [], []>} : vector<256x128xf32>, vector<128x128xf32>, vector<256x128xf32> -> vector<256x128xf32>
    %21 = arith.addf %14, %20 : vector<256x128xf32>
    %c0_24 = arith.constant 0 : index
    %c1_25 = arith.constant 1 : index
    %c0_26 = arith.constant 0 : index
    %c0_27 = arith.constant 0 : index
    %22 = vector.load %arg1[%c0_24, %c1_25, %c0_26, %c0_27] : memref<1x18x18x128xf32, #tpu.memory_space<vmem>>, vector<1x16x16x128xf32>
    %23 = vector.shape_cast %22 : vector<1x16x16x128xf32> to vector<16x16x128xf32>
    %24 = vector.shape_cast %23 : vector<16x16x128xf32> to vector<256x128xf32>
    %c1_28 = arith.constant 1 : index
    %c0_29 = arith.constant 0 : index
    %c0_30 = arith.constant 0 : index
    %c0_31 = arith.constant 0 : index
    %25 = vector.load %arg2[%c1_28, %c0_29, %c0_30, %c0_31] : memref<3x3x128x128xf32, #tpu.memory_space<vmem>>, vector<1x1x128x128xf32>
    %26 = vector.shape_cast %25 : vector<1x1x128x128xf32> to vector<128x128xf32>
    %cst_32 = arith.constant dense<0.000000e+00> : vector<256x128xf32>
    %27 = tpu.matmul %24, %26, %cst_32 {dimension_numbers = #tpu.dot_dimension_numbers<[1], [0], [0], [1], [0, 0, 1, 1], [], []>} : vector<256x128xf32>, vector<128x128xf32>, vector<256x128xf32> -> vector<256x128xf32>
    %28 = arith.addf %21, %27 : vector<256x128xf32>
    %c0_33 = arith.constant 0 : index
    %c1_34 = arith.constant 1 : index
    %c1_35 = arith.constant 1 : index
    %c0_36 = arith.constant 0 : index
    %29 = vector.load %arg1[%c0_33, %c1_34, %c1_35, %c0_36] : memref<1x18x18x128xf32, #tpu.memory_space<vmem>>, vector<1x16x16x128xf32>
    %30 = vector.shape_cast %29 : vector<1x16x16x128xf32> to vector<16x16x128xf32>
    %31 = vector.shape_cast %30 : vector<16x16x128xf32> to vector<256x128xf32>
    %c1_37 = arith.constant 1 : index
    %c1_38 = arith.constant 1 : index
    %c0_39 = arith.constant 0 : index
    %c0_40 = arith.constant 0 : index
    %32 = vector.load %arg2[%c1_37, %c1_38, %c0_39, %c0_40] : memref<3x3x128x128xf32, #tpu.memory_space<vmem>>, vector<1x1x128x128xf32>
    %33 = vector.shape_cast %32 : vector<1x1x128x128xf32> to vector<128x128xf32>
    %cst_41 = arith.constant dense<0.000000e+00> : vector<256x128xf32>
    %34 = tpu.matmul %31, %33, %cst_41 {dimension_numbers = #tpu.dot_dimension_numbers<[1], [0], [0], [1], [0, 0, 1, 1], [], []>} : vector<256x128xf32>, vector<128x128xf32>, vector<256x128xf32> -> vector<256x128xf32>
    %35 = arith.addf %28, %34 : vector<256x128xf32>
    %c0_42 = arith.constant 0 : index
    %c1_43 = arith.constant 1 : index
    %c2_44 = arith.constant 2 : index
    %c0_45 = arith.constant 0 : index
    %36 = vector.load %arg1[%c0_42, %c1_43, %c2_44, %c0_45] : memref<1x18x18x128xf32, #tpu.memory_space<vmem>>, vector<1x16x16x128xf32>
    %37 = vector.shape_cast %36 : vector<1x16x16x128xf32> to vector<16x16x128xf32>
    %38 = vector.shape_cast %37 : vector<16x16x128xf32> to vector<256x128xf32>
    %c1_46 = arith.constant 1 : index
    %c2_47 = arith.constant 2 : index
    %c0_48 = arith.constant 0 : index
    %c0_49 = arith.constant 0 : index
    %39 = vector.load %arg2[%c1_46, %c2_47, %c0_48, %c0_49] : memref<3x3x128x128xf32, #tpu.memory_space<vmem>>, vector<1x1x128x128xf32>
    %40 = vector.shape_cast %39 : vector<1x1x128x128xf32> to vector<128x128xf32>
    %cst_50 = arith.constant dense<0.000000e+00> : vector<256x128xf32>
    %41 = tpu.matmul %38, %40, %cst_50 {dimension_numbers = #tpu.dot_dimension_numbers<[1], [0], [0], [1], [0, 0, 1, 1], [], []>} : vector<256x128xf32>, vector<128x128xf32>, vector<256x128xf32> -> vector<256x128xf32>
    %42 = arith.addf %35, %41 : vector<256x128xf32>
    %c0_51 = arith.constant 0 : index
    %c2_52 = arith.constant 2 : index
    %c0_53 = arith.constant 0 : index
    %c0_54 = arith.constant 0 : index
    %43 = vector.load %arg1[%c0_51, %c2_52, %c0_53, %c0_54] : memref<1x18x18x128xf32, #tpu.memory_space<vmem>>, vector<1x16x16x128xf32>
    %44 = vector.shape_cast %43 : vector<1x16x16x128xf32> to vector<16x16x128xf32>
    %45 = vector.shape_cast %44 : vector<16x16x128xf32> to vector<256x128xf32>
    %c2_55 = arith.constant 2 : index
    %c0_56 = arith.constant 0 : index
    %c0_57 = arith.constant 0 : index
    %c0_58 = arith.constant 0 : index
    %46 = vector.load %arg2[%c2_55, %c0_56, %c0_57, %c0_58] : memref<3x3x128x128xf32, #tpu.memory_space<vmem>>, vector<1x1x128x128xf32>
    %47 = vector.shape_cast %46 : vector<1x1x128x128xf32> to vector<128x128xf32>
    %cst_59 = arith.constant dense<0.000000e+00> : vector<256x128xf32>
    %48 = tpu.matmul %45, %47, %cst_59 {dimension_numbers = #tpu.dot_dimension_numbers<[1], [0], [0], [1], [0, 0, 1, 1], [], []>} : vector<256x128xf32>, vector<128x128xf32>, vector<256x128xf32> -> vector<256x128xf32>
    %49 = arith.addf %42, %48 : vector<256x128xf32>
    %c0_60 = arith.constant 0 : index
    %c2_61 = arith.constant 2 : index
    %c1_62 = arith.constant 1 : index
    %c0_63 = arith.constant 0 : index
    %50 = vector.load %arg1[%c0_60, %c2_61, %c1_62, %c0_63] : memref<1x18x18x128xf32, #tpu.memory_space<vmem>>, vector<1x16x16x128xf32>
    %51 = vector.shape_cast %50 : vector<1x16x16x128xf32> to vector<16x16x128xf32>
    %52 = vector.shape_cast %51 : vector<16x16x128xf32> to vector<256x128xf32>
    %c2_64 = arith.constant 2 : index
    %c1_65 = arith.constant 1 : index
    %c0_66 = arith.constant 0 : index
    %c0_67 = arith.constant 0 : index
    %53 = vector.load %arg2[%c2_64, %c1_65, %c0_66, %c0_67] : memref<3x3x128x128xf32, #tpu.memory_space<vmem>>, vector<1x1x128x128xf32>
    %54 = vector.shape_cast %53 : vector<1x1x128x128xf32> to vector<128x128xf32>
    %cst_68 = arith.constant dense<0.000000e+00> : vector<256x128xf32>
    %55 = tpu.matmul %52, %54, %cst_68 {dimension_numbers = #tpu.dot_dimension_numbers<[1], [0], [0], [1], [0, 0, 1, 1], [], []>} : vector<256x128xf32>, vector<128x128xf32>, vector<256x128xf32> -> vector<256x128xf32>
    %56 = arith.addf %49, %55 : vector<256x128xf32>
    %c0_69 = arith.constant 0 : index
    %c2_70 = arith.constant 2 : index
    %c2_71 = arith.constant 2 : index
    %c0_72 = arith.constant 0 : index
    %57 = vector.load %arg1[%c0_69, %c2_70, %c2_71, %c0_72] : memref<1x18x18x128xf32, #tpu.memory_space<vmem>>, vector<1x16x16x128xf32>
    %58 = vector.shape_cast %57 : vector<1x16x16x128xf32> to vector<16x16x128xf32>
    %59 = vector.shape_cast %58 : vector<16x16x128xf32> to vector<256x128xf32>
    %c2_73 = arith.constant 2 : index
    %c2_74 = arith.constant 2 : index
    %c0_75 = arith.constant 0 : index
    %c0_76 = arith.constant 0 : index
    %60 = vector.load %arg2[%c2_73, %c2_74, %c0_75, %c0_76] : memref<3x3x128x128xf32, #tpu.memory_space<vmem>>, vector<1x1x128x128xf32>
    %61 = vector.shape_cast %60 : vector<1x1x128x128xf32> to vector<128x128xf32>
    %cst_77 = arith.constant dense<0.000000e+00> : vector<256x128xf32>
    %62 = tpu.matmul %59, %61, %cst_77 {dimension_numbers = #tpu.dot_dimension_numbers<[1], [0], [0], [1], [0, 0, 1, 1], [], []>} : vector<256x128xf32>, vector<128x128xf32>, vector<256x128xf32> -> vector<256x128xf32>
    %63 = arith.addf %56, %62 : vector<256x128xf32>
    %c0_78 = arith.constant 0 : index
    %c0_79 = arith.constant 0 : index
    %64 = vector.load %arg3[%c0_78, %c0_79] : memref<1x128xf32, #tpu.memory_space<vmem>>, vector<1x128xf32>
    %65 = vector.broadcast %64 : vector<1x128xf32> to vector<256x128xf32>
    %66 = arith.addf %63, %65 : vector<256x128xf32>
    %cst_80 = arith.constant 0.000000e+00 : f32
    %67 = vector.broadcast %cst_80 : f32 to vector<256x128xf32>
    %68 = arith.maximumf %66, %67 : vector<256x128xf32>
    %cst_81 = arith.constant 0.000000e+00 : f32
    %69 = vector.broadcast %cst_81 : f32 to vector<18x18x128xf32>
    %c0_82 = arith.constant 0 : index
    %c0_83 = arith.constant 0 : index
    %c0_84 = arith.constant 0 : index
    %70 = vector.load %arg9[%c0_82, %c0_83, %c0_84] : memref<18x18x128xf32, #tpu.memory_space<vmem>>, vector<18x18x128xf32>
    tpu.vector_store %arg9[%c0_82, %c0_83, %c0_84], %69 {strides = array<i32>} : memref<18x18x128xf32, #tpu.memory_space<vmem>>, vector<18x18x128xf32>,
    %71 = vector.shape_cast %68 : vector<256x128xf32> to vector<16x16x128xf32>
    %c1_85 = arith.constant 1 : index
    %c1_86 = arith.constant 1 : index
    %c0_87 = arith.constant 0 : index
    %72 = vector.load %arg9[%c1_85, %c1_86, %c0_87] : memref<18x18x128xf32, #tpu.memory_space<vmem>>, vector<16x16x128xf32>
    tpu.vector_store %arg9[%c1_85, %c1_86, %c0_87], %71 {strides = array<i32>} : memref<18x18x128xf32, #tpu.memory_space<vmem>>, vector<16x16x128xf32>,
    %cst_88 = arith.constant 0.000000e+00 : f32
    %73 = vector.broadcast %cst_88 : f32 to vector<256x128xf32>
    %c0_89 = arith.constant 0 : index
    %c0_90 = arith.constant 0 : index
    %c0_91 = arith.constant 0 : index
    %74 = vector.load %arg9[%c0_89, %c0_90, %c0_91] : memref<18x18x128xf32, #tpu.memory_space<vmem>>, vector<16x16x128xf32>
    %75 = vector.shape_cast %74 : vector<16x16x128xf32> to vector<256x128xf32>
    %c0_92 = arith.constant 0 : index
    %c0_93 = arith.constant 0 : index
    %c0_94 = arith.constant 0 : index
    %c0_95 = arith.constant 0 : index
    %76 = vector.load %arg4[%c0_92, %c0_93, %c0_94, %c0_95] : memref<3x3x128x128xf32, #tpu.memory_space<vmem>>, vector<1x1x128x128xf32>
    %77 = vector.shape_cast %76 : vector<1x1x128x128xf32> to vector<128x128xf32>
    %cst_96 = arith.constant dense<0.000000e+00> : vector<256x128xf32>
    %78 = tpu.matmul %75, %77, %cst_96 {dimension_numbers = #tpu.dot_dimension_numbers<[1], [0], [0], [1], [0, 0, 1, 1], [], []>} : vector<256x128xf32>, vector<128x128xf32>, vector<256x128xf32> -> vector<256x128xf32>
    %79 = arith.addf %73, %78 : vector<256x128xf32>
    %c0_97 = arith.constant 0 : index
    %c1_98 = arith.constant 1 : index
    %c0_99 = arith.constant 0 : index
    %80 = vector.load %arg9[%c0_97, %c1_98, %c0_99] : memref<18x18x128xf32, #tpu.memory_space<vmem>>, vector<16x16x128xf32>
    %81 = vector.shape_cast %80 : vector<16x16x128xf32> to vector<256x128xf32>
    %c0_100 = arith.constant 0 : index
    %c1_101 = arith.constant 1 : index
    %c0_102 = arith.constant 0 : index
    %c0_103 = arith.constant 0 : index
    %82 = vector.load %arg4[%c0_100, %c1_101, %c0_102, %c0_103] : memref<3x3x128x128xf32, #tpu.memory_space<vmem>>, vector<1x1x128x128xf32>
    %83 = vector.shape_cast %82 : vector<1x1x128x128xf32> to vector<128x128xf32>
    %cst_104 = arith.constant dense<0.000000e+00> : vector<256x128xf32>
    %84 = tpu.matmul %81, %83, %cst_104 {dimension_numbers = #tpu.dot_dimension_numbers<[1], [0], [0], [1], [0, 0, 1, 1], [], []>} : vector<256x128xf32>, vector<128x128xf32>, vector<256x128xf32> -> vector<256x128xf32>
    %85 = arith.addf %79, %84 : vector<256x128xf32>
    %c0_105 = arith.constant 0 : index
    %c2_106 = arith.constant 2 : index
    %c0_107 = arith.constant 0 : index
    %86 = vector.load %arg9[%c0_105, %c2_106, %c0_107] : memref<18x18x128xf32, #tpu.memory_space<vmem>>, vector<16x16x128xf32>
    %87 = vector.shape_cast %86 : vector<16x16x128xf32> to vector<256x128xf32>
    %c0_108 = arith.constant 0 : index
    %c2_109 = arith.constant 2 : index
    %c0_110 = arith.constant 0 : index
    %c0_111 = arith.constant 0 : index
    %88 = vector.load %arg4[%c0_108, %c2_109, %c0_110, %c0_111] : memref<3x3x128x128xf32, #tpu.memory_space<vmem>>, vector<1x1x128x128xf32>
    %89 = vector.shape_cast %88 : vector<1x1x128x128xf32> to vector<128x128xf32>
    %cst_112 = arith.constant dense<0.000000e+00> : vector<256x128xf32>
    %90 = tpu.matmul %87, %89, %cst_112 {dimension_numbers = #tpu.dot_dimension_numbers<[1], [0], [0], [1], [0, 0, 1, 1], [], []>} : vector<256x128xf32>, vector<128x128xf32>, vector<256x128xf32> -> vector<256x128xf32>
    %91 = arith.addf %85, %90 : vector<256x128xf32>
    %c1_113 = arith.constant 1 : index
    %c0_114 = arith.constant 0 : index
    %c0_115 = arith.constant 0 : index
    %92 = vector.load %arg9[%c1_113, %c0_114, %c0_115] : memref<18x18x128xf32, #tpu.memory_space<vmem>>, vector<16x16x128xf32>
    %93 = vector.shape_cast %92 : vector<16x16x128xf32> to vector<256x128xf32>
    %c1_116 = arith.constant 1 : index
    %c0_117 = arith.constant 0 : index
    %c0_118 = arith.constant 0 : index
    %c0_119 = arith.constant 0 : index
    %94 = vector.load %arg4[%c1_116, %c0_117, %c0_118, %c0_119] : memref<3x3x128x128xf32, #tpu.memory_space<vmem>>, vector<1x1x128x128xf32>
    %95 = vector.shape_cast %94 : vector<1x1x128x128xf32> to vector<128x128xf32>
    %cst_120 = arith.constant dense<0.000000e+00> : vector<256x128xf32>
    %96 = tpu.matmul %93, %95, %cst_120 {dimension_numbers = #tpu.dot_dimension_numbers<[1], [0], [0], [1], [0, 0, 1, 1], [], []>} : vector<256x128xf32>, vector<128x128xf32>, vector<256x128xf32> -> vector<256x128xf32>
    %97 = arith.addf %91, %96 : vector<256x128xf32>
    %c1_121 = arith.constant 1 : index
    %c1_122 = arith.constant 1 : index
    %c0_123 = arith.constant 0 : index
    %98 = vector.load %arg9[%c1_121, %c1_122, %c0_123] : memref<18x18x128xf32, #tpu.memory_space<vmem>>, vector<16x16x128xf32>
    %99 = vector.shape_cast %98 : vector<16x16x128xf32> to vector<256x128xf32>
    %c1_124 = arith.constant 1 : index
    %c1_125 = arith.constant 1 : index
    %c0_126 = arith.constant 0 : index
    %c0_127 = arith.constant 0 : index
    %100 = vector.load %arg4[%c1_124, %c1_125, %c0_126, %c0_127] : memref<3x3x128x128xf32, #tpu.memory_space<vmem>>, vector<1x1x128x128xf32>
    %101 = vector.shape_cast %100 : vector<1x1x128x128xf32> to vector<128x128xf32>
    %cst_128 = arith.constant dense<0.000000e+00> : vector<256x128xf32>
    %102 = tpu.matmul %99, %101, %cst_128 {dimension_numbers = #tpu.dot_dimension_numbers<[1], [0], [0], [1], [0, 0, 1, 1], [], []>} : vector<256x128xf32>, vector<128x128xf32>, vector<256x128xf32> -> vector<256x128xf32>
    %103 = arith.addf %97, %102 : vector<256x128xf32>
    %c1_129 = arith.constant 1 : index
    %c2_130 = arith.constant 2 : index
    %c0_131 = arith.constant 0 : index
    %104 = vector.load %arg9[%c1_129, %c2_130, %c0_131] : memref<18x18x128xf32, #tpu.memory_space<vmem>>, vector<16x16x128xf32>
    %105 = vector.shape_cast %104 : vector<16x16x128xf32> to vector<256x128xf32>
    %c1_132 = arith.constant 1 : index
    %c2_133 = arith.constant 2 : index
    %c0_134 = arith.constant 0 : index
    %c0_135 = arith.constant 0 : index
    %106 = vector.load %arg4[%c1_132, %c2_133, %c0_134, %c0_135] : memref<3x3x128x128xf32, #tpu.memory_space<vmem>>, vector<1x1x128x128xf32>
    %107 = vector.shape_cast %106 : vector<1x1x128x128xf32> to vector<128x128xf32>
    %cst_136 = arith.constant dense<0.000000e+00> : vector<256x128xf32>
    %108 = tpu.matmul %105, %107, %cst_136 {dimension_numbers = #tpu.dot_dimension_numbers<[1], [0], [0], [1], [0, 0, 1, 1], [], []>} : vector<256x128xf32>, vector<128x128xf32>, vector<256x128xf32> -> vector<256x128xf32>
    %109 = arith.addf %103, %108 : vector<256x128xf32>
    %c2_137 = arith.constant 2 : index
    %c0_138 = arith.constant 0 : index
    %c0_139 = arith.constant 0 : index
    %110 = vector.load %arg9[%c2_137, %c0_138, %c0_139] : memref<18x18x128xf32, #tpu.memory_space<vmem>>, vector<16x16x128xf32>
    %111 = vector.shape_cast %110 : vector<16x16x128xf32> to vector<256x128xf32>
    %c2_140 = arith.constant 2 : index
    %c0_141 = arith.constant 0 : index
    %c0_142 = arith.constant 0 : index
    %c0_143 = arith.constant 0 : index
    %112 = vector.load %arg4[%c2_140, %c0_141, %c0_142, %c0_143] : memref<3x3x128x128xf32, #tpu.memory_space<vmem>>, vector<1x1x128x128xf32>
    %113 = vector.shape_cast %112 : vector<1x1x128x128xf32> to vector<128x128xf32>
    %cst_144 = arith.constant dense<0.000000e+00> : vector<256x128xf32>
    %114 = tpu.matmul %111, %113, %cst_144 {dimension_numbers = #tpu.dot_dimension_numbers<[1], [0], [0], [1], [0, 0, 1, 1], [], []>} : vector<256x128xf32>, vector<128x128xf32>, vector<256x128xf32> -> vector<256x128xf32>
    %115 = arith.addf %109, %114 : vector<256x128xf32>
    %c2_145 = arith.constant 2 : index
    %c1_146 = arith.constant 1 : index
    %c0_147 = arith.constant 0 : index
    %116 = vector.load %arg9[%c2_145, %c1_146, %c0_147] : memref<18x18x128xf32, #tpu.memory_space<vmem>>, vector<16x16x128xf32>
    %117 = vector.shape_cast %116 : vector<16x16x128xf32> to vector<256x128xf32>
    %c2_148 = arith.constant 2 : index
    %c1_149 = arith.constant 1 : index
    %c0_150 = arith.constant 0 : index
    %c0_151 = arith.constant 0 : index
    %118 = vector.load %arg4[%c2_148, %c1_149, %c0_150, %c0_151] : memref<3x3x128x128xf32, #tpu.memory_space<vmem>>, vector<1x1x128x128xf32>
    %119 = vector.shape_cast %118 : vector<1x1x128x128xf32> to vector<128x128xf32>
    %cst_152 = arith.constant dense<0.000000e+00> : vector<256x128xf32>
    %120 = tpu.matmul %117, %119, %cst_152 {dimension_numbers = #tpu.dot_dimension_numbers<[1], [0], [0], [1], [0, 0, 1, 1], [], []>} : vector<256x128xf32>, vector<128x128xf32>, vector<256x128xf32> -> vector<256x128xf32>
    %121 = arith.addf %115, %120 : vector<256x128xf32>
    %c2_153 = arith.constant 2 : index
    %c2_154 = arith.constant 2 : index
    %c0_155 = arith.constant 0 : index
    %122 = vector.load %arg9[%c2_153, %c2_154, %c0_155] : memref<18x18x128xf32, #tpu.memory_space<vmem>>, vector<16x16x128xf32>
    %123 = vector.shape_cast %122 : vector<16x16x128xf32> to vector<256x128xf32>
    %c2_156 = arith.constant 2 : index
    %c2_157 = arith.constant 2 : index
    %c0_158 = arith.constant 0 : index
    %c0_159 = arith.constant 0 : index
    %124 = vector.load %arg4[%c2_156, %c2_157, %c0_158, %c0_159] : memref<3x3x128x128xf32, #tpu.memory_space<vmem>>, vector<1x1x128x128xf32>
    %125 = vector.shape_cast %124 : vector<1x1x128x128xf32> to vector<128x128xf32>
    %cst_160 = arith.constant dense<0.000000e+00> : vector<256x128xf32>
    %126 = tpu.matmul %123, %125, %cst_160 {dimension_numbers = #tpu.dot_dimension_numbers<[1], [0], [0], [1], [0, 0, 1, 1], [], []>} : vector<256x128xf32>, vector<128x128xf32>, vector<256x128xf32> -> vector<256x128xf32>
    %127 = arith.addf %121, %126 : vector<256x128xf32>
    %c0_161 = arith.constant 0 : index
    %c0_162 = arith.constant 0 : index
    %128 = vector.load %arg5[%c0_161, %c0_162] : memref<1x128xf32, #tpu.memory_space<vmem>>, vector<1x128xf32>
    %129 = vector.broadcast %128 : vector<1x128xf32> to vector<256x128xf32>
    %130 = arith.addf %127, %129 : vector<256x128xf32>
    %c0_163 = arith.constant 0 : index
    %c1_164 = arith.constant 1 : index
    %c1_165 = arith.constant 1 : index
    %c0_166 = arith.constant 0 : index
    %131 = vector.load %arg1[%c0_163, %c1_164, %c1_165, %c0_166] : memref<1x18x18x128xf32, #tpu.memory_space<vmem>>, vector<1x16x16x128xf32>
    %132 = vector.shape_cast %131 : vector<1x16x16x128xf32> to vector<16x16x128xf32>
    %133 = vector.shape_cast %132 : vector<16x16x128xf32> to vector<256x128xf32>
    %c0_167 = arith.constant 0 : index
    %c0_168 = arith.constant 0 : index
    %134 = vector.load %arg6[%c0_167, %c0_168] : memref<128x128xf32, #tpu.memory_space<vmem>>, vector<128x128xf32>
    %cst_169 = arith.constant dense<0.000000e+00> : vector<256x128xf32>
    %135 = tpu.matmul %133, %134, %cst_169 {dimension_numbers = #tpu.dot_dimension_numbers<[1], [0], [0], [1], [0, 0, 1, 1], [], []>} : vector<256x128xf32>, vector<128x128xf32>, vector<256x128xf32> -> vector<256x128xf32>
    %c0_170 = arith.constant 0 : index
    %c0_171 = arith.constant 0 : index
    %136 = vector.load %arg7[%c0_170, %c0_171] : memref<1x128xf32, #tpu.memory_space<vmem>>, vector<1x128xf32>
    %137 = vector.broadcast %136 : vector<1x128xf32> to vector<256x128xf32>
    %138 = arith.addf %135, %137 : vector<256x128xf32>
    %139 = arith.addf %130, %138 : vector<256x128xf32>
    %cst_172 = arith.constant 0.000000e+00 : f32
    %140 = vector.broadcast %cst_172 : f32 to vector<256x128xf32>
    %141 = arith.maximumf %139, %140 : vector<256x128xf32>
    %142 = vector.shape_cast %141 : vector<256x128xf32> to vector<16x16x128xf32>
    %c0_173 = arith.constant 0 : index
    %c0_174 = arith.constant 0 : index
    %c0_175 = arith.constant 0 : index
    %c0_176 = arith.constant 0 : index
    %143 = vector.load %arg8[%c0_173, %c0_174, %c0_175, %c0_176] : memref<1x16x16x128xf32, #tpu.memory_space<vmem>>, vector<1x16x16x128xf32>
    %144 = vector.shape_cast %143 : vector<1x16x16x128xf32> to vector<16x16x128xf32>
    %145 = vector.shape_cast %142 : vector<16x16x128xf32> to vector<1x16x16x128xf32>
    tpu.vector_store %arg8[%c0_173, %c0_174, %c0_175, %c0_176], %145 {strides = array<i32>} : memref<1x16x16x128xf32, #tpu.memory_space<vmem>>, vector<1x16x16x128xf32>,
    return
  }
  func.func @transform_0(%arg0: i32) -> (i32, i32, i32, i32) {
    %c0_i32 = arith.constant 0 : i32
    %c0_i32_0 = arith.constant 0 : i32
    %c0_i32_1 = arith.constant 0 : i32
    %c0_i32_2 = arith.constant 0 : i32
    return %arg0, %c0_i32, %c0_i32_0, %c0_i32_1 : i32, i32, i32, i32
  }
  func.func @transform_1(%arg0: i32) -> (i32, i32, i32, i32) {
    %c0_i32 = arith.constant 0 : i32
    %c0_i32_0 = arith.constant 0 : i32
    %c0_i32_1 = arith.constant 0 : i32
    %c0_i32_2 = arith.constant 0 : i32
    %c0_i32_3 = arith.constant 0 : i32
    return %c0_i32, %c0_i32_0, %c0_i32_1, %c0_i32_2 : i32, i32, i32, i32
  }
  func.func @transform_2(%arg0: i32) -> (i32, i32) {
    %c0_i32 = arith.constant 0 : i32
    %c0_i32_0 = arith.constant 0 : i32
    %c0_i32_1 = arith.constant 0 : i32
    return %c0_i32, %c0_i32_0 : i32, i32
  }
  func.func @transform_3(%arg0: i32) -> (i32, i32, i32, i32) {
    %c0_i32 = arith.constant 0 : i32
    %c0_i32_0 = arith.constant 0 : i32
    %c0_i32_1 = arith.constant 0 : i32
    %c0_i32_2 = arith.constant 0 : i32
    %c0_i32_3 = arith.constant 0 : i32
    return %c0_i32, %c0_i32_0, %c0_i32_1, %c0_i32_2 : i32, i32, i32, i32
  }
  func.func @transform_4(%arg0: i32) -> (i32, i32) {
    %c0_i32 = arith.constant 0 : i32
    %c0_i32_0 = arith.constant 0 : i32
    %c0_i32_1 = arith.constant 0 : i32
    return %c0_i32, %c0_i32_0 : i32, i32
  }
  func.func @transform_5(%arg0: i32) -> (i32, i32) {
    %c0_i32 = arith.constant 0 : i32
    %c0_i32_0 = arith.constant 0 : i32
    %c0_i32_1 = arith.constant 0 : i32
    return %c0_i32, %c0_i32_0 : i32, i32
  }
  func.func @transform_6(%arg0: i32) -> (i32, i32) {
    %c0_i32 = arith.constant 0 : i32
    %c0_i32_0 = arith.constant 0 : i32
    %c0_i32_1 = arith.constant 0 : i32
    return %c0_i32, %c0_i32_0 : i32, i32
  }
  func.func @transform_7(%arg0: i32) -> (i32, i32, i32, i32) {
    %c0_i32 = arith.constant 0 : i32
    %c0_i32_0 = arith.constant 0 : i32
    %c0_i32_1 = arith.constant 0 : i32
    %c0_i32_2 = arith.constant 0 : i32
    return %arg0, %c0_i32, %c0_i32_0, %c0_i32_1 : i32, i32, i32, i32
  }
}

</mosaic_0001>

<bundles_post_ra>
// kernel: tpu_custom_call.1
= control target key start
LH: loop header
LB: loop body
LE: loop exit
PB: predicated region body
PF: predicated region fallthrough
CT: control target
= control target key end

     0   :  { %12 = vsyncpa [#allocation4], 0  ;;  %s12465_s0 = inlined_call_operand.vmem [shape: f32[2,18,18,128], index: 0, kind: input, shape index: {}]   ;;  %s12466_s1 = inlined_call_operand.vmem [shape: f32[3,3,128,128], index: 1, kind: input, shape index: {}]   ;;  %s12467_s2 = inlined_call_operand.vmem [shape: f32[1,128], index: 2, kind: input, shape index: {}]   ;;  %s12468_s3 = inlined_call_operand.hbm [shape: f32[3,3,128,128], index: 3, kind: input, shape index: {}]   ;;  %s12469_s4 = inlined_call_operand.vmem [shape: f32[1,128], index: 4, kind: input, shape index: {}]   ;;  %s12470_s5 = inlined_call_operand.vmem [shape: f32[128,128], index: 5, kind: input, shape index: {}]   ;;  %s12471_s6 = inlined_call_operand.vmem [shape: f32[1,128], index: 6, kind: input, shape index: {}]   ;;  %s12472_s7 = inlined_call_operand.hbm [shape: f32[2,16,16,128], index: 7, kind: output, shape index: {}]  }
   0x1   :  { %13 = vsyncpa [#allocation5], 0 }
   0x2   :  { %15 = vsyncpa [#allocation5 + $0x1], 0  ;;  %s10567_s24 = smov 0   ;;  %s10569_s25 = smov 0  }
   0x3   :  { %s10571_s26 = smov 0   ;;  %s10573_s27 = smov 0  }
   0x4 LB: > { %s10588_s28 = sadd.s32 4294967295, %s10518_s27   ;;  %s6334_s29 = sadd.s32 4294967294, %s10518_s27   ;;  %s10518_s27 = sphi %s10573_s27, %s12645_s27   ;;  %s10514_s26 = sphi %s10571_s26, %s12644_s26   ;;  %s10510_s25 = sphi %s10569_s25, %s12643_s25   ;;  %s10506_s24 = sphi %s10567_s24, %s12642_s24  }
   0x5   : > { %s10592_s30 = sadd.s32 1, %s10518_s27   ;;  %s180_s8 = sadd.s32 1, %s10514_s26 }
   0x6   : > { %s177_s9 = ssub.s32 %s10518_s27, %s10592_s30  ;;  %p190_p0 = scmp.ne.s32.totalorder %s10514_s26, %s10510_s25 }
   0x7   : > { %p178_p1 = scmp.eq.s32.totalorder %s177_s9, 0  ;;  %p191_p2 = scmp.eq.s32.totalorder %s10588_s28, 1 }
   0x8   : > { %p196_p3 = scmp.ne.s32.totalorder %s10510_s25, %s10506_s24  ;;  %p197_p4 = scmp.eq.s32.totalorder %s6334_s29, 1 }
   0x9   : > { %s10603_s10 = scalar_select %p178_p1, %s10514_s26, %s180_s8  }
   0xa   : > { %p10605_p5 = por %p191_p2, %p190_p0  ;;  %p10609_p6 = por %p197_p4, %p196_p3 }
   0xb   : > { %p6335_p7 = scmp.ge.s32.totalorder %s10518_s27, 1  ;;  %p204_p8 = scmp.lt.s32.totalorder %s10518_s27, 3 }
   0xc   : > { %s12525_s11 = scalar_select %p10605_p5, 1, 0 }
   0xd   : > { %s12526_s12 = scalar_select %p10609_p6, 1, 0 }
   0xe   : > { %p12473_p9 = scmp.eq.s32.totalorder %s10588_s28, 0  ;;  %p10616_p10 = pnand %p6335_p7, %p204_p8 }
   0xf   : > { %s10520_s14 = smov [#allocation3]   ;;  %s10424_s19 = scalar_lea.hbm %s12468_s3, 18432 }
  0x10   : > { %s12527_s13 = scalar_select %p10616_p10, 1, 0 }
  0x11   : > { %s222_s15 = sshll.u32 %s10520_s14, 4  ;;  %p10374_p11 = pneg %p10616_p10  ;;  %s223_s15 = int_to_ptr.vmem [resolvable:$true] %s222_s15 }
  0x12   : > { %p10425_p13 = scmp.ne.s32.totalorder %s12468_s3, %s10424_s19  ;;  %p10431_p3 = scmp.lt.u32.totalorder %s10424_s19, %s12468_s3 }
  0x13   : > { %p10624_p12 = pnand %p12473_p9, %p10374_p11 }
  0x15   : > { %p10426_p0 = pneg %p10624_p12 }
  0x17   : > { %p10427_p1 = pnand %p10426_p0, %p10425_p13 }
  0x19   : > { %p10428_p2 = pneg %p10427_p1 }
  0x1b   : > { %p10433_p4 = pnand %p10431_p3, %p10428_p2 }
  0x1d   : > { %10436 = shalt.err (!%p10433_p4)
}
  0x1e   : > { %s10437_s29 = scalar_lea.vmem %s223_s15, 18432  ;;  %p10445_p9 = scmp.lt.s32.totalorder %s223_s15, %s223_s15 }
  0x1f   : > { %p10438_p7 = scmp.ne.s32.totalorder %s223_s15, %s10437_s29  ;;  %p10446_p6 = scmp.lt.s32.totalorder %s10437_s29, %s10437_s29 }
  0x21   : > { %p10440_p8 = pnand %p10438_p7, %p10426_p0  ;;  %p10447_p5 = por %p10446_p6, %p10445_p9 }
  0x23   : > { %p10441_p11 = pneg %p10440_p8 }
  0x25   : > { %p10448_p10 = pnand %p10447_p5, %p10441_p11 }
  0x27   : > { %10451 = shalt.err (!%p10448_p10)
}
  0x28   : > { %s10521_s8 = smov 128   ;;  %s10522_s9 = smov 8  }
  0x29   : > { %10377 = dma.hbm_to_vmem [thread:$0]  (!%p10624_p12), %s12468_s3, 18432, %s223_s15, [#allocation4], %s10521_s8, %s10521_s8, %s10522_s9  }
  0x2a   : > { %p12529_p13 = scmp.ne.s32.totalorder %s12527_s13, 0 }
  0x2c   : > { %255 = sbr.rel (%p12529_p13) target bundleno = 1683 (0x693), region = 48 }
  0x33   : > { %p12530_p1 = scmp.eq.s32.totalorder %s10588_s28, 0 }
  0x35   : > { %10497 = dma.done.wait (%p12530_p1), [#allocation4], 18432   ;;  %p12531_p0 = pmov %p12530_p1 }
  0x36   : > { %p287_p5 = scmp.lt.s32.totalorder %s10588_s28, 1  ;;  %v6342_v0 = vld [vmem:[%s12466_s1 + $0x80] sm:$0xff]  ;;  %v6343_v1 = vld [vmem:[%s12466_s1 + $0x88] sm:$0xff]  ;;  %v6344_v2 = vld [vmem:[%s12466_s1 + $0x90] sm:$0xff]  ;;  %s284_s21 = sand.u32 1, %s10510_s25  }
  0x37   : > { %10499 = vsyncadd (%p12531_p0), [#allocation4], 4294948864  ;;  %v9135_v3 = vpack.c.bf16 %v6343_v1, %v6342_v0  ;;  %v6345_v4 = vld [vmem:[%s12466_s1 + $0x98] sm:$0xff]  ;;  %v6346_v6 = vld [vmem:[%s12466_s1 + $0xa0] sm:$0xff]  ;;  %s6340_s13 = sshll.u32 %s284_s21, 8  ;;  %p12640_p9 = scmp.ne.s32.totalorder %s12525_s11, 0 }
  0x38   : > { %s288_s18 = scalar_select %p287_p5, %s10588_s28, 1  ;;  %v9139_v5 = vpack.c.bf16 %v6345_v4, %v6344_v2  ;;  %v6347_v7 = vld [vmem:[%s12466_s1 + $0xa8] sm:$0xff]  ;;  %v6348_v10 = vld [vmem:[%s12466_s1 + $0xb0] sm:$0xff]  ;;  %v6349_v11 = vld [vmem:[%s12466_s1 + $0xb8] sm:$0xff] }
  0x39   : > { %9136 = vmatprep.subr.bf16.mxu0 %v9135_v3  ;;  %v9143_v8 = vpack.c.bf16 %v6347_v7, %v6346_v6  ;;  %v9147_v12 = vpack.c.bf16 %v6349_v11, %v6348_v10  ;;  %v6350_v13 = vld [vmem:[%s12466_s1 + $0xc0] sm:$0xff]  ;;  %v6351_v14 = vld [vmem:[%s12466_s1 + $0xc8] sm:$0xff]  ;;  %v6352_v16 = vld [vmem:[%s12466_s1 + $0xd0] sm:$0xff]  ;;  %s12329_s22 = scalar_lea.vmem [#allocation6], %s6340_s13  ;;  %s10524_s17 = smov [#allocation6]  }
  0x3a   : > { %s10367_s19 = smul.u32 432, %s288_s18  ;;  %9138 = vmatpush3.bf16.msra.mxu0 %v9135_v3  ;;  %v9151_v15 = vpack.c.bf16 %v6351_v14, %v6350_v13  ;;  %v6353_v17 = vld [vmem:[%s12466_s1 + $0xd8] sm:$0xff]  ;;  %v6354_v19 = vld [vmem:[%s12466_s1 + $0xe0] sm:$0xff]  ;;  %v6355_v20 = vld [vmem:[%s12466_s1 + $0xe8] sm:$0xff]  ;;  %s6260_s23 = sshll.u32 %s12329_s22, 4  ;;  %s12418_s23 = int_to_ptr.vmem [resolvable:$true] %s6260_s23 }
  0x3b   : > { %9140 = vmatprep.subr.bf16.mxu0 %v9139_v5  ;;  %v9155_v18 = vpack.c.bf16 %v6353_v17, %v6352_v16  ;;  %v9159_v21 = vpack.c.bf16 %v6355_v20, %v6354_v19  ;;  %v6356_v22 = vld [vmem:[%s12466_s1 + $0xf0] sm:$0xff]  ;;  %v6357_v23 = vld [vmem:[%s12466_s1 + $0xf8] sm:$0xff]  ;;  %v324_v25 = vld [vmem:[%s12466_s1] sm:$0xff]  ;;  %s10452_s14 = scalar_lea.vmem %s12418_s23, 4096  ;;  %s10456_s18 = sshll.u32 %s10524_s17, 4  ;;  %s10457_s18 = int_to_ptr.vmem [resolvable:$false] %s10456_s18 }
  0x3c   : > { %s10673_s16 = scalar_lea.vmem %s12465_s0, %s10367_s19  ;;  %v9163_v24 = vpack.c.bf16 %v6357_v23, %v6356_v22  ;;  %v325_v26 = vld [vmem:[%s12466_s1 + $0x8] sm:$0xff]  ;;  %v326_v28 = vld [vmem:[%s12466_s1 + $0x10] sm:$0xff]  ;;  %v327_v29 = vld [vmem:[%s12466_s1 + $0x18] sm:$0xff]  ;;  %s6702_s19 = sshll.u32 %s10588_s28, 12 }
  0x3d   : > { %v340_v9 = vld [vmem:[%s10673_s16 + $0x1] sm:$0xff]  ;;  %v9167_v27 = vpack.c.bf16 %v325_v26, %v324_v25  ;;  %v341_v30 = vld [vmem:[%s10673_s16 + $0x9] sm:$0xff]  ;;  %v10720_v31 = vld [vmem:[%s10673_s16 + $0x19] sm:$0xff]  ;;  %v9171_v32 = vpack.c.bf16 %v327_v29, %v326_v28  ;;  %s12416_s9 = scalar_lea.hbm %s12472_s7, %s6702_s19  ;;  %s12424_s28 = scalar_lea.sflag [#allocation5], %s284_s21 }
  0x3e   : > { %7647 = vmatprep.mubr.f32.mxu0 %v340_v9  ;;  %9142 = vmatpush3.bf16.msra.mxu0 %v9139_v5  ;;  %v328_v33 = vld [vmem:[%s12466_s1 + $0x20] sm:$0xff]  ;;  %v329_v34 = vld [vmem:[%s12466_s1 + $0x28] sm:$0xff]  ;;  %v10733_v36 = vld [vmem:[%s10673_s16 + $0x31] sm:$0xff]  ;;  %p10453_p6 = scmp.ne.s32.totalorder %s12418_s23, %s10452_s14  ;;  %s10458_s20 = scalar_lea.vmem %s10457_s18, 8192 }
  0x3f   : > { %9144 = vmatprep.subr.bf16.mxu0 %v9143_v8  ;;  %v10730_v35 = vld [vmem:[%s10673_s16 + $0x21] sm:$0xff]  ;;  %v9175_v37 = vpack.c.bf16 %v329_v34, %v328_v33  ;;  %v330_v38 = vld [vmem:[%s12466_s1 + $0x30] sm:$0xff]  ;;  %v331_v39 = vld [vmem:[%s12466_s1 + $0x38] sm:$0xff]  ;;  %p10459_p2 = scmp.lt.s32.totalorder %s12418_s23, %s10457_s18  ;;  %p10460_p3 = scmp.lt.s32.totalorder %s10458_s20, %s10452_s14 }
  0x40   : > { %v10744_v40 = vld [vmem:[%s10673_s16 + $0x39] sm:$0xff]  ;;  %v10747_v41 = vld [vmem:[%s10673_s16 + $0x49] sm:$0xff]  ;;  %v9179_v42 = vpack.c.bf16 %v331_v39, %v330_v38  ;;  %v10758_v45 = vld [vmem:[%s10673_s16 + $0x51] sm:$0xff]  ;;  %p10454_p10 = pnand %p10453_p6, %p12640_p9 }
  0x41   : > { %v332_v43 = vld [vmem:[%s12466_s1 + $0x40] sm:$0xff]  ;;  %v333_v44 = vld [vmem:[%s12466_s1 + $0x48] sm:$0xff]  ;;  %v334_v48 = vld [vmem:[%s12466_s1 + $0x50] sm:$0xff]  ;;  %p10461_p4 = por %p10460_p3, %p10459_p2 }
  0x42   : > { %9146 = vmatpush3.bf16.msra.mxu0 %v9143_v8  ;;  %v10761_v46 = vld [vmem:[%s10673_s16 + $0x61] sm:$0xff]  ;;  %v9183_v47 = vpack.c.bf16 %v333_v44, %v332_v43  ;;  %v335_v49 = vld [vmem:[%s12466_s1 + $0x58] sm:$0xff]  ;;  %v10772_v50 = vld [vmem:[%s10673_s16 + $0x69] sm:$0xff]  ;;  %p10455_p12 = pneg %p10454_p10 }
  0x43   : > { %9148 = vmatprep.subr.bf16.mxu0 %v9147_v12  ;;  %v10775_v51 = vld [vmem:[%s10673_s16 + $0x79] sm:$0xff]  ;;  %v9187_v52 = vpack.c.bf16 %v335_v49, %v334_v48  ;;  %v337_v54 = vld [vmem:[%s12466_s1 + $0x68] sm:$0xff]  ;;  %v10789_v56 = vld [vmem:[%s10673_s16 + $0x91] sm:$0xff] }
  0x44   : > { %v336_v53 = vld [vmem:[%s12466_s1 + $0x60] sm:$0xff]  ;;  %v338_v58 = vld [vmem:[%s12466_s1 + $0x70] sm:$0xff]  ;;  %v339_v59 = vld [vmem:[%s12466_s1 + $0x78] sm:$0xff]  ;;  %p10462_p7 = pnand %p10461_p4, %p10455_p12 }
  0x45   : > { %v10786_v55 = vld [vmem:[%s10673_s16 + $0x81] sm:$0xff]  ;;  %v9191_v57 = vpack.c.bf16 %v337_v54, %v336_v53  ;;  %v10800_v60 = vld [vmem:[%s10673_s16 + $0x99] sm:$0xff]  ;;  %v10803_v61 = vld [vmem:[%s10673_s16 + $0xa9] sm:$0xff]  ;;  %v9195_v62 = vpack.c.bf16 %v339_v59, %v338_v58 }
  0x46   : > { %9150 = vmatpush3.bf16.msra.mxu0 %v9147_v12  ;;  %v6358_v63 = vld [vmem:[%s12466_s1 + $0x100] sm:$0xff]  ;;  %v6359_v0 = vld [vmem:[%s12466_s1 + $0x108] sm:$0xff]  ;;  %v10814_v1 = vld [vmem:[%s10673_s16 + $0xb1] sm:$0xff] }
  0x47   : > { %9152 = vmatprep.subr.bf16.mxu0 %v9151_v15  ;;  %v10817_v2 = vld [vmem:[%s10673_s16 + $0xc1] sm:$0xff]  ;;  %v9199_v3 = vpack.c.bf16 %v6359_v0, %v6358_v63  ;;  %v10822_v4 = vld [vmem:[%s10673_s16 + $0xc9] sm:$0xff]  ;;  %v10825_v5 = vld [vmem:[%s10673_s16 + $0xd9] sm:$0xff] }
  0x48   : > { %v10830_v6 = vld [vmem:[%s10673_s16 + $0xe1] sm:$0xff]  ;;  %v10833_v7 = vld [vmem:[%s10673_s16 + $0xf1] sm:$0xff]  ;;  %v10838_v8 = vld [vmem:[%s10673_s16 + $0xf9] sm:$0xff] }
  0x49   : > { %v10841_v9 = vld [vmem:[%s10673_s16 + $0x109] sm:$0xff]  ;;  %v10846_v10 = vld [vmem:[%s10673_s16 + $0x111] sm:$0xff]  ;;  %v10849_v11 = vld [vmem:[%s10673_s16 + $0x121] sm:$0xff] }
  0x4a   : > { %9154 = vmatpush3.bf16.msra.mxu0 %v9151_v15  ;;  %v10854_v12 = vld [vmem:[%s10673_s16 + $0x129] sm:$0xff]  ;;  %v10857_v13 = vld [vmem:[%s10673_s16 + $0x139] sm:$0xff]  ;;  %v10862_v14 = vld [vmem:[%s10673_s16 + $0x141] sm:$0xff] }
  0x4b   : > { %9156 = vmatprep.subr.bf16.mxu0 %v9155_v18  ;;  %12532 = vst [vmem:[#allocation9_spill] sm:$0xff] %v10854_v12  ;;  %12533 = vst [vmem:[#allocation10_spill] sm:$0xff] %v10857_v13  ;;  %v10865_v15 = vld [vmem:[%s10673_s16 + $0x151] sm:$0xff]  ;;  %v10870_v16 = vld [vmem:[%s10673_s16 + $0x159] sm:$0xff] }
  0x4c   : > { %12534 = vst [vmem:[#allocation11_spill] sm:$0xff] %v10862_v14  ;;  %12535 = vst [vmem:[#allocation12_spill] sm:$0xff] %v10865_v15  ;;  %v10873_v17 = vld [vmem:[%s10673_s16 + $0x169] sm:$0xff]  ;;  %v292_v19 = vld [vmem:[%s10673_s16] sm:$0xff] }
  0x4d   : > { %12536 = vst [vmem:[#allocation13_spill] sm:$0xff] %v10870_v16  ;;  %12537 = vst [vmem:[#allocation14_spill] sm:$0xff] %v10873_v17  ;;  %v6360_v20 = vld [vmem:[%s12466_s1 + $0x110] sm:$0xff]  ;;  %v293_v22 = vld [vmem:[%s10673_s16 + $0x8] sm:$0xff] }
  0x4e   : > { %9158 = vmatpush3.bf16.msra.mxu0 %v9155_v18  ;;  %v10878_v18 = vld [vmem:[%s10673_s16 + $0x171] sm:$0xff]  ;;  %v6362_v25 = vld [vmem:[%s12466_s1 + $0x120] sm:$0xff]  ;;  %v6363_v26 = vld [vmem:[%s12466_s1 + $0x128] sm:$0xff] }
  0x4f   : > { %9160 = vmatprep.subr.bf16.mxu0 %v9159_v21  ;;  %12538 = vst [vmem:[#allocation15_spill] sm:$0xff] %v10878_v18  ;;  %v10890_v23 = vld [vmem:[%s10673_s16 + $0x18] sm:$0xff]  ;;  %v10903_v28 = vld [vmem:[%s10673_s16 + $0x30] sm:$0xff]  ;;  %v9207_v29 = vpack.c.bf16 %v6363_v26, %v6362_v25  ;;  %v10917_v34 = vld [vmem:[%s10673_s16 + $0x48] sm:$0xff] }
  0x50   : > { %v10914_v33 = vld [vmem:[%s10673_s16 + $0x38] sm:$0xff]  ;;  %v6366_v38 = vld [vmem:[%s12466_s1 + $0x140] sm:$0xff]  ;;  %v6367_v39 = vld [vmem:[%s12466_s1 + $0x148] sm:$0xff] }
  0x51   : > { %v10931_v43 = vld [vmem:[%s10673_s16 + $0x60] sm:$0xff]  ;;  %v9215_v44 = vpack.c.bf16 %v6367_v39, %v6366_v38  ;;  %v6369_v48 = vld [vmem:[%s12466_s1 + $0x158] sm:$0xff]  ;;  %v10942_v49 = vld [vmem:[%s10673_s16 + $0x68] sm:$0xff] }
  0x52   : > { %9162 = vmatpush3.bf16.msra.mxu0 %v9159_v21  ;;  %v6361_v21 = vld [vmem:[%s12466_s1 + $0x118] sm:$0xff]  ;;  %v6370_v54 = vld [vmem:[%s12466_s1 + $0x160] sm:$0xff]  ;;  %v10959_v59 = vld [vmem:[%s10673_s16 + $0x90] sm:$0xff] }
  0x53   : > { %9164 = vmatprep.subr.bf16.mxu0 %v9163_v24  ;;  %v10956_v58 = vld [vmem:[%s10673_s16 + $0x80] sm:$0xff]  ;;  %v6372_v63 = vld [vmem:[%s12466_s1 + $0x170] sm:$0xff]  ;;  %v6373_v0 = vld [vmem:[%s12466_s1 + $0x178] sm:$0xff] }
  0x54   : > { %v10987_v25 = vld [vmem:[%s10673_s16 + $0xc0] sm:$0xff]  ;;  %v11008_v38 = vld [vmem:[%s10673_s16 + $0xf8] sm:$0xff]  ;;  %v11011_v39 = vld [vmem:[%s10673_s16 + $0x108] sm:$0xff] }
  0x56   : > { %9166 = vmatpush3.bf16.msra.mxu0 %v9163_v24  ;;  %v9203_v24 = vpack.c.bf16 %v6361_v21, %v6360_v20  ;;  %v9227_v20 = vpack.c.bf16 %v6373_v0, %v6372_v63  ;;  %v6406_v21 = vld [vmem:[%s12466_s1 + $0x180] sm:$0xff]  ;;  %v11043_v63 = vld [vmem:[%s10673_s16 + $0x168] sm:$0xff]  ;;  %v11048_v0 = vld [vmem:[%s10673_s16 + $0x170] sm:$0xff] }
  0x57   : > { %9168 = vmatprep.subr.bf16.mxu0 %v9167_v27 }
  0x59   : > { %7648 = vmatmul.mubr.f32.vlgmr.msra.gmra.mrb[0].mxu0 %v341_v30  ;;  %v6364_v30 = vld [vmem:[%s12466_s1 + $0x130] sm:$0xff] }
  0x5a   : > { %9170 = vmatpush3.bf16.msra.mxu0 %v9167_v27  ;;  %7650 = vmatprep.mubr.f32.mxu0 %v10720_v31  ;;  %v10900_v27 = vld [vmem:[%s10673_s16 + $0x20] sm:$0xff] }
  0x5b   : > { %9172 = vmatprep.subr.bf16.mxu0 %v9171_v32 }
  0x5d   : > { %7651 = vmatmul.mubr.f32.gmra.mrb[2].mxu0 %v10730_v35 }
  0x5e   : > { %7653 = vmatprep.mubr.f32.mxu0 %v10733_v36  ;;  %9174 = vmatpush3.bf16.msra.mxu0 %v9171_v32  ;;  %v6365_v32 = vld [vmem:[%s12466_s1 + $0x138] sm:$0xff] }
  0x5f   : > { %9176 = vmatprep.subr.bf16.mxu0 %v9175_v37 }
  0x61   : > { %7654 = vmatmul.mubr.f32.gmra.mrb[4].mxu0 %v10744_v40 }
  0x62   : > { %7656 = vmatprep.mubr.f32.mxu0 %v10747_v41  ;;  %9178 = vmatpush3.bf16.msra.mxu0 %v9175_v37  ;;  %v9211_v37 = vpack.c.bf16 %v6365_v32, %v6364_v30  ;;  %v10995_v30 = vld [vmem:[%s10673_s16 + $0xd8] sm:$0xff]  ;;  %v11000_v32 = vld [vmem:[%s10673_s16 + $0xe0] sm:$0xff] }
  0x63   : > { %9180 = vmatprep.subr.bf16.mxu0 %v9179_v42 }
  0x65   : > { %7657 = vmatmul.mubr.f32.gmra.mrb[6].mxu0 %v10758_v45 }
  0x66   : > { %7659 = vmatprep.mubr.f32.mxu0 %v10761_v46  ;;  %9182 = vmatpush3.bf16.msra.mxu0 %v9179_v42  ;;  %v10928_v42 = vld [vmem:[%s10673_s16 + $0x50] sm:$0xff] }
  0x67   : > { %9184 = vmatprep.subr.bf16.mxu0 %v9183_v47 }
  0x69   : > { %7660 = vmatmul.mubr.f32.gmra.mrb[8].mxu0 %v10772_v50 }
  0x6a   : > { %7662 = vmatprep.mubr.f32.mxu0 %v10775_v51  ;;  %9186 = vmatpush3.bf16.msra.mxu0 %v9183_v47  ;;  %v6368_v47 = vld [vmem:[%s12466_s1 + $0x150] sm:$0xff] }
  0x6b   : > { %9188 = vmatprep.subr.bf16.mxu0 %v9187_v52  ;;  %v9219_v53 = vpack.c.bf16 %v6369_v48, %v6368_v47  ;;  %v11019_v47 = vld [vmem:[%s10673_s16 + $0x120] sm:$0xff]  ;;  %v11024_v48 = vld [vmem:[%s10673_s16 + $0x128] sm:$0xff] }
  0x6d   : > { %7663 = vmatmul.mubr.f32.gmra.mrb[10].mxu0 %v10786_v55 }
  0x6e   : > { %7665 = vmatprep.mubr.f32.mxu0 %v10789_v56  ;;  %9190 = vmatpush3.bf16.msra.mxu0 %v9187_v52  ;;  %v10945_v52 = vld [vmem:[%s10673_s16 + $0x78] sm:$0xff] }
  0x6f   : > { %9192 = vmatprep.subr.bf16.mxu0 %v9191_v57 }
  0x71   : > { %7666 = vmatmul.mubr.f32.gmra.mrb[12].mxu0 %v10800_v60 }
  0x72   : > { %7668 = vmatprep.mubr.f32.mxu0 %v10803_v61  ;;  %9194 = vmatpush3.bf16.msra.mxu0 %v9191_v57  ;;  %v6371_v57 = vld [vmem:[%s12466_s1 + $0x168] sm:$0xff] }
  0x73   : > { %9196 = vmatprep.subr.bf16.mxu0 %v9195_v62 }
  0x75   : > { %7669 = vmatmul.mubr.f32.gmra.mrb[14].mxu0 %v10814_v1 }
  0x76   : > { %7671 = vmatprep.mubr.f32.mxu0 %v10817_v2  ;;  %9198 = vmatpush3.bf16.msra.mxu0 %v9195_v62  ;;  %v9223_v62 = vpack.c.bf16 %v6371_v57, %v6370_v54  ;;  %v11032_v54 = vld [vmem:[%s10673_s16 + $0x140] sm:$0xff]  ;;  %v11035_v57 = vld [vmem:[%s10673_s16 + $0x150] sm:$0xff] }
  0x77   : > { %9200 = vmatprep.subr.bf16.mxu0 %v9199_v3 }
  0x79   : > { %7672 = vmatmul.mubr.f32.gmra.mrb[16].mxu0 %v10822_v4 }
  0x7a   : > { %7674 = vmatprep.mubr.f32.mxu0 %v10825_v5 }
  0x7d   : > { %7675 = vmatmul.mubr.f32.gmra.mrb[18].mxu0 %v10830_v6 }
  0x7e   : > { %7677 = vmatprep.mubr.f32.mxu0 %v10833_v7 }
  0x81   : > { %7678 = vmatmul.mubr.f32.gmra.mrb[20].mxu0 %v10838_v8 }
  0x82   : > { %7680 = vmatprep.mubr.f32.mxu0 %v10841_v9 }
  0x85   : > { %7681 = vmatmul.mubr.f32.gmra.mrb[22].mxu0 %v10846_v10 }
  0x86   : > { %7683 = vmatprep.mubr.f32.mxu0 %v10849_v11 }
  0x89   : > { %7684 = vmatmul.mubr.f32.gmra.mrb[24].mxu0 %v10854_v12  ;;  %v6413_v12 = vld [vmem:[%s12466_s1 + $0x1b8] sm:$0xff] }
  0x8a   : > { %7686 = vmatprep.mubr.f32.mxu0 %v10857_v13  ;;  %v11070_v13 = vld [vmem:[%s10673_s16 + $0x22] sm:$0xff] }
  0x8b   : > { %12540 = vst [vmem:[#allocation17_spill] sm:$0xff] %v11070_v13 }
  0x8d   : > { %7687 = vmatmul.mubr.f32.gmra.mrb[26].mxu0 %v10862_v14  ;;  %v6411_v14 = vld [vmem:[%s12466_s1 + $0x1a8] sm:$0xff] }
  0x8e   : > { %7689 = vmatprep.mubr.f32.mxu0 %v10865_v15  ;;  %v6410_v15 = vld [vmem:[%s12466_s1 + $0x1a0] sm:$0xff] }
  0x91   : > { %7690 = vmatmul.mubr.f32.gmra.mrb[28].mxu0 %v10870_v16 }
  0x92   : > { %7692 = vmatprep.mubr.f32.mxu0 %v10873_v17  ;;  %v11060_v17 = vld [vmem:[%s10673_s16 + $0x1a] sm:$0xff] }
  0x93   : > { %12539 = vst [vmem:[#allocation16_spill] sm:$0xff] %v11060_v17 }
  0x95   : > { %7693 = vmatmul.mubr.f32.gmra.mrb[30].mxu0 %v10878_v18  ;;  %v840_v18 = vld [vmem:[%s10673_s16 + $0xa] sm:$0xff] }
  0x96   : > { %7727 = vmatprep.mubr.f32.mxu0 %v292_v19  ;;  %v10973_v19 = vld [vmem:[%s10673_s16 + $0xa8] sm:$0xff] }
  0x99   : > { %7728 = vmatmul.mubr.f32.vlgmr.msra.gmra.mrb[0].mxu0 %v293_v22  ;;  %v6407_v22 = vld [vmem:[%s12466_s1 + $0x188] sm:$0xff] }
  0x9a   : > { %9202 = vmatpush3.bf16.msra.mxu0 %v9199_v3  ;;  %7730 = vmatprep.mubr.f32.mxu0 %v10890_v23  ;;  %v10970_v3 = vld [vmem:[%s10673_s16 + $0x98] sm:$0xff]  ;;  %v9231_v26 = vpack.c.bf16 %v6407_v22, %v6406_v21  ;;  %v6408_v21 = vld [vmem:[%s12466_s1 + $0x190] sm:$0xff] }
  0x9b   : > { %9204 = vmatprep.subr.bf16.mxu0 %v9203_v24  ;;  %v6409_v22 = vld [vmem:[%s12466_s1 + $0x198] sm:$0xff] }
  0x9c   : > { %v9235_v16 = vpack.c.bf16 %v6409_v22, %v6408_v21  ;;  %v9239_v21 = vpack.c.bf16 %v6411_v14, %v6410_v15  ;;  %v6412_v22 = vld [vmem:[%s12466_s1 + $0x1b0] sm:$0xff]  ;;  %v6414_v15 = vld [vmem:[%s12466_s1 + $0x1c0] sm:$0xff] }
  0x9d   : > { %7731 = vmatmul.mubr.f32.gmra.mrb[2].mxu0 %v10900_v27  ;;  %v9243_v14 = vpack.c.bf16 %v6413_v12, %v6412_v22  ;;  %v6416_v22 = vld [vmem:[%s12466_s1 + $0x1d0] sm:$0xff] }
  0x9e   : > { %7733 = vmatprep.mubr.f32.mxu0 %v10903_v28  ;;  %9206 = vmatpush3.bf16.msra.mxu0 %v9203_v24  ;;  %v10984_v24 = vld [vmem:[%s10673_s16 + $0xb0] sm:$0xff] }
  0x9f   : > { %9208 = vmatprep.subr.bf16.mxu0 %v9207_v29 }
  0xa1   : > { %7734 = vmatmul.mubr.f32.gmra.mrb[4].mxu0 %v10914_v33 }
  0xa2   : > { %7736 = vmatprep.mubr.f32.mxu0 %v10917_v34  ;;  %9210 = vmatpush3.bf16.msra.mxu0 %v9207_v29  ;;  %v10992_v29 = vld [vmem:[%s10673_s16 + $0xc8] sm:$0xff] }
  0xa3   : > { %9212 = vmatprep.subr.bf16.mxu0 %v9211_v37 }
  0xa5   : > { %7737 = vmatmul.mubr.f32.gmra.mrb[6].mxu0 %v10928_v42 }
  0xa6   : > { %7739 = vmatprep.mubr.f32.mxu0 %v10931_v43  ;;  %9214 = vmatpush3.bf16.msra.mxu0 %v9211_v37  ;;  %v11003_v37 = vld [vmem:[%s10673_s16 + $0xf0] sm:$0xff] }
  0xa7   : > { %9216 = vmatprep.subr.bf16.mxu0 %v9215_v44 }
  0xa9   : > { %7740 = vmatmul.mubr.f32.gmra.mrb[8].mxu0 %v10942_v49 }
  0xaa   : > { %7742 = vmatprep.mubr.f32.mxu0 %v10945_v52  ;;  %9218 = vmatpush3.bf16.msra.mxu0 %v9215_v44  ;;  %v11016_v44 = vld [vmem:[%s10673_s16 + $0x110] sm:$0xff] }
  0xab   : > { %9220 = vmatprep.subr.bf16.mxu0 %v9219_v53 }
  0xad   : > { %7743 = vmatmul.mubr.f32.gmra.mrb[10].mxu0 %v10956_v58 }
  0xae   : > { %7745 = vmatprep.mubr.f32.mxu0 %v10959_v59  ;;  %9222 = vmatpush3.bf16.msra.mxu0 %v9219_v53  ;;  %v11027_v53 = vld [vmem:[%s10673_s16 + $0x138] sm:$0xff] }
  0xaf   : > { %9224 = vmatprep.subr.bf16.mxu0 %v9223_v62 }
  0xb1   : > { %7746 = vmatmul.mubr.f32.gmra.mrb[12].mxu0 %v10970_v3 }
  0xb2   : > { %7748 = vmatprep.mubr.f32.mxu0 %v10973_v19  ;;  %9226 = vmatpush3.bf16.msra.mxu0 %v9223_v62  ;;  %v11040_v62 = vld [vmem:[%s10673_s16 + $0x158] sm:$0xff] }
  0xb3   : > { %9228 = vmatprep.subr.bf16.mxu0 %v9227_v20 }
  0xb5   : > { %7749 = vmatmul.mubr.f32.gmra.mrb[14].mxu0 %v10984_v24 }
  0xb6   : > { %7751 = vmatprep.mubr.f32.mxu0 %v10987_v25  ;;  %9230 = vmatpush3.bf16.msra.mxu0 %v9227_v20  ;;  %v839_v20 = vld [vmem:[%s10673_s16 + $0x2] sm:$0xff] }
  0xb7   : > { %9232 = vmatprep.subr.bf16.mxu0 %v9231_v26 }
  0xb9   : > { %7752 = vmatmul.mubr.f32.gmra.mrb[16].mxu0 %v10992_v29 }
  0xba   : > { %7754 = vmatprep.mubr.f32.mxu0 %v10995_v30 }
  0xbd   : > { %7755 = vmatmul.mubr.f32.gmra.mrb[18].mxu0 %v11000_v32 }
  0xbe   : > { %7757 = vmatprep.mubr.f32.mxu0 %v11003_v37 }
  0xc1   : > { %7758 = vmatmul.mubr.f32.gmra.mrb[20].mxu0 %v11008_v38 }
  0xc2   : > { %7760 = vmatprep.mubr.f32.mxu0 %v11011_v39 }
  0xc5   : > { %7761 = vmatmul.mubr.f32.gmra.mrb[22].mxu0 %v11016_v44 }
  0xc6   : > { %7763 = vmatprep.mubr.f32.mxu0 %v11019_v47 }
  0xc9   : > { %7764 = vmatmul.mubr.f32.gmra.mrb[24].mxu0 %v11024_v48 }
  0xca   : > { %7766 = vmatprep.mubr.f32.mxu0 %v11027_v53 }
  0xcd   : > { %7767 = vmatmul.mubr.f32.gmra.mrb[26].mxu0 %v11032_v54 }
  0xce   : > { %7769 = vmatprep.mubr.f32.mxu0 %v11035_v57 }
  0xd1   : > { %7770 = vmatmul.mubr.f32.gmra.mrb[28].mxu0 %v11040_v62 }
  0xd2   : > { %7772 = vmatprep.mubr.f32.mxu0 %v11043_v63 }
  0xd5   : > { %7773 = vmatmul.mubr.f32.gmra.mrb[30].mxu0 %v11048_v0 }
  0xd6   : > { %7807 = vmatprep.mubr.f32.mxu0 %v839_v20  ;;  %v11073_v20 = vld [vmem:[%s10673_s16 + $0x32] sm:$0xff] }
  0xd7   : > { %12541 = vst [vmem:[#allocation18_spill] sm:$0xff] %v11073_v20 }
  0xd9   : > { %7808 = vmatmul.mubr.f32.vlgmr.msra.gmra.mrb[0].mxu0 %v840_v18  ;;  %v11084_v18 = vld [vmem:[%s10673_s16 + $0x3a] sm:$0xff] }
  0xda   : > { %9234 = vmatpush3.bf16.msra.mxu0 %v9231_v26  ;;  %7810 = vmatprep.mubr.f32.mxu0 %v11060_v17  ;;  %12542 = vst [vmem:[#allocation19_spill] sm:$0xff] %v11084_v18  ;;  %v11087_v26 = vld [vmem:[%s10673_s16 + $0x4a] sm:$0xff] }
  0xdb   : > { %9236 = vmatprep.subr.bf16.mxu0 %v9235_v16  ;;  %12543 = vst [vmem:[#allocation20_spill] sm:$0xff] %v11087_v26  ;;  %v6415_v17 = vld [vmem:[%s12466_s1 + $0x1c8] sm:$0xff] }
  0xdc   : > { %v9247_v12 = vpack.c.bf16 %v6415_v17, %v6414_v15  ;;  %v6418_v15 = vld [vmem:[%s12466_s1 + $0x1e0] sm:$0xff] }
  0xdd   : > { %7811 = vmatmul.mubr.f32.gmra.mrb[2].mxu0 %v11070_v13  ;;  %v6417_v13 = vld [vmem:[%s12466_s1 + $0x1d8] sm:$0xff] }
  0xde   : > { %7813 = vmatprep.mubr.f32.mxu0 %v11073_v20  ;;  %9238 = vmatpush3.bf16.msra.mxu0 %v9235_v16  ;;  %v11098_v20 = vld [vmem:[%s10673_s16 + $0x52] sm:$0xff]  ;;  %v11101_v16 = vld [vmem:[%s10673_s16 + $0x62] sm:$0xff]  ;;  %v9251_v17 = vpack.c.bf16 %v6417_v13, %v6416_v22 }
  0xdf   : > { %9240 = vmatprep.subr.bf16.mxu0 %v9239_v21  ;;  %12544 = vst [vmem:[#allocation21_spill] sm:$0xff] %v11098_v20  ;;  %12545 = vst [vmem:[#allocation22_spill] sm:$0xff] %v11101_v16  ;;  %v6420_v22 = vld [vmem:[%s12466_s1 + $0x1f0] sm:$0xff] }
  0xe1   : > { %7814 = vmatmul.mubr.f32.gmra.mrb[4].mxu0 %v11084_v18  ;;  %v6419_v18 = vld [vmem:[%s12466_s1 + $0x1e8] sm:$0xff] }
  0xe2   : > { %7816 = vmatprep.mubr.f32.mxu0 %v11087_v26  ;;  %9242 = vmatpush3.bf16.msra.mxu0 %v9239_v21  ;;  %v11112_v26 = vld [vmem:[%s10673_s16 + $0x6a] sm:$0xff]  ;;  %v11115_v21 = vld [vmem:[%s10673_s16 + $0x7a] sm:$0xff]  ;;  %v9255_v13 = vpack.c.bf16 %v6419_v18, %v6418_v15 }
  0xe3   : > { %9244 = vmatprep.subr.bf16.mxu0 %v9243_v14  ;;  %12546 = vst [vmem:[#allocation23_spill] sm:$0xff] %v11112_v26  ;;  %12547 = vst [vmem:[#allocation24_spill] sm:$0xff] %v11115_v21  ;;  %v6454_v15 = vld [vmem:[%s12466_s1 + $0x200] sm:$0xff] }
  0xe5   : > { %7817 = vmatmul.mubr.f32.gmra.mrb[6].mxu0 %v11098_v20  ;;  %v6421_v20 = vld [vmem:[%s12466_s1 + $0x1f8] sm:$0xff] }
  0xe6   : > { %7819 = vmatprep.mubr.f32.mxu0 %v11101_v16  ;;  %9246 = vmatpush3.bf16.msra.mxu0 %v9243_v14  ;;  %v11126_v16 = vld [vmem:[%s10673_s16 + $0x82] sm:$0xff]  ;;  %v11129_v14 = vld [vmem:[%s10673_s16 + $0x92] sm:$0xff]  ;;  %v9259_v18 = vpack.c.bf16 %v6421_v20, %v6420_v22  ;;  %v11162_v22 = vld [vmem:[%s10673_s16 + $0xca] sm:$0xff] }
  0xe7   : > { %9248 = vmatprep.subr.bf16.mxu0 %v9247_v12  ;;  %12548 = vst [vmem:[#allocation25_spill] sm:$0xff] %v11129_v14  ;;  %12551 = vst [vmem:[#allocation28_spill] sm:$0xff] %v11162_v22 }
  0xe9   : > { %7820 = vmatmul.mubr.f32.gmra.mrb[8].mxu0 %v11112_v26  ;;  %v6455_v26 = vld [vmem:[%s12466_s1 + $0x208] sm:$0xff] }
  0xea   : > { %7822 = vmatprep.mubr.f32.mxu0 %v11115_v21  ;;  %9250 = vmatpush3.bf16.msra.mxu0 %v9247_v12  ;;  %v11140_v21 = vld [vmem:[%s10673_s16 + $0x9a] sm:$0xff]  ;;  %v11143_v12 = vld [vmem:[%s10673_s16 + $0xaa] sm:$0xff]  ;;  %v9263_v20 = vpack.c.bf16 %v6455_v26, %v6454_v15  ;;  %v11173_v26 = vld [vmem:[%s10673_s16 + $0xf2] sm:$0xff] }
  0xeb   : > { %9252 = vmatprep.subr.bf16.mxu0 %v9251_v17  ;;  %12549 = vst [vmem:[#allocation26_spill] sm:$0xff] %v11140_v21  ;;  %12554 = vst [vmem:[#allocation31_spill] sm:$0xff] %v11173_v26  ;;  %v11181_v15 = vld [vmem:[%s10673_s16 + $0x10a] sm:$0xff] }
  0xec   : > { %12556 = vst [vmem:[#allocation33_spill] sm:$0xff] %v11181_v15 }
  0xed   : > { %7823 = vmatmul.mubr.f32.gmra.mrb[10].mxu0 %v11126_v16 }
  0xee   : > { %7825 = vmatprep.mubr.f32.mxu0 %v11129_v14  ;;  %9254 = vmatpush3.bf16.msra.mxu0 %v9251_v17  ;;  %v11154_v17 = vld [vmem:[%s10673_s16 + $0xb2] sm:$0xff]  ;;  %v11157_v14 = vld [vmem:[%s10673_s16 + $0xc2] sm:$0xff] }
  0xef   : > { %9256 = vmatprep.subr.bf16.mxu0 %v9255_v13  ;;  %12550 = vst [vmem:[#allocation27_spill] sm:$0xff] %v11157_v14 }
  0xf1   : > { %7826 = vmatmul.mubr.f32.gmra.mrb[12].mxu0 %v11140_v21  ;;  %v11165_v21 = vld [vmem:[%s10673_s16 + $0xda] sm:$0xff] }
  0xf2   : > { %7828 = vmatprep.mubr.f32.mxu0 %v11143_v12  ;;  %9258 = vmatpush3.bf16.msra.mxu0 %v9255_v13  ;;  %12552 = vst [vmem:[#allocation29_spill] sm:$0xff] %v11165_v21  ;;  %v11170_v13 = vld [vmem:[%s10673_s16 + $0xe2] sm:$0xff] }
  0xf3   : > { %9260 = vmatprep.subr.bf16.mxu0 %v9259_v18  ;;  %12553 = vst [vmem:[#allocation30_spill] sm:$0xff] %v11170_v13 }
  0xf5   : > { %7829 = vmatmul.mubr.f32.gmra.mrb[14].mxu0 %v11154_v17 }
  0xf6   : > { %7831 = vmatprep.mubr.f32.mxu0 %v11157_v14  ;;  %9262 = vmatpush3.bf16.msra.mxu0 %v9259_v18  ;;  %v11178_v18 = vld [vmem:[%s10673_s16 + $0xfa] sm:$0xff] }
  0xf7   : > { %9264 = vmatprep.subr.bf16.mxu0 %v9263_v20  ;;  %12555 = vst [vmem:[#allocation32_spill] sm:$0xff] %v11178_v18  ;;  %v11210_v14 = vld [vmem:[%s10673_s16 + $0x15a] sm:$0xff] }
  0xf8   : > { %12563 = vst [vmem:[#allocation40_spill] sm:$0xff] %v11210_v14 }
  0xf9   : > { %7832 = vmatmul.mubr.f32.gmra.mrb[16].mxu0 %v11162_v22  ;;  %v11189_v22 = vld [vmem:[%s10673_s16 + $0x122] sm:$0xff] }
  0xfa   : > { %7834 = vmatprep.mubr.f32.mxu0 %v11165_v21  ;;  %v11186_v21 = vld [vmem:[%s10673_s16 + $0x112] sm:$0xff]  ;;  %12558 = vst [vmem:[#allocation35_spill] sm:$0xff] %v11189_v22 }
  0xfb   : > { %12557 = vst [vmem:[#allocation34_spill] sm:$0xff] %v11186_v21 }
  0xfd   : > { %7835 = vmatmul.mubr.f32.gmra.mrb[18].mxu0 %v11170_v13  ;;  %v11197_v13 = vld [vmem:[%s10673_s16 + $0x13a] sm:$0xff] }
  0xfe   : > { %7837 = vmatprep.mubr.f32.mxu0 %v11173_v26  ;;  %v11194_v26 = vld [vmem:[%s10673_s16 + $0x12a] sm:$0xff]  ;;  %12560 = vst [vmem:[#allocation37_spill] sm:$0xff] %v11197_v13 }
  0xff   : > { %12559 = vst [vmem:[#allocation36_spill] sm:$0xff] %v11194_v26 }
 0x101   : > { %7838 = vmatmul.mubr.f32.gmra.mrb[20].mxu0 %v11178_v18  ;;  %v11202_v18 = vld [vmem:[%s10673_s16 + $0x142] sm:$0xff] }
 0x102   : > { %7840 = vmatprep.mubr.f32.mxu0 %v11181_v15  ;;  %12561 = vst [vmem:[#allocation38_spill] sm:$0xff] %v11202_v18  ;;  %v11205_v15 = vld [vmem:[%s10673_s16 + $0x152] sm:$0xff] }
 0x103   : > { %12562 = vst [vmem:[#allocation39_spill] sm:$0xff] %v11205_v15 }
 0x105   : > { %7841 = vmatmul.mubr.f32.gmra.mrb[22].mxu0 %v11186_v21  ;;  %v11213_v21 = vld [vmem:[%s10673_s16 + $0x16a] sm:$0xff] }
 0x106   : > { %7843 = vmatprep.mubr.f32.mxu0 %v11189_v22  ;;  %12564 = vst [vmem:[#allocation41_spill] sm:$0xff] %v11213_v21  ;;  %v11218_v22 = vld [vmem:[%s10673_s16 + $0x172] sm:$0xff] }
 0x109   : > { %7844 = vmatmul.mubr.f32.gmra.mrb[24].mxu0 %v11194_v26 }
 0x10a   : > { %7846 = vmatprep.mubr.f32.mxu0 %v11197_v13  ;;  %v6456_v13 = vld [vmem:[%s12466_s1 + $0x210] sm:$0xff] }
 0x10d   : > { %7847 = vmatmul.mubr.f32.gmra.mrb[26].mxu0 %v11202_v18  ;;  %v6457_v18 = vld [vmem:[%s12466_s1 + $0x218] sm:$0xff] }
 0x10e   : > { %7849 = vmatprep.mubr.f32.mxu0 %v11205_v15  ;;  %v9267_v15 = vpack.c.bf16 %v6457_v18, %v6456_v13  ;;  %v6461_v13 = vld [vmem:[%s12466_s1 + $0x238] sm:$0xff]  ;;  %v6464_v18 = vld [vmem:[%s12466_s1 + $0x250] sm:$0xff] }
 0x111   : > { %7850 = vmatmul.mubr.f32.gmra.mrb[28].mxu0 %v11210_v14  ;;  %v6458_v14 = vld [vmem:[%s12466_s1 + $0x220] sm:$0xff] }
 0x112   : > { %7852 = vmatprep.mubr.f32.mxu0 %v11213_v21  ;;  %v6459_v21 = vld [vmem:[%s12466_s1 + $0x228] sm:$0xff] }
 0x113   : > { %v9271_v26 = vpack.c.bf16 %v6459_v21, %v6458_v14  ;;  %v6463_v21 = vld [vmem:[%s12466_s1 + $0x248] sm:$0xff] }
 0x115   : > { %7853 = vmatmul.mubr.f32.gmra.mrb[30].mxu0 %v11218_v22 }
 0x116   : > { %7887 = vmatprep.mubr.f32.mxu0 %v10890_v23  ;;  %v6460_v23 = vld [vmem:[%s12466_s1 + $0x230] sm:$0xff] }
 0x119   : > { %7888 = vmatmul.mubr.f32.vlgmr.msra.gmra.mrb[0].mxu0 %v10900_v27  ;;  %v9275_v27 = vpack.c.bf16 %v6461_v13, %v6460_v23  ;;  %v6467_v13 = vld [vmem:[%s12466_s1 + $0x268] sm:$0xff] }
 0x11a   : > { %9266 = vmatpush3.bf16.msra.mxu0 %v9263_v20  ;;  %7890 = vmatprep.mubr.f32.mxu0 %v10903_v28  ;;  %v6462_v20 = vld [vmem:[%s12466_s1 + $0x240] sm:$0xff] }
 0x11b   : > { %9268 = vmatprep.subr.bf16.mxu0 %v9267_v15  ;;  %v9279_v14 = vpack.c.bf16 %v6463_v21, %v6462_v20  ;;  %v6469_v21 = vld [vmem:[%s12466_s1 + $0x278] sm:$0xff] }
 0x11d   : > { %7891 = vmatmul.mubr.f32.gmra.mrb[2].mxu0 %v10914_v33 }
 0x11e   : > { %7893 = vmatprep.mubr.f32.mxu0 %v10917_v34  ;;  %9270 = vmatpush3.bf16.msra.mxu0 %v9267_v15  ;;  %v6465_v15 = vld [vmem:[%s12466_s1 + $0x258] sm:$0xff] }
 0x11f   : > { %9272 = vmatprep.subr.bf16.mxu0 %v9271_v26  ;;  %v9283_v23 = vpack.c.bf16 %v6465_v15, %v6464_v18  ;;  %v6503_v15 = vld [vmem:[%s12466_s1 + $0x288] sm:$0xff] }
 0x121   : > { %7894 = vmatmul.mubr.f32.gmra.mrb[4].mxu0 %v10928_v42 }
 0x122   : > { %7896 = vmatprep.mubr.f32.mxu0 %v10931_v43  ;;  %9274 = vmatpush3.bf16.msra.mxu0 %v9271_v26  ;;  %v6466_v26 = vld [vmem:[%s12466_s1 + $0x260] sm:$0xff] }
 0x123   : > { %9276 = vmatprep.subr.bf16.mxu0 %v9275_v27  ;;  %v9287_v20 = vpack.c.bf16 %v6467_v13, %v6466_v26  ;;  %v11304_v13 = vld [vmem:[%s10673_s16 + $0x188] sm:$0xff] }
 0x125   : > { %7897 = vmatmul.mubr.f32.gmra.mrb[6].mxu0 %v10942_v49 }
 0x126   : > { %7899 = vmatprep.mubr.f32.mxu0 %v10945_v52  ;;  %9278 = vmatpush3.bf16.msra.mxu0 %v9275_v27  ;;  %v6468_v27 = vld [vmem:[%s12466_s1 + $0x270] sm:$0xff] }
 0x127   : > { %9280 = vmatprep.subr.bf16.mxu0 %v9279_v14  ;;  %v9291_v18 = vpack.c.bf16 %v6469_v21, %v6468_v27  ;;  %v6505_v27 = vld [vmem:[%s12466_s1 + $0x298] sm:$0xff] }
 0x129   : > { %7900 = vmatmul.mubr.f32.gmra.mrb[8].mxu0 %v10956_v58 }
 0x12a   : > { %7902 = vmatprep.mubr.f32.mxu0 %v10959_v59  ;;  %9282 = vmatpush3.bf16.msra.mxu0 %v9279_v14  ;;  %v6502_v14 = vld [vmem:[%s12466_s1 + $0x280] sm:$0xff] }
 0x12b   : > { %9284 = vmatprep.subr.bf16.mxu0 %v9283_v23  ;;  %v9295_v26 = vpack.c.bf16 %v6503_v15, %v6502_v14  ;;  %v6507_v14 = vld [vmem:[%s12466_s1 + $0x2a8] sm:$0xff] }
 0x12d   : > { %7903 = vmatmul.mubr.f32.gmra.mrb[10].mxu0 %v10970_v3 }
 0x12e   : > { %7905 = vmatprep.mubr.f32.mxu0 %v10973_v19  ;;  %9286 = vmatpush3.bf16.msra.mxu0 %v9283_v23  ;;  %v11299_v23 = vld [vmem:[%s10673_s16 + $0x180] sm:$0xff] }
 0x12f   : > { %9288 = vmatprep.subr.bf16.mxu0 %v9287_v20 }
 0x131   : > { %7906 = vmatmul.mubr.f32.gmra.mrb[12].mxu0 %v10984_v24 }
 0x132   : > { %7908 = vmatprep.mubr.f32.mxu0 %v10987_v25  ;;  %9290 = vmatpush3.bf16.msra.mxu0 %v9287_v20  ;;  %v6504_v20 = vld [vmem:[%s12466_s1 + $0x290] sm:$0xff] }
 0x133   : > { %9292 = vmatprep.subr.bf16.mxu0 %v9291_v18  ;;  %v9299_v21 = vpack.c.bf16 %v6505_v27, %v6504_v20  ;;  %v6509_v20 = vld [vmem:[%s12466_s1 + $0x2b8] sm:$0xff] }
 0x134   : > { %v6513_v27 = vld [vmem:[%s12466_s1 + $0x2d8] sm:$0xff] }
 0x135   : > { %7909 = vmatmul.mubr.f32.gmra.mrb[14].mxu0 %v10992_v29 }
 0x136   : > { %7911 = vmatprep.mubr.f32.mxu0 %v10995_v30  ;;  %9294 = vmatpush3.bf16.msra.mxu0 %v9291_v18  ;;  %v6506_v18 = vld [vmem:[%s12466_s1 + $0x2a0] sm:$0xff] }
 0x137   : > { %9296 = vmatprep.subr.bf16.mxu0 %v9295_v26  ;;  %v9303_v15 = vpack.c.bf16 %v6507_v14, %v6506_v18  ;;  %v6517_v18 = vld [vmem:[%s12466_s1 + $0x2f8] sm:$0xff]  ;;  %v6551_v14 = vld [vmem:[%s12466_s1 + $0x308] sm:$0xff] }
 0x139   : > { %7912 = vmatmul.mubr.f32.gmra.mrb[16].mxu0 %v11000_v32 }
 0x13a   : > { %7914 = vmatprep.mubr.f32.mxu0 %v11003_v37 }
 0x13d   : > { %7915 = vmatmul.mubr.f32.gmra.mrb[18].mxu0 %v11008_v38 }
 0x13e   : > { %7917 = vmatprep.mubr.f32.mxu0 %v11011_v39 }
 0x141   : > { %7918 = vmatmul.mubr.f32.gmra.mrb[20].mxu0 %v11016_v44 }
 0x142   : > { %7920 = vmatprep.mubr.f32.mxu0 %v11019_v47 }
 0x145   : > { %7921 = vmatmul.mubr.f32.gmra.mrb[22].mxu0 %v11024_v48 }
 0x146   : > { %7923 = vmatprep.mubr.f32.mxu0 %v11027_v53 }
 0x149   : > { %7924 = vmatmul.mubr.f32.gmra.mrb[24].mxu0 %v11032_v54 }
 0x14a   : > { %7926 = vmatprep.mubr.f32.mxu0 %v11035_v57 }
 0x14d   : > { %7927 = vmatmul.mubr.f32.gmra.mrb[26].mxu0 %v11040_v62 }
 0x14e   : > { %7929 = vmatprep.mubr.f32.mxu0 %v11043_v63 }
 0x151   : > { %7930 = vmatmul.mubr.f32.gmra.mrb[28].mxu0 %v11048_v0 }
 0x152   : > { %7932 = vmatprep.mubr.f32.mxu0 %v11299_v23 }
 0x155   : > { %7933 = vmatmul.mubr.f32.gmra.mrb[30].mxu0 %v11304_v13 }
 0x156   : > { %7967 = vmatprep.mubr.f32.mxu0 %v10720_v31  ;;  %v6508_v31 = vld [vmem:[%s12466_s1 + $0x2b0] sm:$0xff] }
 0x159   : > { %7968 = vmatmul.mubr.f32.vlgmr.msra.gmra.mrb[0].mxu0 %v10730_v35  ;;  %v9307_v35 = vpack.c.bf16 %v6509_v20, %v6508_v31  ;;  %v6554_v20 = vld [vmem:[%s12466_s1 + $0x320] sm:$0xff] }
 0x15a   : > { %9298 = vmatpush3.bf16.msra.mxu0 %v9295_v26  ;;  %7970 = vmatprep.mubr.f32.mxu0 %v10733_v36  ;;  %v6510_v36 = vld [vmem:[%s12466_s1 + $0x2c0] sm:$0xff]  ;;  %v6511_v26 = vld [vmem:[%s12466_s1 + $0x2c8] sm:$0xff] }
 0x15b   : > { %9300 = vmatprep.subr.bf16.mxu0 %v9299_v21 }
 0x15d   : > { %7971 = vmatmul.mubr.f32.gmra.mrb[2].mxu0 %v10744_v40  ;;  %v9311_v40 = vpack.c.bf16 %v6511_v26, %v6510_v36  ;;  %v12573_v36 = vld [vmem:[#allocation17_spill] sm:$0xff]  ;;  %v12574_v26 = vld [vmem:[#allocation18_spill] sm:$0xff] }
 0x15e   : > { %7973 = vmatprep.mubr.f32.mxu0 %v10747_v41  ;;  %9302 = vmatpush3.bf16.msra.mxu0 %v9299_v21  ;;  %v6512_v41 = vld [vmem:[%s12466_s1 + $0x2d0] sm:$0xff]  ;;  %v6515_v21 = vld [vmem:[%s12466_s1 + $0x2e8] sm:$0xff] }
 0x15f   : > { %9304 = vmatprep.subr.bf16.mxu0 %v9303_v15 }
 0x161   : > { %7974 = vmatmul.mubr.f32.gmra.mrb[4].mxu0 %v10758_v45  ;;  %v9315_v45 = vpack.c.bf16 %v6513_v27, %v6512_v41  ;;  %v6556_v41 = vld [vmem:[%s12466_s1 + $0x330] sm:$0xff]  ;;  %v6557_v27 = vld [vmem:[%s12466_s1 + $0x338] sm:$0xff] }
 0x162   : > { %7976 = vmatprep.mubr.f32.mxu0 %v10761_v46  ;;  %9306 = vmatpush3.bf16.msra.mxu0 %v9303_v15  ;;  %v6514_v46 = vld [vmem:[%s12466_s1 + $0x2e0] sm:$0xff]  ;;  %v12572_v15 = vld [vmem:[#allocation16_spill] sm:$0xff] }
 0x163   : > { %9308 = vmatprep.subr.bf16.mxu0 %v9307_v35 }
 0x165   : > { %7977 = vmatmul.mubr.f32.gmra.mrb[6].mxu0 %v10772_v50  ;;  %v9319_v50 = vpack.c.bf16 %v6515_v21, %v6514_v46  ;;  %v12576_v46 = vld [vmem:[#allocation20_spill] sm:$0xff]  ;;  %v9339_v21 = vpack.c.bf16 %v6557_v27, %v6556_v41  ;;  %v12587_v41 = vld [vmem:[#allocation31_spill] sm:$0xff] }
 0x166   : > { %7979 = vmatprep.mubr.f32.mxu0 %v10775_v51  ;;  %9310 = vmatpush3.bf16.msra.mxu0 %v9307_v35  ;;  %v6516_v51 = vld [vmem:[%s12466_s1 + $0x2f0] sm:$0xff]  ;;  %v6555_v35 = vld [vmem:[%s12466_s1 + $0x328] sm:$0xff] }
 0x167   : > { %9312 = vmatprep.subr.bf16.mxu0 %v9311_v40  ;;  %v12588_v27 = vld [vmem:[#allocation32_spill] sm:$0xff] }
 0x169   : > { %7980 = vmatmul.mubr.f32.gmra.mrb[8].mxu0 %v10786_v55  ;;  %v9323_v55 = vpack.c.bf16 %v6517_v18, %v6516_v51  ;;  %v6559_v51 = vld [vmem:[%s12466_s1 + $0x348] sm:$0xff]  ;;  %v12577_v18 = vld [vmem:[#allocation21_spill] sm:$0xff] }
 0x16a   : > { %7982 = vmatprep.mubr.f32.mxu0 %v10789_v56  ;;  %9314 = vmatpush3.bf16.msra.mxu0 %v9311_v40  ;;  %v6550_v56 = vld [vmem:[%s12466_s1 + $0x300] sm:$0xff]  ;;  %v9335_v40 = vpack.c.bf16 %v6555_v35, %v6554_v20  ;;  %v6599_v20 = vld [vmem:[%s12466_s1 + $0x388] sm:$0xff] }
 0x16b   : > { %9316 = vmatprep.subr.bf16.mxu0 %v9315_v45  ;;  %v12583_v35 = vld [vmem:[#allocation27_spill] sm:$0xff] }
 0x16d   : > { %7983 = vmatmul.mubr.f32.gmra.mrb[10].mxu0 %v10800_v60  ;;  %v9327_v60 = vpack.c.bf16 %v6551_v14, %v6550_v56  ;;  %v6560_v14 = vld [vmem:[%s12466_s1 + $0x350] sm:$0xff] }
 0x16e   : > { %7985 = vmatprep.mubr.f32.mxu0 %v10803_v61  ;;  %9318 = vmatpush3.bf16.msra.mxu0 %v9315_v45  ;;  %v12565_v61 = vld [vmem:[#allocation9_spill] sm:$0xff]  ;;  %v12575_v45 = vld [vmem:[#allocation19_spill] sm:$0xff] }
 0x16f   : > { %9320 = vmatprep.subr.bf16.mxu0 %v9319_v50 }
 0x171   : > { %7986 = vmatmul.mubr.f32.gmra.mrb[12].mxu0 %v10814_v1  ;;  %v12566_v1 = vld [vmem:[#allocation10_spill] sm:$0xff] }
 0x172   : > { %7988 = vmatprep.mubr.f32.mxu0 %v10817_v2  ;;  %9322 = vmatpush3.bf16.msra.mxu0 %v9319_v50  ;;  %v12567_v2 = vld [vmem:[#allocation11_spill] sm:$0xff] }
 0x173   : > { %9324 = vmatprep.subr.bf16.mxu0 %v9323_v55  ;;  %v6558_v50 = vld [vmem:[%s12466_s1 + $0x340] sm:$0xff] }
 0x174   : > { %v9343_v56 = vpack.c.bf16 %v6559_v51, %v6558_v50  ;;  %v12593_v50 = vld [vmem:[#allocation37_spill] sm:$0xff]  ;;  %v12594_v51 = vld [vmem:[#allocation38_spill] sm:$0xff] }
 0x175   : > { %7989 = vmatmul.mubr.f32.gmra.mrb[14].mxu0 %v10822_v4  ;;  %v12568_v4 = vld [vmem:[#allocation12_spill] sm:$0xff] }
 0x176   : > { %7991 = vmatprep.mubr.f32.mxu0 %v10825_v5  ;;  %9326 = vmatpush3.bf16.msra.mxu0 %v9323_v55  ;;  %v12569_v5 = vld [vmem:[#allocation13_spill] sm:$0xff]  ;;  %v12578_v55 = vld [vmem:[#allocation22_spill] sm:$0xff] }
 0x177   : > { %9328 = vmatprep.subr.bf16.mxu0 %v9327_v60 }
 0x179   : > { %7992 = vmatmul.mubr.f32.gmra.mrb[16].mxu0 %v10830_v6  ;;  %v12570_v6 = vld [vmem:[#allocation14_spill] sm:$0xff] }
 0x17a   : > { %7994 = vmatprep.mubr.f32.mxu0 %v10833_v7  ;;  %v11385_v7 = vld [vmem:[%s10673_s16 + $0x181] sm:$0xff] }
 0x17d   : > { %7995 = vmatmul.mubr.f32.gmra.mrb[18].mxu0 %v10838_v8  ;;  %v12571_v8 = vld [vmem:[#allocation15_spill] sm:$0xff] }
 0x17e   : > { %7997 = vmatprep.mubr.f32.mxu0 %v10841_v9  ;;  %v11390_v9 = vld [vmem:[%s10673_s16 + $0x189] sm:$0xff] }
 0x181   : > { %7998 = vmatmul.mubr.f32.gmra.mrb[20].mxu0 %v10846_v10  ;;  %v6552_v10 = vld [vmem:[%s12466_s1 + $0x310] sm:$0xff] }
 0x182   : > { %8000 = vmatprep.mubr.f32.mxu0 %v10849_v11  ;;  %v6553_v11 = vld [vmem:[%s12466_s1 + $0x318] sm:$0xff] }
 0x183   : > { %v9331_v31 = vpack.c.bf16 %v6553_v11, %v6552_v10  ;;  %v6564_v10 = vld [vmem:[%s12466_s1 + $0x370] sm:$0xff]  ;;  %v6565_v11 = vld [vmem:[%s12466_s1 + $0x378] sm:$0xff] }
 0x185   : > { %8001 = vmatmul.mubr.f32.gmra.mrb[22].mxu0 %v12565_v61  ;;  %v12579_v61 = vld [vmem:[#allocation23_spill] sm:$0xff] }
 0x186   : > { %8003 = vmatprep.mubr.f32.mxu0 %v12566_v1  ;;  %v12580_v1 = vld [vmem:[#allocation24_spill] sm:$0xff] }
 0x189   : > { %8004 = vmatmul.mubr.f32.gmra.mrb[24].mxu0 %v12567_v2 }
 0x18a   : > { %8006 = vmatprep.mubr.f32.mxu0 %v12568_v4  ;;  %v6562_v4 = vld [vmem:[%s12466_s1 + $0x360] sm:$0xff] }
 0x18d   : > { %8007 = vmatmul.mubr.f32.gmra.mrb[26].mxu0 %v12569_v5  ;;  %v6563_v5 = vld [vmem:[%s12466_s1 + $0x368] sm:$0xff] }
 0x18e   : > { %8009 = vmatprep.mubr.f32.mxu0 %v12570_v6  ;;  %v12581_v6 = vld [vmem:[#allocation25_spill] sm:$0xff] }
 0x191   : > { %8010 = vmatmul.mubr.f32.gmra.mrb[28].mxu0 %v12571_v8  ;;  %v9351_v8 = vpack.c.bf16 %v6563_v5, %v6562_v4  ;;  %v6603_v4 = vld [vmem:[%s12466_s1 + $0x3a8] sm:$0xff] }
 0x192   : > { %8012 = vmatprep.mubr.f32.mxu0 %v11385_v7 }
 0x195   : > { %8013 = vmatmul.mubr.f32.gmra.mrb[30].mxu0 %v11390_v9 }
 0x196   : > { %8047 = vmatprep.mubr.f32.mxu0 %v12572_v15  ;;  %v12582_v15 = vld [vmem:[#allocation26_spill] sm:$0xff] }
 0x199   : > { %8048 = vmatmul.mubr.f32.vlgmr.msra.gmra.mrb[0].mxu0 %v12573_v36 }
 0x19a   : > { %9330 = vmatpush3.bf16.msra.mxu0 %v9327_v60  ;;  %8050 = vmatprep.mubr.f32.mxu0 %v12574_v26  ;;  %v6561_v60 = vld [vmem:[%s12466_s1 + $0x358] sm:$0xff]  ;;  %v12584_v26 = vld [vmem:[#allocation28_spill] sm:$0xff] }
 0x19b   : > { %9332 = vmatprep.subr.bf16.mxu0 %v9331_v31  ;;  %v9347_v2 = vpack.c.bf16 %v6561_v60, %v6560_v14  ;;  %v11471_v14 = vld [vmem:[%s10673_s16 + $0x182] sm:$0xff]  ;;  %v11476_v60 = vld [vmem:[%s10673_s16 + $0x18a] sm:$0xff] }
 0x19d   : > { %8051 = vmatmul.mubr.f32.gmra.mrb[2].mxu0 %v12575_v45  ;;  %v12590_v45 = vld [vmem:[#allocation34_spill] sm:$0xff] }
 0x19e   : > { %8053 = vmatprep.mubr.f32.mxu0 %v12576_v46  ;;  %9334 = vmatpush3.bf16.msra.mxu0 %v9331_v31  ;;  %v6598_v31 = vld [vmem:[%s12466_s1 + $0x380] sm:$0xff] }
 0x19f   : > { %9336 = vmatprep.subr.bf16.mxu0 %v9335_v40  ;;  %v9359_v36 = vpack.c.bf16 %v6599_v20, %v6598_v31  ;;  %v12591_v46 = vld [vmem:[#allocation35_spill] sm:$0xff]  ;;  %v3227_v31 = vld [vmem:[#allocation3 + $0xa8] sm:$0xff] }
 0x1a0   : > { %v6570_v20 = vld [vmem:[%s10673_s16 + $0x61] sm:$0xff] }
 0x1a1   : > { %8054 = vmatmul.mubr.f32.gmra.mrb[4].mxu0 %v12577_v18  ;;  %v12595_v18 = vld [vmem:[#allocation39_spill] sm:$0xff] }
 0x1a2   : > { %8056 = vmatprep.mubr.f32.mxu0 %v12578_v55  ;;  %9338 = vmatpush3.bf16.msra.mxu0 %v9335_v40  ;;  %v12586_v40 = vld [vmem:[#allocation30_spill] sm:$0xff]  ;;  %v12596_v55 = vld [vmem:[#allocation40_spill] sm:$0xff] }
 0x1a3   : > { %9340 = vmatprep.subr.bf16.mxu0 %v9339_v21 }
 0x1a5   : > { %8057 = vmatmul.mubr.f32.gmra.mrb[6].mxu0 %v12579_v61  ;;  %v6600_v61 = vld [vmem:[%s12466_s1 + $0x390] sm:$0xff] }
 0x1a6   : > { %8059 = vmatprep.mubr.f32.mxu0 %v12580_v1  ;;  %9342 = vmatpush3.bf16.msra.mxu0 %v9339_v21  ;;  %v12592_v21 = vld [vmem:[#allocation36_spill] sm:$0xff]  ;;  %v6601_v1 = vld [vmem:[%s12466_s1 + $0x398] sm:$0xff] }
 0x1a7   : > { %9344 = vmatprep.subr.bf16.mxu0 %v9343_v56 }
 0x1a9   : > { %8060 = vmatmul.mubr.f32.gmra.mrb[8].mxu0 %v11126_v16  ;;  %v9355_v16 = vpack.c.bf16 %v6565_v11, %v6564_v10  ;;  %v6609_v10 = vld [vmem:[%s12466_s1 + $0x3d8] sm:$0xff]  ;;  %v6611_v11 = vld [vmem:[%s12466_s1 + $0x3e8] sm:$0xff] }
 0x1aa   : > { %8062 = vmatprep.mubr.f32.mxu0 %v12581_v6  ;;  %9346 = vmatpush3.bf16.msra.mxu0 %v9343_v56  ;;  %v12597_v56 = vld [vmem:[#allocation41_spill] sm:$0xff]  ;;  %v6605_v6 = vld [vmem:[%s12466_s1 + $0x3b8] sm:$0xff] }
 0x1ab   : > { %9348 = vmatprep.subr.bf16.mxu0 %v9347_v2 }
 0x1ad   : > { %8063 = vmatmul.mubr.f32.gmra.mrb[10].mxu0 %v12582_v15  ;;  %v6613_v15 = vld [vmem:[%s12466_s1 + $0x3f8] sm:$0xff] }
 0x1ae   : > { %8065 = vmatprep.mubr.f32.mxu0 %v11143_v12  ;;  %9350 = vmatpush3.bf16.msra.mxu0 %v9347_v2  ;;  %v12585_v12 = vld [vmem:[#allocation29_spill] sm:$0xff]  ;;  %v9363_v2 = vpack.c.bf16 %v6601_v1, %v6600_v61 }
 0x1af   : > { %9352 = vmatprep.subr.bf16.mxu0 %v9351_v8  ;;  %v6656_v1 = vld [vmem:[%s12466_s1 + $0x450] sm:$0xff] }
 0x1b1   : > { %8066 = vmatmul.mubr.f32.gmra.mrb[12].mxu0 %v11154_v17  ;;  %v12589_v17 = vld [vmem:[#allocation33_spill] sm:$0xff] }
 0x1b2   : > { %8068 = vmatprep.mubr.f32.mxu0 %v12583_v35  ;;  %9354 = vmatpush3.bf16.msra.mxu0 %v9351_v8  ;;  %v6607_v8 = vld [vmem:[%s12466_s1 + $0x3c8] sm:$0xff] }
 0x1b3   : > { %9356 = vmatprep.subr.bf16.mxu0 %v9355_v16 }
 0x1b5   : > { %8069 = vmatmul.mubr.f32.gmra.mrb[14].mxu0 %v12584_v26  ;;  %v6653_v26 = vld [vmem:[%s12466_s1 + $0x438] sm:$0xff] }
 0x1b6   : > { %8071 = vmatprep.mubr.f32.mxu0 %v12585_v12  ;;  %9358 = vmatpush3.bf16.msra.mxu0 %v9355_v16  ;;  %v6647_v16 = vld [vmem:[%s12466_s1 + $0x408] sm:$0xff] }
 0x1b7   : > { %9360 = vmatprep.subr.bf16.mxu0 %v9359_v36 }
 0x1b9   : > { %8072 = vmatmul.mubr.f32.gmra.mrb[16].mxu0 %v12586_v40  ;;  %v6571_v40 = vld [vmem:[%s10673_s16 + $0x69] sm:$0xff] }
 0x1ba   : > { %8074 = vmatprep.mubr.f32.mxu0 %v12587_v41  ;;  %v3228_v41 = vld [vmem:[#allocation3 + $0xb0] sm:$0xff] }
 0x1bd   : > { %8075 = vmatmul.mubr.f32.gmra.mrb[18].mxu0 %v12588_v27  ;;  %v3229_v27 = vld [vmem:[#allocation3 + $0xb8] sm:$0xff] }
 0x1be   : > { %8077 = vmatprep.mubr.f32.mxu0 %v12589_v17  ;;  %v6572_v17 = vld [vmem:[%s10673_s16 + $0x79] sm:$0xff] }
 0x1c1   : > { %8078 = vmatmul.mubr.f32.gmra.mrb[20].mxu0 %v12590_v45 }
 0x1c2   : > { %8080 = vmatprep.mubr.f32.mxu0 %v12591_v46  ;;  %v6654_v46 = vld [vmem:[%s12466_s1 + $0x440] sm:$0xff] }
 0x1c5   : > { %8081 = vmatmul.mubr.f32.gmra.mrb[22].mxu0 %v12592_v21  ;;  %v6655_v21 = vld [vmem:[%s12466_s1 + $0x448] sm:$0xff] }
 0x1c6   : > { %8083 = vmatprep.mubr.f32.mxu0 %v12593_v50  ;;  %v11601_v50 = vpack.c.bf16 %v3229_v27, %v3228_v41  ;;  %v9407_v61 = vpack.c.bf16 %v6655_v21, %v6654_v46  ;;  %v6630_v41 = vld [vmem:[%s10673_s16 + $0xf2] sm:$0xff]  ;;  %v6631_v27 = vld [vmem:[%s10673_s16 + $0xfa] sm:$0xff]  ;;  %v6634_v46 = vld [vmem:[%s10673_s16 + $0x122] sm:$0xff] }
 0x1c7   : > { %v6635_v21 = vld [vmem:[%s10673_s16 + $0x12a] sm:$0xff] }
 0x1c9   : > { %8084 = vmatmul.mubr.f32.gmra.mrb[24].mxu0 %v12594_v51  ;;  %v6573_v51 = vld [vmem:[%s10673_s16 + $0x81] sm:$0xff] }
 0x1ca   : > { %8086 = vmatprep.mubr.f32.mxu0 %v12595_v18  ;;  %v3230_v18 = vld [vmem:[#allocation3 + $0xc0] sm:$0xff] }
 0x1cd   : > { %8087 = vmatmul.mubr.f32.gmra.mrb[26].mxu0 %v12596_v55  ;;  %v3231_v55 = vld [vmem:[#allocation3 + $0xc8] sm:$0xff] }
 0x1ce   : > { %8089 = vmatprep.mubr.f32.mxu0 %v12597_v56  ;;  %v6574_v56 = vld [vmem:[%s10673_s16 + $0x91] sm:$0xff] }
 0x1d1   : > { %8090 = vmatmul.mubr.f32.gmra.mrb[28].mxu0 %v11218_v22  ;;  %v6602_v22 = vld [vmem:[%s12466_s1 + $0x3a0] sm:$0xff] }
 0x1d2   : > { %8092 = vmatprep.mubr.f32.mxu0 %v11471_v14  ;;  %v9367_v5 = vpack.c.bf16 %v6603_v4, %v6602_v22  ;;  %v11613_v22 = vpack.c.bf16 %v3231_v55, %v3230_v18  ;;  %v6575_v4 = vld [vmem:[%s10673_s16 + $0x99] sm:$0xff] }
 0x1d3   : > { %v6638_v18 = vld [vmem:[%s10673_s16 + $0x152] sm:$0xff]  ;;  %v6639_v55 = vld [vmem:[%s10673_s16 + $0x15a] sm:$0xff] }
 0x1d5   : > { %8093 = vmatmul.mubr.f32.gmra.mrb[30].mxu0 %v11476_v60 }
 0x1d6   : > { %8127 = vmatprep.mubr.f32.mxu0 %v10903_v28  ;;  %v6604_v28 = vld [vmem:[%s12466_s1 + $0x3b0] sm:$0xff] }
 0x1d9   : > { %8128 = vmatmul.mubr.f32.vlgmr.msra.gmra.mrb[0].mxu0 %v10914_v33  ;;  %v9371_v33 = vpack.c.bf16 %v6605_v6, %v6604_v28  ;;  %v3233_v28 = vld [vmem:[#allocation3 + $0xd8] sm:$0xff] }
 0x1da   : > { %9362 = vmatpush3.bf16.msra.mxu0 %v9359_v36  ;;  %8130 = vmatprep.mubr.f32.mxu0 %v10917_v34  ;;  %v6606_v34 = vld [vmem:[%s12466_s1 + $0x3c0] sm:$0xff]  ;;  %v6652_v36 = vld [vmem:[%s12466_s1 + $0x430] sm:$0xff] }
 0x1db   : > { %9364 = vmatprep.subr.bf16.mxu0 %v9363_v2  ;;  %v9403_v45 = vpack.c.bf16 %v6653_v26, %v6652_v36  ;;  %v6576_v6 = vld [vmem:[%s10673_s16 + $0xa9] sm:$0xff] }
 0x1dc   : > { %v6626_v36 = vld [vmem:[%s10673_s16 + $0xc2] sm:$0xff]  ;;  %v6627_v26 = vld [vmem:[%s10673_s16 + $0xca] sm:$0xff] }
 0x1dd   : > { %8131 = vmatmul.mubr.f32.gmra.mrb[2].mxu0 %v10928_v42  ;;  %v9375_v42 = vpack.c.bf16 %v6607_v8, %v6606_v34  ;;  %v6658_v34 = vld [vmem:[%s12466_s1 + $0x460] sm:$0xff]  ;;  %v6659_v8 = vld [vmem:[%s12466_s1 + $0x468] sm:$0xff] }
 0x1de   : > { %8133 = vmatprep.mubr.f32.mxu0 %v10931_v43  ;;  %9366 = vmatpush3.bf16.msra.mxu0 %v9363_v2  ;;  %v6608_v43 = vld [vmem:[%s12466_s1 + $0x3d0] sm:$0xff]  ;;  %v6657_v2 = vld [vmem:[%s12466_s1 + $0x458] sm:$0xff] }
 0x1df   : > { %9368 = vmatprep.subr.bf16.mxu0 %v9367_v5 }
 0x1e1   : > { %8134 = vmatmul.mubr.f32.gmra.mrb[4].mxu0 %v10942_v49  ;;  %v9379_v49 = vpack.c.bf16 %v6609_v10, %v6608_v43  ;;  %v6577_v43 = vld [vmem:[%s10673_s16 + $0xb1] sm:$0xff]  ;;  %v6578_v10 = vld [vmem:[%s10673_s16 + $0xc1] sm:$0xff] }
 0x1e2   : > { %8136 = vmatprep.mubr.f32.mxu0 %v10945_v52  ;;  %9370 = vmatpush3.bf16.msra.mxu0 %v9367_v5  ;;  %v6610_v52 = vld [vmem:[%s12466_s1 + $0x3e0] sm:$0xff] }
 0x1e3   : > { %9372 = vmatprep.subr.bf16.mxu0 %v9371_v33  ;;  %v3232_v5 = vld [vmem:[#allocation3 + $0xd0] sm:$0xff] }
 0x1e5   : > { %8137 = vmatmul.mubr.f32.gmra.mrb[6].mxu0 %v10956_v58  ;;  %v9383_v58 = vpack.c.bf16 %v6611_v11, %v6610_v52  ;;  %v6660_v52 = vld [vmem:[%s12466_s1 + $0x470] sm:$0xff]  ;;  %v6661_v11 = vld [vmem:[%s12466_s1 + $0x478] sm:$0xff] }
 0x1e6   : > { %8139 = vmatprep.mubr.f32.mxu0 %v10959_v59  ;;  %9374 = vmatpush3.bf16.msra.mxu0 %v9371_v33  ;;  %v6612_v59 = vld [vmem:[%s12466_s1 + $0x3f0] sm:$0xff]  ;;  %v9411_v33 = vpack.c.bf16 %v6657_v2, %v6656_v1  ;;  %v6644_v1 = vld [vmem:[%s10673_s16 + $0x19a] sm:$0xff]  ;;  %v6645_v2 = vld [vmem:[%s10673_s16 + $0x1a2] sm:$0xff] }
 0x1e7   : > { %9376 = vmatprep.subr.bf16.mxu0 %v9375_v42 }
 0x1e9   : > { %8140 = vmatmul.mubr.f32.gmra.mrb[8].mxu0 %v10970_v3  ;;  %v9387_v3 = vpack.c.bf16 %v6613_v15, %v6612_v59  ;;  %v6580_v59 = vld [vmem:[%s10673_s16 + $0xd9] sm:$0xff]  ;;  %v9419_v15 = vpack.c.bf16 %v6661_v11, %v6660_v52 }
 0x1ea   : > { %8142 = vmatprep.mubr.f32.mxu0 %v10973_v19  ;;  %9378 = vmatpush3.bf16.msra.mxu0 %v9375_v42  ;;  %v6646_v19 = vld [vmem:[%s12466_s1 + $0x400] sm:$0xff]  ;;  %v11625_v42 = vpack.c.bf16 %v3233_v28, %v3232_v5  ;;  %v10523_v28 = vmov 0.0  }
 0x1eb   : > { %9380 = vmatprep.subr.bf16.mxu0 %v9379_v49  ;;  %3058 = vst [vmem:[#allocation2 + $0x20] sm:$0xff] %v10523_v28  ;;  %3059 = vst [vmem:[#allocation2 + $0x28] sm:$0x3] %v10523_v28 }
 0x1ec   : > { %3054 = vst [vmem:[#allocation2] sm:$0xff] %v10523_v28  ;;  %3055 = vst [vmem:[#allocation2 + $0x8] sm:$0xff] %v10523_v28 }
 0x1ed   : > { %8143 = vmatmul.mubr.f32.gmra.mrb[10].mxu0 %v10984_v24  ;;  %v9391_v24 = vpack.c.bf16 %v6647_v16, %v6646_v19  ;;  %v6582_v19 = vld [vmem:[%s10673_s16 + $0xf1] sm:$0xff]  ;;  %v6583_v16 = vld [vmem:[%s10673_s16 + $0xf9] sm:$0xff]  ;;  %3056 = vst [vmem:[#allocation2 + $0x10] sm:$0x3] %v10523_v28  ;;  %3057 = vst [vmem:[#allocation2 + $0x18] sm:$0xff] %v10523_v28 }
 0x1ee   : > { %8145 = vmatprep.mubr.f32.mxu0 %v10987_v25  ;;  %9382 = vmatpush3.bf16.msra.mxu0 %v9379_v49  ;;  %v6548_v25 = vld [vmem:[%s10673_s16 + $0x198] sm:$0xff]  ;;  %v9415_v49 = vpack.c.bf16 %v6659_v8, %v6658_v34  ;;  %3060 = vst [vmem:[#allocation2 + $0x30] sm:$0xff] %v10523_v28  ;;  %3061 = vst [vmem:[#allocation2 + $0x38] sm:$0xff] %v10523_v28  ;;  %v3173_v8 = vld [vmem:[#allocation3] sm:$0xff] }
 0x1ef   : > { %9384 = vmatprep.subr.bf16.mxu0 %v9383_v58  ;;  %3062 = vst [vmem:[#allocation2 + $0x40] sm:$0x3] %v10523_v28  ;;  %3063 = vst [vmem:[#allocation2 + $0x48] sm:$0xff] %v10523_v28 }
 0x1f0   : > { %3064 = vst [vmem:[#allocation2 + $0x50] sm:$0xff] %v10523_v28  ;;  %3065 = vst [vmem:[#allocation2 + $0x58] sm:$0x3] %v10523_v28 }
 0x1f1   : > { %8146 = vmatmul.mubr.f32.gmra.mrb[12].mxu0 %v10992_v29  ;;  %v6549_v29 = vld [vmem:[%s10673_s16 + $0x1a0] sm:$0xff]  ;;  %3066 = vst [vmem:[#allocation2 + $0x60] sm:$0xff] %v10523_v28  ;;  %3067 = vst [vmem:[#allocation2 + $0x68] sm:$0xff] %v10523_v28 }
 0x1f2   : > { %8148 = vmatprep.mubr.f32.mxu0 %v10995_v30  ;;  %9386 = vmatpush3.bf16.msra.mxu0 %v9383_v58  ;;  %v6566_v30 = vld [vmem:[%s10673_s16 + $0x31] sm:$0xff]  ;;  %v6579_v58 = vld [vmem:[%s10673_s16 + $0xc9] sm:$0xff]  ;;  %3068 = vst [vmem:[#allocation2 + $0x70] sm:$0x3] %v10523_v28  ;;  %3069 = vst [vmem:[#allocation2 + $0x78] sm:$0xff] %v10523_v28 }
 0x1f3   : > { %9388 = vmatprep.subr.bf16.mxu0 %v9387_v3  ;;  %3070 = vst [vmem:[#allocation2 + $0x80] sm:$0xff] %v10523_v28  ;;  %3071 = vst [vmem:[#allocation2 + $0x88] sm:$0x3] %v10523_v28 }
 0x1f4   : > { %3072 = vst [vmem:[#allocation2 + $0x90] sm:$0xff] %v10523_v28  ;;  %3073 = vst [vmem:[#allocation2 + $0x98] sm:$0xff] %v10523_v28  ;;  %v3190_v34 = vld [vmem:[#allocation2 + $0x9] sm:$0xff] }
 0x1f5   : > { %8149 = vmatmul.mubr.f32.gmra.mrb[14].mxu0 %v11000_v32  ;;  %v6648_v32 = vld [vmem:[%s12466_s1 + $0x410] sm:$0xff]  ;;  %3074 = vst [vmem:[#allocation2 + $0xa0] sm:$0x3] %v10523_v28  ;;  %3075 = vst [vmem:[#allocation2 + $0xa8] sm:$0xff] %v10523_v28 }
 0x1f6   : > { %8151 = vmatprep.mubr.f32.mxu0 %v11003_v37  ;;  %9390 = vmatpush3.bf16.msra.mxu0 %v9387_v3  ;;  %v6649_v37 = vld [vmem:[%s12466_s1 + $0x418] sm:$0xff]  ;;  %v6581_v3 = vld [vmem:[%s10673_s16 + $0xe1] sm:$0xff]  ;;  %3076 = vst [vmem:[#allocation2 + $0xb0] sm:$0xff] %v10523_v28  ;;  %3077 = vst [vmem:[#allocation2 + $0xb8] sm:$0x3] %v10523_v28 }
 0x1f7   : > { %9392 = vmatprep.subr.bf16.mxu0 %v9391_v24  ;;  %3078 = vst [vmem:[#allocation2 + $0xc0] sm:$0xff] %v10523_v28  ;;  %3079 = vst [vmem:[#allocation2 + $0xc8] sm:$0xff] %v10523_v28 }
 0x1f8   : > { %3080 = vst [vmem:[#allocation2 + $0xd0] sm:$0x3] %v10523_v28  ;;  %3081 = vst [vmem:[#allocation2 + $0xd8] sm:$0xff] %v10523_v28 }
 0x1f9   : > { %8152 = vmatmul.mubr.f32.gmra.mrb[16].mxu0 %v11008_v38  ;;  %v3222_v38 = vld [vmem:[#allocation3 + $0x80] sm:$0xff]  ;;  %3082 = vst [vmem:[#allocation2 + $0xe0] sm:$0xff] %v10523_v28  ;;  %3083 = vst [vmem:[#allocation2 + $0xe8] sm:$0x3] %v10523_v28 }
 0x1fa   : > { %8154 = vmatprep.mubr.f32.mxu0 %v11011_v39  ;;  %v3223_v39 = vld [vmem:[#allocation3 + $0x88] sm:$0xff]  ;;  %3084 = vst [vmem:[#allocation2 + $0xf0] sm:$0xff] %v10523_v28  ;;  %3085 = vst [vmem:[#allocation2 + $0xf8] sm:$0xff] %v10523_v28 }
 0x1fb   : > { %3086 = vst [vmem:[#allocation2 + $0x100] sm:$0x3] %v10523_v28  ;;  %3087 = vst [vmem:[#allocation2 + $0x108] sm:$0xff] %v10523_v28 }
 0x1fc   : > { %3088 = vst [vmem:[#allocation2 + $0x110] sm:$0xff] %v10523_v28  ;;  %3089 = vst [vmem:[#allocation2 + $0x118] sm:$0x3] %v10523_v28 }
 0x1fd   : > { %8155 = vmatmul.mubr.f32.gmra.mrb[18].mxu0 %v11016_v44  ;;  %v6567_v44 = vld [vmem:[%s10673_s16 + $0x39] sm:$0xff]  ;;  %3090 = vst [vmem:[#allocation2 + $0x120] sm:$0xff] %v10523_v28  ;;  %3091 = vst [vmem:[#allocation2 + $0x128] sm:$0xff] %v10523_v28 }
 0x1fe   : > { %8157 = vmatprep.mubr.f32.mxu0 %v11019_v47  ;;  %v11567_v47 = vpack.c.bf16 %v3223_v39, %v3222_v38  ;;  %v6590_v38 = vld [vmem:[%s10673_s16 + $0x151] sm:$0xff]  ;;  %v6591_v39 = vld [vmem:[%s10673_s16 + $0x159] sm:$0xff]  ;;  %3092 = vst [vmem:[#allocation2 + $0x130] sm:$0x3] %v10523_v28  ;;  %3093 = vst [vmem:[#allocation2 + $0x138] sm:$0xff] %v10523_v28 }
 0x1ff   : > { %3094 = vst [vmem:[#allocation2 + $0x140] sm:$0xff] %v10523_v28  ;;  %3095 = vst [vmem:[#allocation2 + $0x148] sm:$0x3] %v10523_v28 }
 0x200   : > { %9743 = vmatprep.subr.bf16.mxu1 %v11567_v47  ;;  %3096 = vst [vmem:[#allocation2 + $0x150] sm:$0xff] %v10523_v28  ;;  %3097 = vst [vmem:[#allocation2 + $0x158] sm:$0xff] %v10523_v28 }
 0x201   : > { %8158 = vmatmul.mubr.f32.gmra.mrb[20].mxu0 %v11024_v48  ;;  %v3224_v48 = vld [vmem:[#allocation3 + $0x90] sm:$0xff]  ;;  %9751 = vmatpush3.bf16.msra.mxu1 %v11567_v47  ;;  %3098 = vst [vmem:[#allocation2 + $0x160] sm:$0x3] %v10523_v28  ;;  %3099 = vst [vmem:[#allocation2 + $0x168] sm:$0xff] %v10523_v28 }
 0x202   : > { %8160 = vmatprep.mubr.f32.mxu0 %v11027_v53  ;;  %v3225_v53 = vld [vmem:[#allocation3 + $0x98] sm:$0xff]  ;;  %3100 = vst [vmem:[#allocation2 + $0x170] sm:$0xff] %v10523_v28  ;;  %3101 = vst [vmem:[#allocation2 + $0x178] sm:$0x3] %v10523_v28 }
 0x203   : > { %3102 = vst [vmem:[#allocation2 + $0x180] sm:$0xff] %v10523_v28  ;;  %3103 = vst [vmem:[#allocation2 + $0x188] sm:$0xff] %v10523_v28 }
 0x204   : > { %3104 = vst [vmem:[#allocation2 + $0x190] sm:$0x3] %v10523_v28  ;;  %3105 = vst [vmem:[#allocation2 + $0x198] sm:$0xff] %v10523_v28 }
 0x205   : > { %8161 = vmatmul.mubr.f32.gmra.mrb[22].mxu0 %v11032_v54  ;;  %v6568_v54 = vld [vmem:[%s10673_s16 + $0x49] sm:$0xff]  ;;  %3106 = vst [vmem:[#allocation2 + $0x1a0] sm:$0xff] %v10523_v28  ;;  %3107 = vst [vmem:[#allocation2 + $0x1a8] sm:$0x3] %v10523_v28 }
 0x206   : > { %8163 = vmatprep.mubr.f32.mxu0 %v11035_v57  ;;  %v9395_v57 = vpack.c.bf16 %v6649_v37, %v6648_v32  ;;  %v6588_v32 = vld [vmem:[%s10673_s16 + $0x139] sm:$0xff]  ;;  %v6589_v37 = vld [vmem:[%s10673_s16 + $0x141] sm:$0xff] }
 0x209   : > { %8164 = vmatmul.mubr.f32.gmra.mrb[24].mxu0 %v11040_v62  ;;  %v6650_v62 = vld [vmem:[%s12466_s1 + $0x420] sm:$0xff] }
 0x20a   : > { %8166 = vmatprep.mubr.f32.mxu0 %v11043_v63  ;;  %v6651_v63 = vld [vmem:[%s12466_s1 + $0x428] sm:$0xff] }
 0x20b   : > { %v9399_v35 = vpack.c.bf16 %v6651_v63, %v6650_v62  ;;  %v6615_v62 = vld [vmem:[%s10673_s16 + $0x3a] sm:$0xff]  ;;  %v6616_v63 = vld [vmem:[%s10673_s16 + $0x4a] sm:$0xff] }
 0x20d   : > { %8167 = vmatmul.mubr.f32.gmra.mrb[26].mxu0 %v11048_v0  ;;  %v11577_v0 = vpack.c.bf16 %v3225_v53, %v3224_v48  ;;  %v6593_v48 = vld [vmem:[%s10673_s16 + $0x171] sm:$0xff]  ;;  %v6596_v53 = vld [vmem:[%s10673_s16 + $0x199] sm:$0xff] }
 0x20e   : > { %8169 = vmatprep.mubr.f32.mxu0 %v11299_v23  ;;  %v6569_v23 = vld [vmem:[%s10673_s16 + $0x51] sm:$0xff] }
 0x20f   : > { %9744 = vmatprep.subr.bf16.mxu1 %v11577_v0 }
 0x210   : > { %9752 = vmatpush3.bf16.msra.mxu1 %v11577_v0 }
 0x211   : > { %8170 = vmatmul.mubr.f32.gmra.mrb[28].mxu0 %v11304_v13  ;;  %v3226_v13 = vld [vmem:[#allocation3 + $0xa0] sm:$0xff] }
 0x212   : > { %8172 = vmatprep.mubr.f32.mxu0 %v6548_v25  ;;  %v11589_v12 = vpack.c.bf16 %v3227_v31, %v3226_v13  ;;  %v6585_v25 = vld [vmem:[%s10673_s16 + $0x111] sm:$0xff]  ;;  %v6620_v13 = vld [vmem:[%s10673_s16 + $0x7a] sm:$0xff]  ;;  %v6621_v31 = vld [vmem:[%s10673_s16 + $0x82] sm:$0xff] }
 0x214   : > { %9745 = vmatprep.subr.bf16.mxu1 %v11589_v12 }
 0x215   : > { %8173 = vmatmul.mubr.f32.gmra.mrb[30].mxu0 %v6549_v29  ;;  %9753 = vmatpush3.bf16.msra.mxu1 %v11589_v12  ;;  %v6586_v29 = vld [vmem:[%s10673_s16 + $0x121] sm:$0xff] }
 0x216   : > { %8207 = vmatprep.mubr.f32.mxu0 %v6566_v30  ;;  %9746 = vmatprep.subr.bf16.mxu1 %v11601_v50  ;;  %v6587_v30 = vld [vmem:[%s10673_s16 + $0x129] sm:$0xff] }
 0x219   : > { %8208 = vmatmul.mubr.f32.vlgmr.msra.gmra.mrb[0].mxu0 %v6567_v44  ;;  %9754 = vmatpush3.bf16.msra.mxu1 %v11601_v50  ;;  %v6592_v44 = vld [vmem:[%s10673_s16 + $0x169] sm:$0xff] }
 0x21a   : > { %9394 = vmatpush3.bf16.msra.mxu0 %v9391_v24  ;;  %8210 = vmatprep.mubr.f32.mxu0 %v6568_v54  ;;  %v6584_v24 = vld [vmem:[%s10673_s16 + $0x109] sm:$0xff]  ;;  %v6597_v54 = vld [vmem:[%s10673_s16 + $0x1a1] sm:$0xff] }
 0x21b   : > { %9396 = vmatprep.subr.bf16.mxu0 %v9395_v57  ;;  %9747 = vmatprep.subr.bf16.mxu1 %v11613_v22 }
 0x21d   : > { %8211 = vmatmul.mubr.f32.gmra.mrb[2].mxu0 %v6569_v23  ;;  %9755 = vmatpush3.bf16.msra.mxu1 %v11613_v22  ;;  %v6617_v23 = vld [vmem:[%s10673_s16 + $0x52] sm:$0xff] }
 0x21e   : > { %8213 = vmatprep.mubr.f32.mxu0 %v6570_v20  ;;  %9398 = vmatpush3.bf16.msra.mxu0 %v9395_v57  ;;  %v6614_v57 = vld [vmem:[%s10673_s16 + $0x32] sm:$0xff]  ;;  %v6623_v20 = vld [vmem:[%s10673_s16 + $0x9a] sm:$0xff] }
 0x21f   : > { %9400 = vmatprep.subr.bf16.mxu0 %v9399_v35  ;;  %9748 = vmatprep.subr.bf16.mxu1 %v11625_v42 }
 0x221   : > { %8214 = vmatmul.mubr.f32.gmra.mrb[4].mxu0 %v6571_v40  ;;  %9756 = vmatpush3.bf16.msra.mxu1 %v11625_v42  ;;  %v6629_v40 = vld [vmem:[%s10673_s16 + $0xe2] sm:$0xff] }
 0x222   : > { %8216 = vmatprep.mubr.f32.mxu0 %v6572_v17  ;;  %9402 = vmatpush3.bf16.msra.mxu0 %v9399_v35  ;;  %v6625_v35 = vld [vmem:[%s10673_s16 + $0xb2] sm:$0xff]  ;;  %v6632_v17 = vld [vmem:[%s10673_s16 + $0x10a] sm:$0xff] }
 0x223   : > { %9404 = vmatprep.subr.bf16.mxu0 %v9403_v45 }
 0x225   : > { %8217 = vmatmul.mubr.f32.gmra.mrb[6].mxu0 %v6573_v51  ;;  %v6637_v51 = vld [vmem:[%s10673_s16 + $0x142] sm:$0xff] }
 0x226   : > { %8219 = vmatprep.mubr.f32.mxu0 %v6574_v56  ;;  %9406 = vmatpush3.bf16.msra.mxu0 %v9403_v45  ;;  %v6633_v45 = vld [vmem:[%s10673_s16 + $0x112] sm:$0xff]  ;;  %v6640_v56 = vld [vmem:[%s10673_s16 + $0x16a] sm:$0xff] }
 0x227   : > { %9408 = vmatprep.subr.bf16.mxu0 %v9407_v61 }
 0x229   : > { %8220 = vmatmul.mubr.f32.gmra.mrb[8].mxu0 %v6575_v4  ;;  %v3235_v4 = vld [vmem:[#allocation3 + $0xe8] sm:$0xff] }
 0x22a   : > { %8222 = vmatprep.mubr.f32.mxu0 %v6576_v6  ;;  %9410 = vmatpush3.bf16.msra.mxu0 %v9407_v61  ;;  %v6641_v61 = vld [vmem:[%s10673_s16 + $0x172] sm:$0xff] }
 0x22b   : > { %9412 = vmatprep.subr.bf16.mxu0 %v9411_v33 }
 0x22d   : > { %8223 = vmatmul.mubr.f32.gmra.mrb[10].mxu0 %v6577_v43 }
 0x22e   : > { %8225 = vmatprep.mubr.f32.mxu0 %v6578_v10  ;;  %9414 = vmatpush3.bf16.msra.mxu0 %v9411_v33  ;;  %v3189_v33 = vld [vmem:[#allocation2 + $0x1] sm:$0xff]  ;;  %v11761_v10 = vld [vmem:[%s12467_s2] ss:$0 sm:$0xff] }
 0x22f   : > { %9416 = vmatprep.subr.bf16.mxu0 %v9415_v49 }
 0x231   : > { %8226 = vmatmul.mubr.f32.gmra.mrb[12].mxu0 %v6579_v58 }
 0x232   : > { %8228 = vmatprep.mubr.f32.mxu0 %v6580_v59  ;;  %9418 = vmatpush3.bf16.msra.mxu0 %v9415_v49 }
 0x233   : > { %9420 = vmatprep.subr.bf16.mxu0 %v9419_v15 }
 0x235   : > { %8229 = vmatmul.mubr.f32.gmra.mrb[14].mxu0 %v6581_v3 }
 0x236   : > { %8231 = vmatprep.mubr.f32.mxu0 %v6582_v19  ;;  %9422 = vmatpush3.bf16.msra.mxu0 %v9419_v15 }
 0x237   : > { %9424 = vmatprep.subr.bf16.mxu0 %v11567_v47 }
 0x239   : > { %8232 = vmatmul.mubr.f32.gmra.mrb[16].mxu0 %v6583_v16 }
 0x23a   : > { %8234 = vmatprep.mubr.f32.mxu0 %v6584_v24 }
 0x23d   : > { %8235 = vmatmul.mubr.f32.gmra.mrb[18].mxu0 %v6585_v25 }
 0x23e   : > { %8237 = vmatprep.mubr.f32.mxu0 %v6586_v29 }
 0x241   : > { %8238 = vmatmul.mubr.f32.gmra.mrb[20].mxu0 %v6587_v30 }
 0x242   : > { %8240 = vmatprep.mubr.f32.mxu0 %v6588_v32 }
 0x245   : > { %8241 = vmatmul.mubr.f32.gmra.mrb[22].mxu0 %v6589_v37 }
 0x246   : > { %8243 = vmatprep.mubr.f32.mxu0 %v6590_v38 }
 0x249   : > { %8244 = vmatmul.mubr.f32.gmra.mrb[24].mxu0 %v6591_v39 }
 0x24a   : > { %8246 = vmatprep.mubr.f32.mxu0 %v6592_v44 }
 0x24d   : > { %8247 = vmatmul.mubr.f32.gmra.mrb[26].mxu0 %v6593_v48 }
 0x24e   : > { %8249 = vmatprep.mubr.f32.mxu0 %v11385_v7  ;;  %v6618_v7 = vld [vmem:[%s10673_s16 + $0x62] sm:$0xff] }
 0x251   : > { %8250 = vmatmul.mubr.f32.gmra.mrb[28].mxu0 %v11390_v9  ;;  %v6619_v9 = vld [vmem:[%s10673_s16 + $0x6a] sm:$0xff] }
 0x252   : > { %8252 = vmatprep.mubr.f32.mxu0 %v6596_v53 }
 0x255   : > { %8253 = vmatmul.mubr.f32.gmra.mrb[30].mxu0 %v6597_v54 }
 0x256   : > { %8287 = vmatprep.mubr.f32.mxu0 %v6614_v57 }
 0x259   : > { %8288 = vmatmul.mubr.f32.vlgmr.msra.gmra.mrb[0].mxu0 %v6615_v62 }
 0x25a   : > { %8290 = vmatprep.mubr.f32.mxu0 %v6616_v63  ;;  %9426 = vmatpush3.bf16.msra.mxu0 %v11567_v47  ;;  %v6622_v47 = vld [vmem:[%s10673_s16 + $0x92] sm:$0xff] }
 0x25b   : > { %9428 = vmatprep.subr.bf16.mxu0 %v11577_v0 }
 0x25d   : > { %8291 = vmatmul.mubr.f32.gmra.mrb[2].mxu0 %v6617_v23 }
 0x25e   : > { %8293 = vmatprep.mubr.f32.mxu0 %v6618_v7  ;;  %9430 = vmatpush3.bf16.msra.mxu0 %v11577_v0  ;;  %v6624_v0 = vld [vmem:[%s10673_s16 + $0xaa] sm:$0xff] }
 0x25f   : > { %9432 = vmatprep.subr.bf16.mxu0 %v11589_v12 }
 0x261   : > { %8294 = vmatmul.mubr.f32.gmra.mrb[4].mxu0 %v6619_v9 }
 0x262   : > { %8296 = vmatprep.mubr.f32.mxu0 %v6620_v13  ;;  %9434 = vmatpush3.bf16.msra.mxu0 %v11589_v12  ;;  %v6628_v12 = vld [vmem:[%s10673_s16 + $0xda] sm:$0xff] }
 0x263   : > { %9436 = vmatprep.subr.bf16.mxu0 %v11601_v50 }
 0x265   : > { %8297 = vmatmul.mubr.f32.gmra.mrb[6].mxu0 %v6621_v31 }
 0x266   : > { %8299 = vmatprep.mubr.f32.mxu0 %v6622_v47  ;;  %9438 = vmatpush3.bf16.msra.mxu0 %v11601_v50  ;;  %v6636_v50 = vld [vmem:[%s10673_s16 + $0x13a] sm:$0xff] }
 0x267   : > { %9440 = vmatprep.subr.bf16.mxu0 %v11613_v22 }
 0x269   : > { %8300 = vmatmul.mubr.f32.gmra.mrb[8].mxu0 %v6623_v20 }
 0x26a   : > { %8302 = vmatprep.mubr.f32.mxu0 %v6624_v0  ;;  %9442 = vmatpush3.bf16.msra.mxu0 %v11613_v22  ;;  %v3234_v22 = vld [vmem:[#allocation3 + $0xe0] sm:$0xff] }
 0x26b   : > { %9444 = vmatprep.subr.bf16.mxu0 %v11625_v42  ;;  %v9447_v5 = vpack.c.bf16 %v3235_v4, %v3234_v22 }
 0x26d   : > { %8303 = vmatmul.mubr.f32.gmra.mrb[10].mxu0 %v6625_v35  ;;  %9749 = vmatprep.subr.bf16.mxu1 %v9447_v5 }
 0x26e   : > { %8305 = vmatprep.mubr.f32.mxu0 %v6626_v36  ;;  %9446 = vmatpush3.bf16.msra.mxu0 %v11625_v42  ;;  %v3174_v42 = vld [vmem:[#allocation3 + $0x8] sm:$0xff] }
 0x26f   : > { %9448 = vmatprep.subr.bf16.mxu0 %v9447_v5  ;;  %9757 = vmatpush3.bf16.msra.mxu1 %v9447_v5  ;;  %v11755_v43 = vpack.c.bf16 %v3174_v42, %v3173_v8 }
 0x271   : > { %8306 = vmatmul.mubr.f32.gmra.mrb[12].mxu0 %v6627_v26 }
 0x272   : > { %8308 = vmatprep.mubr.f32.mxu0 %v6628_v12  ;;  %9450 = vmatpush3.bf16.msra.mxu0 %v9447_v5 }
 0x275   : > { %8309 = vmatmul.mubr.f32.gmra.mrb[14].mxu0 %v6629_v40 }
 0x276   : > { %8311 = vmatprep.mubr.f32.mxu0 %v6630_v41 }
 0x279   : > { %8312 = vmatmul.mubr.f32.gmra.mrb[16].mxu0 %v6631_v27 }
 0x27a   : > { %8314 = vmatprep.mubr.f32.mxu0 %v6632_v17 }
 0x27d   : > { %8315 = vmatmul.mubr.f32.gmra.mrb[18].mxu0 %v6633_v45 }
 0x27e   : > { %8317 = vmatprep.mubr.f32.mxu0 %v6634_v46 }
 0x281   : > { %8318 = vmatmul.mubr.f32.gmra.mrb[20].mxu0 %v6635_v21 }
 0x282   : > { %8320 = vmatprep.mubr.f32.mxu0 %v6636_v50 }
 0x285   : > { %8321 = vmatmul.mubr.f32.gmra.mrb[22].mxu0 %v6637_v51 }
 0x286   : > { %8323 = vmatprep.mubr.f32.mxu0 %v6638_v18 }
 0x289   : > { %8324 = vmatmul.mubr.f32.gmra.mrb[24].mxu0 %v6639_v55  ;;  %v3175_v55 = vld [vmem:[#allocation3 + $0x10] sm:$0xff] }
 0x28a   : > { %8326 = vmatprep.mubr.f32.mxu0 %v6640_v56  ;;  %v3176_v56 = vld [vmem:[#allocation3 + $0x18] sm:$0xff] }
 0x28b   : > { %v9459_v5 = vpack.c.bf16 %v3176_v56, %v3175_v55  ;;  %v3721_v56 = vld [vmem:[#allocation3 + $0x100] sm:$0xff] }
 0x28d   : > { %8327 = vmatmul.mubr.f32.gmra.mrb[26].mxu0 %v6641_v61 }
 0x28e   : > { %8329 = vmatprep.mubr.f32.mxu0 %v11471_v14  ;;  %v3236_v14 = vld [vmem:[#allocation3 + $0xf0] sm:$0xff] }
 0x291   : > { %8330 = vmatmul.mubr.f32.gmra.mrb[28].mxu0 %v11476_v60  ;;  %v3237_v60 = vld [vmem:[#allocation3 + $0xf8] sm:$0xff] }
 0x292   : > { %8332 = vmatprep.mubr.f32.mxu0 %v6644_v1  ;;  %v9451_v6 = vpack.c.bf16 %v3237_v60, %v3236_v14  ;;  %v3177_v60 = vld [vmem:[#allocation3 + $0x20] sm:$0xff] }
 0x294   : > { %9452 = vmatprep.subr.bf16.mxu0 %v9451_v6  ;;  %9750 = vmatprep.subr.bf16.mxu1 %v9451_v6 }
 0x295   : > { %8333 = vmatmul.mubr.f32.gmra.mrb[30].mxu0 %v6645_v2  ;;  %9758 = vmatpush3.bf16.msra.mxu1 %v9451_v6 }
 0x296   : > { %9454 = vmatpush3.bf16.msra.mxu0 %v9451_v6  ;;  %8367 = vmatprep.mubr.f32.mxu0 %v3189_v33  ;;  %v3178_v6 = vld [vmem:[#allocation3 + $0x28] sm:$0xff] }
 0x297   : > { %9456 = vmatprep.subr.bf16.mxu1 %v11755_v43 }
 0x299   : > { %8368 = vmatmul.mubr.f32.vlgmr.msra.gmra.mrb[32].mxu0 %v3190_v34 }
 0x32c   : > { %v8289_v49 = vpop.f32.mrb[0].mxu0 }
 0x32d   : > { %v2991_v52 = vadd.f32 %v8289_v49, %v11761_v10  ;;  %v2792_v11 = vpop.f32.mrb[1].mxu0 }
 0x32e   : > { %v2990_v58 = vadd.f32 %v11761_v10, %v2792_v11 }
 0x32f   : > { %v3023_v59 = vmax.f32 %v2991_v52, 0.0  ;;  %v9463_v52 = vpack.c.bf16 %v3178_v6, %v3177_v60  ;;  %v3723_v6 = vld [vmem:[#allocation3 + $0x110] sm:$0xff] }
 0x330   : > { %v3022_v15 = vmax.f32 %v2990_v58, 0.0  ;;  %v8292_v3 = vpop.f32.mrb[2].mxu0  ;;  %v3179_v58 = vld [vmem:[#allocation3 + $0x30] sm:$0xff] }
 0x331   : > { %3110 = vst [vmem:[#allocation2 + $0x21] sm:$0xff] %v3023_v59  ;;  %v2993_v19 = vadd.f32 %v8292_v3, %v11761_v10  ;;  %v2802_v16 = vpop.f32.mrb[3].mxu0 }
 0x332   : > { %3109 = vst [vmem:[#allocation2 + $0x19] sm:$0xff] %v3022_v15  ;;  %v2992_v24 = vadd.f32 %v11761_v10, %v2802_v16  ;;  %8370 = vmatprep.mubr.f32.mxu0 %v3022_v15 }
 0x333   : > { %v3025_v25 = vmax.f32 %v2993_v19, 0.0  ;;  %8371 = vmatmul.mubr.f32.gmra.mrb[34].mxu0 %v3023_v59  ;;  %v3180_v59 = vld [vmem:[#allocation3 + $0x38] sm:$0xff] }
 0x334   : > { %v3024_v29 = vmax.f32 %v2992_v24, 0.0  ;;  %v8295_v30 = vpop.f32.mrb[4].mxu0  ;;  %v9467_v24 = vpack.c.bf16 %v3180_v59, %v3179_v58  ;;  %v3727_v59 = vld [vmem:[#allocation3 + $0x130] sm:$0xff] }
 0x335   : > { %3112 = vst [vmem:[#allocation2 + $0x39] sm:$0xff] %v3025_v25  ;;  %v2995_v32 = vadd.f32 %v8295_v30, %v11761_v10  ;;  %v2812_v37 = vpop.f32.mrb[5].mxu0  ;;  %v3182_v30 = vld [vmem:[#allocation3 + $0x48] sm:$0xff] }
 0x336   : > { %3111 = vst [vmem:[#allocation2 + $0x31] sm:$0xff] %v3024_v29  ;;  %v2994_v38 = vadd.f32 %v11761_v10, %v2812_v37  ;;  %8373 = vmatprep.mubr.f32.mxu0 %v3024_v29  ;;  %v3181_v29 = vld [vmem:[#allocation3 + $0x40] sm:$0xff] }
 0x337   : > { %v3027_v39 = vmax.f32 %v2995_v32, 0.0  ;;  %8374 = vmatmul.mubr.f32.gmra.mrb[36].mxu0 %v3025_v25 }
 0x338   : > { %v3026_v44 = vmax.f32 %v2994_v38, 0.0  ;;  %v8298_v48 = vpop.f32.mrb[6].mxu0 }
 0x339   : > { %3114 = vst [vmem:[#allocation2 + $0x51] sm:$0xff] %v3027_v39  ;;  %v2997_v53 = vadd.f32 %v8298_v48, %v11761_v10  ;;  %v2822_v54 = vpop.f32.mrb[7].mxu0  ;;  %v9471_v48 = vpack.c.bf16 %v3182_v30, %v3181_v29  ;;  %v11835_v58 = vld [vmem:[#allocation2 + $0x20] sm:$0xff] }
 0x33a   : > { %3113 = vst [vmem:[#allocation2 + $0x49] sm:$0xff] %v3026_v44  ;;  %v2996_v57 = vadd.f32 %v11761_v10, %v2822_v54  ;;  %8376 = vmatprep.mubr.f32.mxu0 %v3026_v44  ;;  %v3183_v54 = vld [vmem:[#allocation3 + $0x50] sm:$0xff] }
 0x33b   : > { %v3029_v62 = vmax.f32 %v2997_v53, 0.0  ;;  %8377 = vmatmul.mubr.f32.gmra.mrb[38].mxu0 %v3027_v39  ;;  %v3731_v30 = vld [vmem:[#allocation3 + $0x150] sm:$0xff] }
 0x33c   : > { %v3028_v63 = vmax.f32 %v2996_v57, 0.0  ;;  %v8301_v23 = vpop.f32.mrb[8].mxu0  ;;  %v3184_v57 = vld [vmem:[#allocation3 + $0x58] sm:$0xff] }
 0x33d   : > { %3116 = vst [vmem:[#allocation2 + $0x69] sm:$0xff] %v3029_v62  ;;  %v2999_v7 = vadd.f32 %v8301_v23, %v11761_v10  ;;  %v2832_v9 = vpop.f32.mrb[9].mxu0 }
 0x33e   : > { %3115 = vst [vmem:[#allocation2 + $0x61] sm:$0xff] %v3028_v63  ;;  %v2998_v13 = vadd.f32 %v11761_v10, %v2832_v9  ;;  %8379 = vmatprep.mubr.f32.mxu0 %v3028_v63 }
 0x33f   : > { %v3031_v31 = vmax.f32 %v2999_v7, 0.0  ;;  %8380 = vmatmul.mubr.f32.gmra.mrb[40].mxu0 %v3029_v62 }
 0x340   : > { %v3030_v47 = vmax.f32 %v2998_v13, 0.0  ;;  %v8304_v20 = vpop.f32.mrb[10].mxu0  ;;  %v9475_v13 = vpack.c.bf16 %v3184_v57, %v3183_v54 }
 0x341   : > { %3118 = vst [vmem:[#allocation2 + $0x81] sm:$0xff] %v3031_v31  ;;  %v3001_v0 = vadd.f32 %v8304_v20, %v11761_v10  ;;  %v2842_v35 = vpop.f32.mrb[11].mxu0  ;;  %v3186_v20 = vld [vmem:[#allocation3 + $0x68] sm:$0xff]  ;;  %v11847_v29 = vld [vmem:[#allocation2 + $0x50] sm:$0xff] }
 0x342   : > { %3117 = vst [vmem:[#allocation2 + $0x79] sm:$0xff] %v3030_v47  ;;  %v3000_v36 = vadd.f32 %v11761_v10, %v2842_v35  ;;  %8382 = vmatprep.mubr.f32.mxu0 %v3030_v47  ;;  %v3185_v47 = vld [vmem:[#allocation3 + $0x60] sm:$0xff] }
 0x343   : > { %v3033_v26 = vmax.f32 %v3001_v0, 0.0  ;;  %8383 = vmatmul.mubr.f32.gmra.mrb[42].mxu0 %v3031_v31 }
 0x344   : > { %v3032_v12 = vmax.f32 %v3000_v36, 0.0  ;;  %v8307_v40 = vpop.f32.mrb[12].mxu0 }
 0x345   : > { %3120 = vst [vmem:[#allocation2 + $0x99] sm:$0xff] %v3033_v26  ;;  %v3003_v41 = vadd.f32 %v8307_v40, %v11761_v10  ;;  %v2852_v27 = vpop.f32.mrb[13].mxu0  ;;  %v9479_v40 = vpack.c.bf16 %v3186_v20, %v3185_v47  ;;  %v4027_v47 = vld [vmem:[#allocation3 + $0x180] sm:$0xff]  ;;  %v4028_v20 = vld [vmem:[#allocation3 + $0x188] sm:$0xff] }
 0x346   : > { %3119 = vst [vmem:[#allocation2 + $0x91] sm:$0xff] %v3032_v12  ;;  %v3002_v17 = vadd.f32 %v11761_v10, %v2852_v27  ;;  %8385 = vmatprep.mubr.f32.mxu0 %v3032_v12  ;;  %v3187_v27 = vld [vmem:[#allocation3 + $0x70] sm:$0xff] }
 0x347   : > { %v3035_v45 = vmax.f32 %v3003_v41, 0.0  ;;  %8386 = vmatmul.mubr.f32.gmra.mrb[44].mxu0 %v3033_v26 }
 0x348   : > { %v3034_v46 = vmax.f32 %v3002_v17, 0.0  ;;  %v8310_v21 = vpop.f32.mrb[14].mxu0  ;;  %v3188_v17 = vld [vmem:[#allocation3 + $0x78] sm:$0xff] }
 0x349   : > { %3122 = vst [vmem:[#allocation2 + $0xb1] sm:$0xff] %v3035_v45  ;;  %v3005_v50 = vadd.f32 %v8310_v21, %v11761_v10  ;;  %v2862_v51 = vpop.f32.mrb[15].mxu0  ;;  %v11859_v57 = vld [vmem:[#allocation2 + $0x80] sm:$0xff] }
 0x34a   : > { %3121 = vst [vmem:[#allocation2 + $0xa9] sm:$0xff] %v3034_v46  ;;  %v3004_v18 = vadd.f32 %v11761_v10, %v2862_v51  ;;  %8388 = vmatprep.mubr.f32.mxu0 %v3034_v46 }
 0x34b   : > { %v3037_v61 = vmax.f32 %v3005_v50, 0.0  ;;  %8389 = vmatmul.mubr.f32.gmra.mrb[46].mxu0 %v3035_v45 }
 0x34c   : > { %v3036_v1 = vmax.f32 %v3004_v18, 0.0  ;;  %v8313_v2 = vpop.f32.mrb[16].mxu0  ;;  %v9483_v18 = vpack.c.bf16 %v3188_v17, %v3187_v27 }
 0x34d   : > { %3124 = vst [vmem:[#allocation2 + $0xc9] sm:$0xff] %v3037_v61  ;;  %v3007_v22 = vadd.f32 %v8313_v2, %v11761_v10  ;;  %v2872_v4 = vpop.f32.mrb[17].mxu0 }
 0x34e   : > { %3123 = vst [vmem:[#allocation2 + $0xc1] sm:$0xff] %v3036_v1  ;;  %v3006_v14 = vadd.f32 %v11761_v10, %v2872_v4  ;;  %8391 = vmatprep.mubr.f32.mxu1 %v3036_v1 }
 0x34f   : > { %v3039_v33 = vmax.f32 %v3007_v22, 0.0  ;;  %8392 = vmatmul.mubr.f32.vlgmr.msra.gmra.mrb[0].mxu1 %v3037_v61  ;;  %v3722_v61 = vld [vmem:[#allocation3 + $0x108] sm:$0xff] }
 0x350   : > { %v3038_v34 = vmax.f32 %v3006_v14, 0.0  ;;  %v8316_v8 = vpop.f32.mrb[18].mxu0  ;;  %9458 = vmatpush3.bf16.msra.mxu1 %v11755_v43  ;;  %v9487_v14 = vpack.c.bf16 %v3722_v61, %v3721_v56 }
 0x351   : > { %3126 = vst [vmem:[#allocation2 + $0xe1] sm:$0xff] %v3039_v33  ;;  %v3009_v42 = vadd.f32 %v8316_v8, %v11761_v10  ;;  %v2882_v49 = vpop.f32.mrb[19].mxu0  ;;  %9460 = vmatprep.subr.bf16.mxu1 %v9459_v5 }
 0x352   : > { %3125 = vst [vmem:[#allocation2 + $0xd9] sm:$0xff] %v3038_v34  ;;  %v3008_v11 = vadd.f32 %v11761_v10, %v2882_v49  ;;  %8394 = vmatprep.mubr.f32.mxu1 %v3038_v34  ;;  %v3726_v49 = vld [vmem:[#allocation3 + $0x128] sm:$0xff] }
 0x353   : > { %v3041_v15 = vmax.f32 %v3009_v42, 0.0  ;;  %8395 = vmatmul.mubr.f32.gmra.mrb[2].mxu1 %v3039_v33  ;;  %v3724_v33 = vld [vmem:[#allocation3 + $0x118] sm:$0xff] }
 0x354   : > { %v3040_v3 = vmax.f32 %v3008_v11, 0.0  ;;  %v8319_v19 = vpop.f32.mrb[20].mxu0  ;;  %9462 = vmatpush3.bf16.msra.mxu1 %v9459_v5  ;;  %v9491_v42 = vpack.c.bf16 %v3724_v33, %v3723_v6  ;;  %v3688_v33 = vld [vmem:[#allocation2 + $0x2] sm:$0xff] }
 0x355   : > { %3128 = vst [vmem:[#allocation2 + $0xf9] sm:$0xff] %v3041_v15  ;;  %v3011_v43 = vadd.f32 %v8319_v19, %v11761_v10  ;;  %v2892_v16 = vpop.f32.mrb[21].mxu0  ;;  %9464 = vmatprep.subr.bf16.mxu1 %v9463_v52  ;;  %v11841_v19 = vld [vmem:[#allocation2 + $0x38] sm:$0xff] }
 0x356   : > { %3127 = vst [vmem:[#allocation2 + $0xf1] sm:$0xff] %v3040_v3  ;;  %v3010_v25 = vadd.f32 %v11761_v10, %v2892_v16  ;;  %8397 = vmatprep.mubr.f32.mxu1 %v3040_v3  ;;  %v11838_v3 = vld [vmem:[#allocation2 + $0x30] sm:$0xff]  ;;  %v3730_v16 = vld [vmem:[#allocation3 + $0x148] sm:$0xff] }
 0x357   : > { %v3043_v32 = vmax.f32 %v3011_v43, 0.0  ;;  %8398 = vmatmul.mubr.f32.gmra.mrb[4].mxu1 %v3041_v15  ;;  %v3728_v15 = vld [vmem:[#allocation3 + $0x138] sm:$0xff]  ;;  %v3729_v43 = vld [vmem:[#allocation3 + $0x140] sm:$0xff] }
 0x358   : > { %v3042_v37 = vmax.f32 %v3010_v25, 0.0  ;;  %v8322_v38 = vpop.f32.mrb[22].mxu0  ;;  %9466 = vmatpush3.bf16.msra.mxu1 %v9463_v52  ;;  %v11832_v52 = vld [vmem:[#allocation2 + $0x18] sm:$0xff]  ;;  %v9503_v25 = vpack.c.bf16 %v3730_v16, %v3729_v43 }
 0x359   : > { %3130 = vst [vmem:[#allocation2 + $0x111] sm:$0xff] %v3043_v32  ;;  %v3013_v39 = vadd.f32 %v8322_v38, %v11761_v10  ;;  %v2902_v44 = vpop.f32.mrb[23].mxu0  ;;  %9468 = vmatprep.subr.bf16.mxu1 %v9467_v24  ;;  %v11884_v27 = vld [vmem:[#allocation2 + $0xd8] sm:$0xff]  ;;  %v11887_v17 = vld [vmem:[#allocation2 + $0xe0] sm:$0xff] }
 0x35a   : > { %3129 = vst [vmem:[#allocation2 + $0x109] sm:$0xff] %v3042_v37  ;;  %v3012_v53 = vadd.f32 %v11761_v10, %v2902_v44  ;;  %8400 = vmatprep.mubr.f32.mxu1 %v3042_v37  ;;  %v11850_v37 = vld [vmem:[#allocation2 + $0x60] sm:$0xff]  ;;  %v3733_v44 = vld [vmem:[#allocation3 + $0x160] sm:$0xff] }
 0x35b   : > { %v3045_v62 = vmax.f32 %v3013_v39, 0.0  ;;  %8401 = vmatmul.mubr.f32.gmra.mrb[6].mxu1 %v3043_v32  ;;  %v3732_v32 = vld [vmem:[#allocation3 + $0x158] sm:$0xff]  ;;  %v11926_v43 = vld [vmem:[#allocation2 + $0x1a] sm:$0xff] }
 0x35c   : > { %v3044_v63 = vmax.f32 %v3012_v53, 0.0  ;;  %v8325_v23 = vpop.f32.mrb[24].mxu0  ;;  %9470 = vmatpush3.bf16.msra.mxu1 %v9467_v24  ;;  %v11844_v24 = vld [vmem:[#allocation2 + $0x48] sm:$0xff]  ;;  %v9507_v38 = vpack.c.bf16 %v3732_v32, %v3731_v30  ;;  %v11856_v53 = vld [vmem:[#allocation2 + $0x78] sm:$0xff]  ;;  %v4033_v30 = vld [vmem:[#allocation3 + $0x1b0] sm:$0xff] }
 0x35d   : > { %3132 = vst [vmem:[#allocation2 + $0x129] sm:$0xff] %v3045_v62  ;;  %v3015_v7 = vadd.f32 %v8325_v23, %v11761_v10  ;;  %v2912_v9 = vpop.f32.mrb[25].mxu0  ;;  %9472 = vmatprep.subr.bf16.mxu1 %v9471_v48  ;;  %v11853_v39 = vld [vmem:[#allocation2 + $0x68] sm:$0xff]  ;;  %v11862_v23 = vld [vmem:[#allocation2 + $0x90] sm:$0xff] }
 0x35e   : > { %3131 = vst [vmem:[#allocation2 + $0x121] sm:$0xff] %v3044_v63  ;;  %v3014_v31 = vadd.f32 %v11761_v10, %v2912_v9  ;;  %8403 = vmatprep.mubr.f32.mxu1 %v3044_v63  ;;  %v3736_v63 = vld [vmem:[#allocation3 + $0x178] sm:$0xff] }
 0x35f   : > { %v11790_v0 = vmax.f32 %v3015_v7, 0.0  ;;  %8404 = vmatmul.mubr.f32.gmra.mrb[8].mxu1 %v3045_v62  ;;  %v3735_v62 = vld [vmem:[#allocation3 + $0x170] sm:$0xff]  ;;  %v4034_v32 = vld [vmem:[#allocation3 + $0x1b8] sm:$0xff] }
 0x360   : > { %v11792_v35 = vmax.f32 %v3014_v31, 0.0  ;;  %v8328_v36 = vpop.f32.mrb[26].mxu0  ;;  %9474 = vmatpush3.bf16.msra.mxu1 %v9471_v48  ;;  %v3734_v48 = vld [vmem:[#allocation3 + $0x168] sm:$0xff] }
 0x361   : > { %3134 = vst [vmem:[#allocation2 + $0x141] sm:$0xff] %v11790_v0  ;;  %v3017_v26 = vadd.f32 %v8328_v36, %v11761_v10  ;;  %v2922_v12 = vpop.f32.mrb[27].mxu0  ;;  %9476 = vmatprep.subr.bf16.mxu1 %v9475_v13  ;;  %v9511_v54 = vpack.c.bf16 %v3734_v48, %v3733_v44  ;;  %v11869_v31 = vld [vmem:[#allocation2 + $0x98] sm:$0xff]  ;;  %v11872_v36 = vld [vmem:[#allocation2 + $0xa8] sm:$0xff]  ;;  %v9531_v44 = vpack.c.bf16 %v4034_v32, %v4033_v30  ;;  %v4041_v30 = vld [vmem:[#allocation3 + $0x1f0] sm:$0xff] }
 0x362   : > { %3133 = vst [vmem:[#allocation2 + $0x139] sm:$0xff] %v11792_v35  ;;  %v3016_v41 = vadd.f32 %v11761_v10, %v2922_v12  ;;  %8406 = vmatprep.mubr.f32.mxu1 %v11792_v35  ;;  %v11875_v12 = vld [vmem:[#allocation2 + $0xb0] sm:$0xff]  ;;  %v11935_v48 = vld [vmem:[#allocation2 + $0x3a] sm:$0xff]  ;;  %v4042_v32 = vld [vmem:[#allocation3 + $0x1f8] sm:$0xff] }
 0x363   : > { %v11799_v45 = vmax.f32 %v3017_v26, 0.0  ;;  %8407 = vmatmul.mubr.f32.gmra.mrb[10].mxu1 %v11790_v0  ;;  %v9519_v26 = vpack.c.bf16 %v4028_v20, %v4027_v47  ;;  %v11941_v47 = vld [vmem:[#allocation2 + $0x52] sm:$0xff]  ;;  %v4037_v20 = vld [vmem:[#allocation3 + $0x1d0] sm:$0xff] }
 0x364   : > { %v11802_v46 = vmax.f32 %v3016_v41, 0.0  ;;  %v8331_v21 = vpop.f32.mrb[28].mxu0  ;;  %9478 = vmatpush3.bf16.msra.mxu1 %v9475_v13  ;;  %v9515_v13 = vpack.c.bf16 %v3736_v63, %v3735_v62  ;;  %v11881_v41 = vld [vmem:[#allocation2 + $0xc8] sm:$0xff]  ;;  %v4036_v62 = vld [vmem:[#allocation3 + $0x1c8] sm:$0xff] }
 0x365   : > { %3136 = vst [vmem:[#allocation2 + $0x159] sm:$0xff] %v11799_v45  ;;  %v3019_v50 = vadd.f32 %v8331_v21, %v11761_v10  ;;  %v2932_v51 = vpop.f32.mrb[29].mxu0  ;;  %9480 = vmatprep.subr.bf16.mxu1 %v9479_v40  ;;  %v11890_v21 = vld [vmem:[#allocation2 + $0xf0] sm:$0xff]  ;;  %v11905_v56 = vld [vmem:[#allocation2 + $0x128] sm:$0xff] }
 0x366   : > { %3135 = vst [vmem:[#allocation2 + $0x151] sm:$0xff] %v11802_v46  ;;  %v3018_v55 = vadd.f32 %v11761_v10, %v2932_v51  ;;  %8409 = vmatprep.mubr.f32.mxu1 %v11802_v46  ;;  %v11896_v51 = vld [vmem:[#allocation2 + $0x108] sm:$0xff] }
 0x367   : > { %v11809_v1 = vmax.f32 %v3019_v50, 0.0  ;;  %8410 = vmatmul.mubr.f32.gmra.mrb[12].mxu1 %v11799_v45  ;;  %v11893_v50 = vld [vmem:[#allocation2 + $0xf8] sm:$0xff]  ;;  %v11938_v63 = vld [vmem:[#allocation2 + $0x4a] sm:$0xff] }
 0x368   : > { %v11812_v2 = vmax.f32 %v3018_v55, 0.0  ;;  %v8334_v22 = vpop.f32.mrb[30].mxu0  ;;  %9482 = vmatpush3.bf16.msra.mxu1 %v9479_v40  ;;  %v11878_v40 = vld [vmem:[#allocation2 + $0xc0] sm:$0xff] }
 0x369   : > { %3138 = vst [vmem:[#allocation2 + $0x171] sm:$0xff] %v11809_v1  ;;  %v11816_v4 = vadd.f32 %v8334_v22, %v11761_v10  ;;  %v2942_v5 = vpop.f32.mrb[31].mxu0  ;;  %9484 = vmatprep.subr.bf16.mxu1 %v9483_v18  ;;  %v11902_v55 = vld [vmem:[#allocation2 + $0x120] sm:$0xff]  ;;  %v11908_v61 = vld [vmem:[#allocation2 + $0x138] sm:$0xff] }
 0x36a   : > { %3137 = vst [vmem:[#allocation2 + $0x169] sm:$0xff] %v11812_v2  ;;  %v11820_v60 = vadd.f32 %v11761_v10, %v2942_v5  ;;  %8412 = vmatprep.mubr.f32.mxu1 %v11812_v2  ;;  %v3725_v10 = vld [vmem:[#allocation3 + $0x120] sm:$0xff]  ;;  %v11911_v22 = vld [vmem:[#allocation2 + $0x140] sm:$0xff] }
 0x36b   : > { %v12509_v34 = vmax.f32 %v11816_v4, 0.0  ;;  %8413 = vmatmul.mubr.f32.gmra.mrb[14].mxu1 %v11809_v1  ;;  %v9495_v11 = vpack.c.bf16 %v3726_v49, %v3725_v10  ;;  %v4029_v10 = vld [vmem:[#allocation3 + $0x190] sm:$0xff]  ;;  %v4030_v49 = vld [vmem:[#allocation3 + $0x198] sm:$0xff] }
 0x36c   : > { %v12510_v8 = vmax.f32 %v11820_v60, 0.0  ;;  %9486 = vmatpush3.bf16.msra.mxu1 %v9483_v18  ;;  %8447 = vmatprep.mubr.f32.mxu1 %v10523_v28  ;;  %v11864_v7 = vpop.f32.mrb[32].mxu0  ;;  %v11899_v18 = vld [vmem:[#allocation2 + $0x110] sm:$0xff] }
 0x36d   : > { %3140 = vst [vmem:[#allocation2 + $0x189] sm:$0xff] %v12509_v34  ;;  %9488 = vmatprep.subr.bf16.mxu1 %v9487_v14  ;;  %12598 = vst [vmem:[#allocation9_spill] sm:$0xff] %v11864_v7  ;;  %v11867_v9 = vpop.f32.mrb[33].mxu0  ;;  %v11914_v5 = vld [vmem:[#allocation2 + $0x150] sm:$0xff]  ;;  %v11998_v7 = vld [vmem:[#allocation2 + $0x13a] sm:$0xff] }
 0x36e   : > { %3139 = vst [vmem:[#allocation2 + $0x181] sm:$0xff] %v12510_v8  ;;  %12599 = vst [vmem:[#allocation10_spill] sm:$0xff] %v11867_v9  ;;  %v11989_v34 = vld [vmem:[#allocation2 + $0x112] sm:$0xff]  ;;  %v11992_v8 = vld [vmem:[#allocation2 + $0x122] sm:$0xff] }
 0x36f   : > { %8448 = vmatmul.mubr.f32.vlgmr.msra.gmra.mrb[16].mxu1 %v10523_v28  ;;  %v9499_v28 = vpack.c.bf16 %v3728_v15, %v3727_v59  ;;  %v9523_v59 = vpack.c.bf16 %v4030_v49, %v4029_v10  ;;  %v4031_v15 = vld [vmem:[#allocation3 + $0x1a0] sm:$0xff]  ;;  %12605 = vst [vmem:[#allocation16_spill] sm:$0xff] %v11989_v34  ;;  %12606 = vst [vmem:[#allocation17_spill] sm:$0xff] %v11992_v8 }
 0x370   : > { %8450 = vmatprep.mubr.f32.mxu1 %v11832_v52  ;;  %9490 = vmatpush3.bf16.msra.mxu1 %v9487_v14  ;;  %v11917_v14 = vld [vmem:[#allocation2 + $0x158] sm:$0xff]  ;;  %v11947_v49 = vld [vmem:[#allocation2 + $0x6a] sm:$0xff]  ;;  %12608 = vst [vmem:[#allocation19_spill] sm:$0xff] %v11998_v7 }
 0x371   : > { %9492 = vmatprep.subr.bf16.mxu1 %v9491_v42  ;;  %v11920_v6 = vld [vmem:[#allocation2 + $0x168] sm:$0xff] }
 0x372   : > { %v11995_v9 = vld [vmem:[#allocation2 + $0x12a] sm:$0xff] }
 0x373   : > { %8451 = vmatmul.mubr.f32.gmra.mrb[18].mxu1 %v11835_v58  ;;  %12607 = vst [vmem:[#allocation18_spill] sm:$0xff] %v11995_v9 }
 0x374   : > { %8453 = vmatprep.mubr.f32.mxu1 %v11838_v3  ;;  %9494 = vmatpush3.bf16.msra.mxu1 %v9491_v42  ;;  %v11923_v42 = vld [vmem:[#allocation2 + $0x170] sm:$0xff] }
 0x375   : > { %9496 = vmatprep.subr.bf16.mxu1 %v9495_v11 }
 0x377   : > { %8454 = vmatmul.mubr.f32.gmra.mrb[20].mxu1 %v11841_v19 }
 0x378   : > { %8456 = vmatprep.mubr.f32.mxu1 %v11844_v24  ;;  %9498 = vmatpush3.bf16.msra.mxu1 %v9495_v11  ;;  %v3689_v11 = vld [vmem:[#allocation2 + $0xa] sm:$0xff] }
 0x379   : > { %9500 = vmatprep.subr.bf16.mxu1 %v9499_v28 }
 0x37b   : > { %8457 = vmatmul.mubr.f32.gmra.mrb[22].mxu1 %v11847_v29 }
 0x37c   : > { %8459 = vmatprep.mubr.f32.mxu1 %v11850_v37  ;;  %9502 = vmatpush3.bf16.msra.mxu1 %v9499_v28  ;;  %v4032_v28 = vld [vmem:[#allocation3 + $0x1a8] sm:$0xff] }
 0x37d   : > { %9504 = vmatprep.subr.bf16.mxu1 %v9503_v25  ;;  %v9527_v16 = vpack.c.bf16 %v4032_v28, %v4031_v15  ;;  %v11950_v15 = vld [vmem:[#allocation2 + $0x7a] sm:$0xff] }
 0x37f   : > { %8460 = vmatmul.mubr.f32.gmra.mrb[24].mxu1 %v11853_v39 }
 0x380   : > { %8462 = vmatprep.mubr.f32.mxu1 %v11856_v53  ;;  %9506 = vmatpush3.bf16.msra.mxu1 %v9503_v25  ;;  %v11929_v25 = vld [vmem:[#allocation2 + $0x22] sm:$0xff] }
 0x381   : > { %9508 = vmatprep.subr.bf16.mxu1 %v9507_v38 }
 0x383   : > { %8463 = vmatmul.mubr.f32.gmra.mrb[26].mxu1 %v11859_v57 }
 0x384   : > { %8465 = vmatprep.mubr.f32.mxu1 %v11862_v23  ;;  %9510 = vmatpush3.bf16.msra.mxu1 %v9507_v38  ;;  %v11932_v38 = vld [vmem:[#allocation2 + $0x32] sm:$0xff] }
 0x385   : > { %9512 = vmatprep.subr.bf16.mxu1 %v9511_v54 }
 0x387   : > { %8466 = vmatmul.mubr.f32.gmra.mrb[28].mxu1 %v11869_v31 }
 0x388   : > { %8468 = vmatprep.mubr.f32.mxu1 %v11872_v36  ;;  %9514 = vmatpush3.bf16.msra.mxu1 %v9511_v54  ;;  %v4035_v54 = vld [vmem:[#allocation3 + $0x1c0] sm:$0xff] }
 0x389   : > { %9516 = vmatprep.subr.bf16.mxu1 %v9515_v13 }
 0x38b   : > { %8469 = vmatmul.mubr.f32.gmra.mrb[30].mxu1 %v11875_v12 }
 0x38c   : > { %8471 = vmatprep.mubr.f32.mxu1 %v11878_v40  ;;  %9518 = vmatpush3.bf16.msra.mxu1 %v9515_v13  ;;  %v9535_v13 = vpack.c.bf16 %v4036_v62, %v4035_v54  ;;  %v9547_v54 = vpack.c.bf16 %v4042_v32, %v4041_v30  ;;  %v11959_v62 = vld [vmem:[#allocation2 + $0x9a] sm:$0xff]  ;;  %v11971_v30 = vld [vmem:[#allocation2 + $0xca] sm:$0xff] }
 0x38d   : > { %9520 = vmatprep.subr.bf16.mxu1 %v9519_v26  ;;  %v11974_v32 = vld [vmem:[#allocation2 + $0xda] sm:$0xff] }
 0x38e   : > { %12600 = vst [vmem:[#allocation11_spill] sm:$0xff] %v11974_v32 }
 0x38f   : > { %8472 = vmatmul.mubr.f32.gmra.mrb[0].mxu1 %v11881_v41 }
 0x390   : > { %8474 = vmatprep.mubr.f32.mxu1 %v11884_v27 }
 0x393   : > { %8475 = vmatmul.mubr.f32.gmra.mrb[2].mxu1 %v11887_v17 }
 0x394   : > { %8477 = vmatprep.mubr.f32.mxu1 %v11890_v21 }
 0x397   : > { %8478 = vmatmul.mubr.f32.gmra.mrb[4].mxu1 %v11893_v50 }
 0x398   : > { %8480 = vmatprep.mubr.f32.mxu1 %v11896_v51 }
 0x39b   : > { %8481 = vmatmul.mubr.f32.gmra.mrb[6].mxu1 %v11899_v18 }
 0x39c   : > { %8483 = vmatprep.mubr.f32.mxu1 %v11902_v55 }
 0x39f   : > { %8484 = vmatmul.mubr.f32.gmra.mrb[8].mxu1 %v11905_v56 }
 0x3a0   : > { %8486 = vmatprep.mubr.f32.mxu1 %v11908_v61 }
 0x3a3   : > { %8487 = vmatmul.mubr.f32.gmra.mrb[10].mxu1 %v11911_v22 }
 0x3a4   : > { %8489 = vmatprep.mubr.f32.mxu1 %v11914_v5 }
 0x3a7   : > { %8490 = vmatmul.mubr.f32.gmra.mrb[12].mxu1 %v11917_v14 }
 0x3a8   : > { %8492 = vmatprep.mubr.f32.mxu1 %v11920_v6 }
 0x3ab   : > { %8493 = vmatmul.mubr.f32.gmra.mrb[14].mxu1 %v11923_v42 }
 0x3ac   : > { %8527 = vmatprep.mubr.f32.mxu1 %v3688_v33  ;;  %v11944_v33 = vld [vmem:[#allocation2 + $0x62] sm:$0xff] }
 0x3af   : > { %8528 = vmatmul.mubr.f32.vlgmr.msra.gmra.mrb[16].mxu1 %v3689_v11  ;;  %v4039_v11 = vld [vmem:[#allocation3 + $0x1e0] sm:$0xff] }
 0x3b0   : > { %8530 = vmatprep.mubr.f32.mxu1 %v11926_v43  ;;  %9522 = vmatpush3.bf16.msra.mxu1 %v9519_v26  ;;  %v4038_v26 = vld [vmem:[#allocation3 + $0x1d8] sm:$0xff] }
 0x3b1   : > { %9524 = vmatprep.subr.bf16.mxu1 %v9523_v59  ;;  %v9539_v10 = vpack.c.bf16 %v4038_v26, %v4037_v20  ;;  %v4333_v20 = vld [vmem:[#allocation3 + $0x200] sm:$0xff]  ;;  %v4334_v26 = vld [vmem:[#allocation3 + $0x208] sm:$0xff] }
 0x3b3   : > { %8531 = vmatmul.mubr.f32.gmra.mrb[18].mxu1 %v11929_v25 }
 0x3b4   : > { %8533 = vmatprep.mubr.f32.mxu1 %v11932_v38  ;;  %9526 = vmatpush3.bf16.msra.mxu1 %v9523_v59  ;;  %v4040_v59 = vld [vmem:[#allocation3 + $0x1e8] sm:$0xff] }
 0x3b5   : > { %9528 = vmatprep.subr.bf16.mxu1 %v9527_v16  ;;  %v9543_v28 = vpack.c.bf16 %v4040_v59, %v4039_v11  ;;  %v9551_v11 = vpack.c.bf16 %v4334_v26, %v4333_v20  ;;  %v11965_v59 = vld [vmem:[#allocation2 + $0xb2] sm:$0xff]  ;;  %v11983_v26 = vld [vmem:[#allocation2 + $0xfa] sm:$0xff] }
 0x3b6   : > { %v11980_v20 = vld [vmem:[#allocation2 + $0xf2] sm:$0xff]  ;;  %12603 = vst [vmem:[#allocation14_spill] sm:$0xff] %v11983_v26 }
 0x3b7   : > { %8534 = vmatmul.mubr.f32.gmra.mrb[20].mxu1 %v11935_v48  ;;  %12602 = vst [vmem:[#allocation13_spill] sm:$0xff] %v11980_v20 }
 0x3b8   : > { %8536 = vmatprep.mubr.f32.mxu1 %v11938_v63  ;;  %9530 = vmatpush3.bf16.msra.mxu1 %v9527_v16  ;;  %v11953_v16 = vld [vmem:[#allocation2 + $0x82] sm:$0xff] }
 0x3b9   : > { %9532 = vmatprep.subr.bf16.mxu1 %v9531_v44 }
 0x3bb   : > { %8537 = vmatmul.mubr.f32.gmra.mrb[22].mxu1 %v11941_v47 }
 0x3bc   : > { %8539 = vmatprep.mubr.f32.mxu1 %v11944_v33  ;;  %9534 = vmatpush3.bf16.msra.mxu1 %v9531_v44  ;;  %v11956_v44 = vld [vmem:[#allocation2 + $0x92] sm:$0xff] }
 0x3bd   : > { %9536 = vmatprep.subr.bf16.mxu1 %v9535_v13 }
 0x3bf   : > { %8540 = vmatmul.mubr.f32.gmra.mrb[24].mxu1 %v11947_v49 }
 0x3c0   : > { %8542 = vmatprep.mubr.f32.mxu1 %v11950_v15  ;;  %9538 = vmatpush3.bf16.msra.mxu1 %v9535_v13  ;;  %v11962_v13 = vld [vmem:[#allocation2 + $0xaa] sm:$0xff] }
 0x3c1   : > { %9540 = vmatprep.subr.bf16.mxu1 %v9539_v10 }
 0x3c3   : > { %8543 = vmatmul.mubr.f32.gmra.mrb[26].mxu1 %v11953_v16 }
 0x3c4   : > { %8545 = vmatprep.mubr.f32.mxu1 %v11956_v44  ;;  %9542 = vmatpush3.bf16.msra.mxu1 %v9539_v10  ;;  %v11968_v10 = vld [vmem:[#allocation2 + $0xc2] sm:$0xff] }
 0x3c5   : > { %9544 = vmatprep.subr.bf16.mxu1 %v9543_v28 }
 0x3c7   : > { %8546 = vmatmul.mubr.f32.gmra.mrb[28].mxu1 %v11959_v62 }
 0x3c8   : > { %8548 = vmatprep.mubr.f32.mxu1 %v11962_v13  ;;  %9546 = vmatpush3.bf16.msra.mxu1 %v9543_v28  ;;  %v11977_v28 = vld [vmem:[#allocation2 + $0xe2] sm:$0xff] }
 0x3c9   : > { %9548 = vmatprep.subr.bf16.mxu1 %v9547_v54  ;;  %12601 = vst [vmem:[#allocation12_spill] sm:$0xff] %v11977_v28 }
 0x3cb   : > { %8549 = vmatmul.mubr.f32.gmra.mrb[30].mxu1 %v11965_v59 }
 0x3cc   : > { %8551 = vmatprep.mubr.f32.mxu1 %v11968_v10  ;;  %9550 = vmatpush3.bf16.msra.mxu1 %v9547_v54  ;;  %v11986_v54 = vld [vmem:[#allocation2 + $0x10a] sm:$0xff] }
 0x3cd   : > { %9552 = vmatprep.subr.bf16.mxu1 %v9551_v11  ;;  %12604 = vst [vmem:[#allocation15_spill] sm:$0xff] %v11986_v54 }
 0x3cf   : > { %8552 = vmatmul.mubr.f32.gmra.mrb[0].mxu1 %v11971_v30 }
 0x3d0   : > { %8554 = vmatprep.mubr.f32.mxu1 %v11974_v32  ;;  %v4338_v32 = vld [vmem:[#allocation3 + $0x228] sm:$0xff] }
 0x3d3   : > { %8555 = vmatmul.mubr.f32.gmra.mrb[2].mxu1 %v11977_v28  ;;  %v4337_v28 = vld [vmem:[#allocation3 + $0x220] sm:$0xff] }
 0x3d4   : > { %8557 = vmatprep.mubr.f32.mxu1 %v11980_v20  ;;  %v4335_v20 = vld [vmem:[#allocation3 + $0x210] sm:$0xff] }
 0x3d7   : > { %8558 = vmatmul.mubr.f32.gmra.mrb[4].mxu1 %v11983_v26  ;;  %v12001_v26 = vld [vmem:[#allocation2 + $0x142] sm:$0xff] }
 0x3d8   : > { %8560 = vmatprep.mubr.f32.mxu1 %v11986_v54  ;;  %12609 = vst [vmem:[#allocation20_spill] sm:$0xff] %v12001_v26  ;;  %v12004_v54 = vld [vmem:[#allocation2 + $0x152] sm:$0xff] }
 0x3d9   : > { %12610 = vst [vmem:[#allocation21_spill] sm:$0xff] %v12004_v54 }
 0x3db   : > { %8561 = vmatmul.mubr.f32.gmra.mrb[6].mxu1 %v11989_v34  ;;  %v12007_v34 = vld [vmem:[#allocation2 + $0x15a] sm:$0xff] }
 0x3dc   : > { %8563 = vmatprep.mubr.f32.mxu1 %v11992_v8  ;;  %12611 = vst [vmem:[#allocation22_spill] sm:$0xff] %v12007_v34  ;;  %v12010_v8 = vld [vmem:[#allocation2 + $0x16a] sm:$0xff] }
 0x3dd   : > { %12612 = vst [vmem:[#allocation23_spill] sm:$0xff] %v12010_v8 }
 0x3df   : > { %8564 = vmatmul.mubr.f32.gmra.mrb[8].mxu1 %v11995_v9  ;;  %v12013_v9 = vld [vmem:[#allocation2 + $0x172] sm:$0xff] }
 0x3e0   : > { %8566 = vmatprep.mubr.f32.mxu1 %v11998_v7  ;;  %12613 = vst [vmem:[#allocation24_spill] sm:$0xff] %v12013_v9  ;;  %v4336_v7 = vld [vmem:[#allocation3 + $0x218] sm:$0xff] }
 0x3e3   : > { %8567 = vmatmul.mubr.f32.gmra.mrb[10].mxu1 %v12001_v26  ;;  %v9555_v26 = vpack.c.bf16 %v4336_v7, %v4335_v20  ;;  %v4342_v7 = vld [vmem:[#allocation3 + $0x248] sm:$0xff] }
 0x3e4   : > { %8569 = vmatprep.mubr.f32.mxu1 %v12004_v54  ;;  %v4339_v54 = vld [vmem:[#allocation3 + $0x230] sm:$0xff] }
 0x3e7   : > { %8570 = vmatmul.mubr.f32.gmra.mrb[12].mxu1 %v12007_v34  ;;  %v9559_v34 = vpack.c.bf16 %v4338_v32, %v4337_v28  ;;  %v4640_v32 = vld [vmem:[#allocation3 + $0x288] sm:$0xff] }
 0x3e8   : > { %8572 = vmatprep.mubr.f32.mxu1 %v12010_v8  ;;  %v4340_v8 = vld [vmem:[#allocation3 + $0x238] sm:$0xff] }
 0x3eb   : > { %8573 = vmatmul.mubr.f32.gmra.mrb[14].mxu1 %v12013_v9  ;;  %v9563_v9 = vpack.c.bf16 %v4340_v8, %v4339_v54  ;;  %v4346_v8 = vld [vmem:[#allocation3 + $0x268] sm:$0xff]  ;;  %v4643_v54 = vld [vmem:[#allocation3 + $0x2a0] sm:$0xff] }
 0x3ec   : > { %8607 = vmatprep.mubr.f32.mxu1 %v11832_v52  ;;  %v4341_v52 = vld [vmem:[#allocation3 + $0x240] sm:$0xff] }
 0x3ef   : > { %8608 = vmatmul.mubr.f32.vlgmr.msra.gmra.mrb[16].mxu1 %v11835_v58  ;;  %v9567_v58 = vpack.c.bf16 %v4342_v7, %v4341_v52  ;;  %v12083_v52 = vld [vmem:[#allocation2 + $0x39] sm:$0xff] }
 0x3f0   : > { %8610 = vmatprep.mubr.f32.mxu1 %v11838_v3  ;;  %9554 = vmatpush3.bf16.msra.mxu1 %v9551_v11  ;;  %v4343_v3 = vld [vmem:[#allocation3 + $0x250] sm:$0xff]  ;;  %v4344_v11 = vld [vmem:[#allocation3 + $0x258] sm:$0xff] }
 0x3f1   : > { %9556 = vmatprep.subr.bf16.mxu1 %v9555_v26  ;;  %v4645_v7 = vld [vmem:[#allocation3 + $0x2b0] sm:$0xff] }
 0x3f3   : > { %8611 = vmatmul.mubr.f32.gmra.mrb[18].mxu1 %v11841_v19  ;;  %v9571_v19 = vpack.c.bf16 %v4344_v11, %v4343_v3  ;;  %v12086_v3 = vld [vmem:[#allocation2 + $0x49] sm:$0xff] }
 0x3f4   : > { %8613 = vmatprep.mubr.f32.mxu1 %v11844_v24  ;;  %9558 = vmatpush3.bf16.msra.mxu1 %v9555_v26  ;;  %v4345_v24 = vld [vmem:[#allocation3 + $0x260] sm:$0xff] }
 0x3f5   : > { %9560 = vmatprep.subr.bf16.mxu1 %v9559_v34 }
 0x3f7   : > { %8614 = vmatmul.mubr.f32.gmra.mrb[20].mxu1 %v11847_v29  ;;  %v4347_v29 = vld [vmem:[#allocation3 + $0x270] sm:$0xff] }
 0x3f8   : > { %8616 = vmatprep.mubr.f32.mxu1 %v11850_v37  ;;  %9562 = vmatpush3.bf16.msra.mxu1 %v9559_v34  ;;  %v9575_v34 = vpack.c.bf16 %v4346_v8, %v4345_v24  ;;  %v4348_v37 = vld [vmem:[#allocation3 + $0x278] sm:$0xff]  ;;  %v4647_v24 = vld [vmem:[#allocation3 + $0x2c0] sm:$0xff]  ;;  %v4648_v8 = vld [vmem:[#allocation3 + $0x2c8] sm:$0xff] }
 0x3f9   : > { %9564 = vmatprep.subr.bf16.mxu1 %v9563_v9 }
 0x3fb   : > { %8617 = vmatmul.mubr.f32.gmra.mrb[22].mxu1 %v11853_v39  ;;  %v9579_v39 = vpack.c.bf16 %v4348_v37, %v4347_v29  ;;  %v9599_v29 = vpack.c.bf16 %v4648_v8, %v4647_v24  ;;  %v12095_v37 = vld [vmem:[#allocation2 + $0x69] sm:$0xff]  ;;  %v4947_v8 = vld [vmem:[#allocation3 + $0x308] sm:$0xff] }
 0x3fc   : > { %8619 = vmatprep.mubr.f32.mxu1 %v11856_v53  ;;  %9566 = vmatpush3.bf16.msra.mxu1 %v9563_v9  ;;  %v4639_v9 = vld [vmem:[#allocation3 + $0x280] sm:$0xff] }
 0x3fd   : > { %9568 = vmatprep.subr.bf16.mxu1 %v9567_v58  ;;  %v4946_v24 = vld [vmem:[#allocation3 + $0x300] sm:$0xff] }
 0x3ff   : > { %8620 = vmatmul.mubr.f32.gmra.mrb[24].mxu1 %v11859_v57  ;;  %v9583_v57 = vpack.c.bf16 %v4640_v32, %v4639_v9  ;;  %v4650_v9 = vld [vmem:[#allocation3 + $0x2d8] sm:$0xff]  ;;  %v12098_v32 = vld [vmem:[#allocation2 + $0x79] sm:$0xff] }
 0x400   : > { %8622 = vmatprep.mubr.f32.mxu1 %v11862_v23  ;;  %9570 = vmatpush3.bf16.msra.mxu1 %v9567_v58  ;;  %v4646_v58 = vld [vmem:[#allocation3 + $0x2b8] sm:$0xff] }
 0x401   : > { %9572 = vmatprep.subr.bf16.mxu1 %v9571_v19  ;;  %v9595_v11 = vpack.c.bf16 %v4646_v58, %v4645_v7  ;;  %v12110_v7 = vld [vmem:[#allocation2 + $0xa9] sm:$0xff] }
 0x403   : > { %8623 = vmatmul.mubr.f32.gmra.mrb[26].mxu1 %v11869_v31 }
 0x404   : > { %8625 = vmatprep.mubr.f32.mxu1 %v11872_v36  ;;  %9574 = vmatpush3.bf16.msra.mxu1 %v9571_v19  ;;  %v12089_v19 = vld [vmem:[#allocation2 + $0x51] sm:$0xff] }
 0x405   : > { %9576 = vmatprep.subr.bf16.mxu1 %v9575_v34 }
 0x406   : > { %v12029_v53 = vpop.f32.mrb[34].mxu0 }
 0x407   : > { %v12031_v28 = vpop.f32.mrb[35].mxu0  ;;  %8626 = vmatmul.mubr.f32.gmra.mrb[28].mxu1 %v11875_v12 }
 0x408   : > { %8628 = vmatprep.mubr.f32.mxu1 %v11878_v40  ;;  %9578 = vmatpush3.bf16.msra.mxu1 %v9575_v34  ;;  %v12092_v34 = vld [vmem:[#allocation2 + $0x61] sm:$0xff] }
 0x409   : > { %9580 = vmatprep.subr.bf16.mxu1 %v9579_v39 }
 0x40a   : > { %v12035_v23 = vpop.f32.mrb[36].mxu0 }
 0x40b   : > { %v12037_v31 = vpop.f32.mrb[37].mxu0  ;;  %8629 = vmatmul.mubr.f32.gmra.mrb[30].mxu1 %v11881_v41 }
 0x40c   : > { %8631 = vmatprep.mubr.f32.mxu1 %v11884_v27  ;;  %9582 = vmatpush3.bf16.msra.mxu1 %v9579_v39  ;;  %v4649_v39 = vld [vmem:[#allocation3 + $0x2d0] sm:$0xff] }
 0x40d   : > { %9584 = vmatprep.subr.bf16.mxu1 %v9583_v57 }
 0x40e   : > { %v12041_v36 = vpop.f32.mrb[38].mxu0 }
 0x40f   : > { %v12043_v20 = vpop.f32.mrb[39].mxu0  ;;  %8632 = vmatmul.mubr.f32.gmra.mrb[0].mxu1 %v11887_v17 }
 0x410   : > { %8634 = vmatprep.mubr.f32.mxu1 %v11890_v21 }
 0x412   : > { %v12047_v12 = vpop.f32.mrb[40].mxu0 }
 0x413   : > { %v12049_v40 = vpop.f32.mrb[41].mxu0  ;;  %8635 = vmatmul.mubr.f32.gmra.mrb[2].mxu1 %v11893_v50 }
 0x414   : > { %8637 = vmatprep.mubr.f32.mxu1 %v11896_v51  ;;  %v12074_v51 = vld [vmem:[#allocation2 + $0x180] sm:$0xff] }
 0x416   : > { %v12053_v41 = vpop.f32.mrb[42].mxu0 }
 0x417   : > { %v12055_v27 = vpop.f32.mrb[43].mxu0  ;;  %8638 = vmatmul.mubr.f32.gmra.mrb[4].mxu1 %v11899_v18  ;;  %v12077_v18 = vld [vmem:[#allocation2 + $0x188] sm:$0xff] }
 0x418   : > { %8640 = vmatprep.mubr.f32.mxu1 %v11902_v55  ;;  %v4641_v55 = vld [vmem:[#allocation3 + $0x290] sm:$0xff] }
 0x41a   : > { %v12059_v26 = vpop.f32.mrb[44].mxu0 }
 0x41b   : > { %12614 = vst [vmem:[#allocation25_spill] sm:$0xff] %v12059_v26  ;;  %v12061_v17 = vpop.f32.mrb[45].mxu0  ;;  %8641 = vmatmul.mubr.f32.gmra.mrb[6].mxu1 %v11905_v56  ;;  %v4642_v56 = vld [vmem:[#allocation3 + $0x298] sm:$0xff]  ;;  %v4951_v26 = vld [vmem:[#allocation3 + $0x328] sm:$0xff] }
 0x41c   : > { %12615 = vst [vmem:[#allocation26_spill] sm:$0xff] %v12061_v17  ;;  %8643 = vmatprep.mubr.f32.mxu1 %v11908_v61  ;;  %v4300_v61 = vld [vmem:[#allocation2 + $0x19] sm:$0xff]  ;;  %v12619_v17 = vmax.f32 %v11816_v4, 0.0  ;;  %v4954_v4 = vld [vmem:[#allocation3 + $0x340] sm:$0xff] }
 0x41e   : > { %v12065_v21 = vpop.f32.mrb[46].mxu0 }
 0x41f   : > { %12616 = vst [vmem:[#allocation27_spill] sm:$0xff] %v12065_v21  ;;  %v12067_v50 = vpop.f32.mrb[47].mxu0  ;;  %8644 = vmatmul.mubr.f32.gmra.mrb[8].mxu1 %v11911_v22  ;;  %v9587_v22 = vpack.c.bf16 %v4642_v56, %v4641_v55  ;;  %v12101_v55 = vld [vmem:[#allocation2 + $0x81] sm:$0xff]  ;;  %v4651_v56 = vld [vmem:[#allocation3 + $0x2e0] sm:$0xff] }
 0x420   : > { %12617 = vst [vmem:[#allocation28_spill] sm:$0xff] %v12067_v50  ;;  %8646 = vmatprep.mubr.f32.mxu1 %v11914_v5  ;;  %v4301_v5 = vld [vmem:[#allocation2 + $0x21] sm:$0xff] }
 0x421   : > { %v4948_v50 = vld [vmem:[#allocation3 + $0x310] sm:$0xff]  ;;  %v4949_v21 = vld [vmem:[#allocation3 + $0x318] sm:$0xff] }
 0x423   : > { %8647 = vmatmul.mubr.f32.gmra.mrb[10].mxu1 %v11917_v14  ;;  %v4644_v14 = vld [vmem:[#allocation3 + $0x2a8] sm:$0xff] }
 0x424   : > { %8649 = vmatprep.mubr.f32.mxu1 %v11920_v6  ;;  %v12080_v6 = vld [vmem:[#allocation2 + $0x31] sm:$0xff] }
 0x427   : > { %8650 = vmatmul.mubr.f32.gmra.mrb[12].mxu1 %v11923_v42  ;;  %v9591_v42 = vpack.c.bf16 %v4644_v14, %v4643_v54  ;;  %v12107_v54 = vld [vmem:[#allocation2 + $0x99] sm:$0xff] }
 0x428   : > { %8652 = vmatprep.mubr.f32.mxu1 %v12074_v51  ;;  %v4653_v14 = vld [vmem:[#allocation3 + $0x2f0] sm:$0xff] }
 0x42b   : > { %8653 = vmatmul.mubr.f32.gmra.mrb[14].mxu1 %v12077_v18 }
 0x42c   : > { %8687 = vmatprep.mubr.f32.mxu1 %v4300_v61  ;;  %v4652_v61 = vld [vmem:[#allocation3 + $0x2e8] sm:$0xff] }
 0x42f   : > { %8688 = vmatmul.mubr.f32.vlgmr.msra.gmra.mrb[16].mxu1 %v4301_v5  ;;  %v9607_v5 = vpack.c.bf16 %v4652_v61, %v4651_v56  ;;  %v12125_v56 = vld [vmem:[#allocation2 + $0xe1] sm:$0xff]  ;;  %v12128_v61 = vld [vmem:[#allocation2 + $0xf1] sm:$0xff] }
 0x430   : > { %8690 = vmatprep.mubr.f32.mxu1 %v12080_v6  ;;  %9586 = vmatpush3.bf16.msra.mxu1 %v9583_v57  ;;  %v9603_v57 = vpack.c.bf16 %v4650_v9, %v4649_v39  ;;  %v9615_v39 = vpack.c.bf16 %v4947_v8, %v4946_v24  ;;  %v12119_v9 = vld [vmem:[#allocation2 + $0xc9] sm:$0xff]  ;;  %v12618_v8 = vmax.f32 %v11820_v60, 0.0  ;;  %v4955_v60 = vld [vmem:[#allocation3 + $0x348] sm:$0xff] }
 0x431   : > { %9588 = vmatprep.subr.bf16.mxu1 %v9587_v22  ;;  %v12143_v24 = vld [vmem:[#allocation2 + $0x129] sm:$0xff] }
 0x433   : > { %8691 = vmatmul.mubr.f32.gmra.mrb[18].mxu1 %v12083_v52 }
 0x434   : > { %8693 = vmatprep.mubr.f32.mxu1 %v12086_v3  ;;  %9590 = vmatpush3.bf16.msra.mxu1 %v9587_v22  ;;  %v12104_v22 = vld [vmem:[#allocation2 + $0x91] sm:$0xff] }
 0x435   : > { %9592 = vmatprep.subr.bf16.mxu1 %v9591_v42 }
 0x437   : > { %8694 = vmatmul.mubr.f32.gmra.mrb[20].mxu1 %v12089_v19 }
 0x438   : > { %8696 = vmatprep.mubr.f32.mxu1 %v12092_v34  ;;  %9594 = vmatpush3.bf16.msra.mxu1 %v9591_v42  ;;  %v4654_v42 = vld [vmem:[#allocation3 + $0x2f8] sm:$0xff] }
 0x439   : > { %9596 = vmatprep.subr.bf16.mxu1 %v9595_v11  ;;  %v9611_v58 = vpack.c.bf16 %v4654_v42, %v4653_v14  ;;  %v12134_v14 = vld [vmem:[#allocation2 + $0x109] sm:$0xff]  ;;  %v12137_v42 = vld [vmem:[#allocation2 + $0x111] sm:$0xff] }
 0x43b   : > { %8697 = vmatmul.mubr.f32.gmra.mrb[22].mxu1 %v12095_v37 }
 0x43c   : > { %8699 = vmatprep.mubr.f32.mxu1 %v12098_v32  ;;  %9598 = vmatpush3.bf16.msra.mxu1 %v9595_v11  ;;  %v12113_v11 = vld [vmem:[#allocation2 + $0xb1] sm:$0xff] }
 0x43d   : > { %9600 = vmatprep.subr.bf16.mxu1 %v9599_v29 }
 0x43f   : > { %8700 = vmatmul.mubr.f32.gmra.mrb[24].mxu1 %v12101_v55 }
 0x440   : > { %8702 = vmatprep.mubr.f32.mxu1 %v12104_v22  ;;  %9602 = vmatpush3.bf16.msra.mxu1 %v9599_v29  ;;  %v12116_v29 = vld [vmem:[#allocation2 + $0xc1] sm:$0xff] }
 0x441   : > { %9604 = vmatprep.subr.bf16.mxu1 %v9603_v57 }
 0x443   : > { %8703 = vmatmul.mubr.f32.gmra.mrb[26].mxu1 %v12107_v54 }
 0x444   : > { %8705 = vmatprep.mubr.f32.mxu1 %v12110_v7  ;;  %9606 = vmatpush3.bf16.msra.mxu1 %v9603_v57  ;;  %v12122_v57 = vld [vmem:[#allocation2 + $0xd9] sm:$0xff] }
 0x445   : > { %9608 = vmatprep.subr.bf16.mxu1 %v9607_v5 }
 0x447   : > { %8706 = vmatmul.mubr.f32.gmra.mrb[28].mxu1 %v12113_v11 }
 0x448   : > { %8708 = vmatprep.mubr.f32.mxu1 %v12116_v29  ;;  %9610 = vmatpush3.bf16.msra.mxu1 %v9607_v5  ;;  %v12131_v5 = vld [vmem:[#allocation2 + $0xf9] sm:$0xff] }
 0x449   : > { %9612 = vmatprep.subr.bf16.mxu1 %v9611_v58 }
 0x44b   : > { %8709 = vmatmul.mubr.f32.gmra.mrb[30].mxu1 %v12119_v9 }
 0x44c   : > { %8711 = vmatprep.mubr.f32.mxu1 %v12122_v57  ;;  %9614 = vmatpush3.bf16.msra.mxu1 %v9611_v58  ;;  %v12140_v58 = vld [vmem:[#allocation2 + $0x121] sm:$0xff] }
 0x44d   : > { %9616 = vmatprep.subr.bf16.mxu1 %v9615_v39 }
 0x44f   : > { %8712 = vmatmul.mubr.f32.gmra.mrb[0].mxu1 %v12125_v56 }
 0x450   : > { %8714 = vmatprep.mubr.f32.mxu1 %v12128_v61 }
 0x453   : > { %8715 = vmatmul.mubr.f32.gmra.mrb[2].mxu1 %v12131_v5 }
 0x454   : > { %8717 = vmatprep.mubr.f32.mxu1 %v12134_v14 }
 0x457   : > { %8718 = vmatmul.mubr.f32.gmra.mrb[4].mxu1 %v12137_v42 }
 0x458   : > { %8720 = vmatprep.mubr.f32.mxu1 %v12140_v58 }
 0x45b   : > { %8721 = vmatmul.mubr.f32.gmra.mrb[6].mxu1 %v12143_v24 }
 0x45c   : > { %8723 = vmatprep.mubr.f32.mxu1 %v11792_v35  ;;  %v9619_v35 = vpack.c.bf16 %v4949_v21, %v4948_v50  ;;  %v5253_v21 = vld [vmem:[#allocation3 + $0x388] sm:$0xff] }
 0x45d   : > { %v12623_v50 = vld [vmem:[#allocation14_spill] sm:$0xff] }
 0x45f   : > { %8724 = vmatmul.mubr.f32.gmra.mrb[8].mxu1 %v11790_v0  ;;  %v4950_v0 = vld [vmem:[#allocation3 + $0x320] sm:$0xff] }
 0x460   : > { %8726 = vmatprep.mubr.f32.mxu1 %v11802_v46  ;;  %v4952_v46 = vld [vmem:[#allocation3 + $0x330] sm:$0xff] }
 0x463   : > { %8727 = vmatmul.mubr.f32.gmra.mrb[10].mxu1 %v11799_v45  ;;  %v9623_v45 = vpack.c.bf16 %v4951_v26, %v4950_v0  ;;  %v4959_v26 = vld [vmem:[#allocation3 + $0x368] sm:$0xff]  ;;  %v12630_v0 = vld [vmem:[#allocation21_spill] sm:$0xff] }
 0x464   : > { %8729 = vmatprep.mubr.f32.mxu1 %v11812_v2 }
 0x467   : > { %8730 = vmatmul.mubr.f32.gmra.mrb[12].mxu1 %v11809_v1  ;;  %v4953_v1 = vld [vmem:[#allocation3 + $0x338] sm:$0xff] }
 0x468   : > { %8732 = vmatprep.mubr.f32.mxu1 %v12618_v8  ;;  %v9627_v2 = vpack.c.bf16 %v4953_v1, %v4952_v46  ;;  %v12627_v8 = vld [vmem:[#allocation18_spill] sm:$0xff]  ;;  %v12632_v46 = vld [vmem:[#allocation23_spill] sm:$0xff]  ;;  %v12633_v1 = vld [vmem:[#allocation24_spill] sm:$0xff] }
 0x46b   : > { %8733 = vmatmul.mubr.f32.gmra.mrb[14].mxu1 %v12619_v17  ;;  %v4961_v17 = vld [vmem:[#allocation3 + $0x378] sm:$0xff] }
 0x46c   : > { %8767 = vmatprep.mubr.f32.mxu1 %v11926_v43  ;;  %v9631_v43 = vpack.c.bf16 %v4955_v60, %v4954_v4  ;;  %v12189_v4 = vld [vmem:[#allocation2 + $0x18a] sm:$0xff]  ;;  %v5254_v60 = vld [vmem:[#allocation3 + $0x390] sm:$0xff] }
 0x46f   : > { %8768 = vmatmul.mubr.f32.vlgmr.msra.gmra.mrb[16].mxu1 %v11929_v25  ;;  %v4956_v25 = vld [vmem:[#allocation3 + $0x350] sm:$0xff] }
 0x470   : > { %8770 = vmatprep.mubr.f32.mxu1 %v11932_v38  ;;  %9618 = vmatpush3.bf16.msra.mxu1 %v9615_v39  ;;  %v4957_v38 = vld [vmem:[#allocation3 + $0x358] sm:$0xff]  ;;  %v12624_v39 = vld [vmem:[#allocation15_spill] sm:$0xff] }
 0x471   : > { %9620 = vmatprep.subr.bf16.mxu1 %v9619_v35 }
 0x473   : > { %8771 = vmatmul.mubr.f32.gmra.mrb[18].mxu1 %v11935_v48  ;;  %v9635_v48 = vpack.c.bf16 %v4957_v38, %v4956_v25  ;;  %v4913_v25 = vld [vmem:[#allocation2 + $0x30] sm:$0xff] }
 0x474   : > { %8773 = vmatprep.mubr.f32.mxu1 %v11938_v63  ;;  %9622 = vmatpush3.bf16.msra.mxu1 %v9619_v35  ;;  %v4958_v63 = vld [vmem:[#allocation3 + $0x360] sm:$0xff]  ;;  %v12628_v35 = vld [vmem:[#allocation19_spill] sm:$0xff] }
 0x475   : > { %9624 = vmatprep.subr.bf16.mxu1 %v9623_v45 }
 0x477   : > { %8774 = vmatmul.mubr.f32.gmra.mrb[20].mxu1 %v11941_v47  ;;  %v9639_v47 = vpack.c.bf16 %v4959_v26, %v4958_v63  ;;  %v5256_v63 = vld [vmem:[#allocation3 + $0x3a0] sm:$0xff]  ;;  %v5257_v26 = vld [vmem:[#allocation3 + $0x3a8] sm:$0xff] }
 0x478   : > { %8776 = vmatprep.mubr.f32.mxu1 %v11944_v33  ;;  %9626 = vmatpush3.bf16.msra.mxu1 %v9623_v45  ;;  %v4960_v33 = vld [vmem:[#allocation3 + $0x370] sm:$0xff]  ;;  %v12631_v45 = vld [vmem:[#allocation22_spill] sm:$0xff] }
 0x479   : > { %9628 = vmatprep.subr.bf16.mxu1 %v9627_v2 }
 0x47b   : > { %8777 = vmatmul.mubr.f32.gmra.mrb[22].mxu1 %v11947_v49  ;;  %v9643_v49 = vpack.c.bf16 %v4961_v17, %v4960_v33  ;;  %v9655_v33 = vpack.c.bf16 %v5257_v26, %v5256_v63  ;;  %v4916_v17 = vld [vmem:[#allocation2 + $0x50] sm:$0xff]  ;;  %v4926_v26 = vld [vmem:[#allocation2 + $0xc8] sm:$0xff] }
 0x47c   : > { %8779 = vmatprep.mubr.f32.mxu1 %v11950_v15  ;;  %9630 = vmatpush3.bf16.msra.mxu1 %v9627_v2  ;;  %v5252_v15 = vld [vmem:[#allocation3 + $0x380] sm:$0xff]  ;;  %v12186_v2 = vld [vmem:[#allocation2 + $0x182] sm:$0xff] }
 0x47d   : > { %9632 = vmatprep.subr.bf16.mxu1 %v9631_v43 }
 0x47f   : > { %8780 = vmatmul.mubr.f32.gmra.mrb[24].mxu1 %v11953_v16  ;;  %v9647_v16 = vpack.c.bf16 %v5253_v21, %v5252_v15  ;;  %v5259_v15 = vld [vmem:[#allocation3 + $0x3b8] sm:$0xff]  ;;  %v4917_v21 = vld [vmem:[#allocation2 + $0x60] sm:$0xff] }
 0x480   : > { %8782 = vmatprep.mubr.f32.mxu1 %v11956_v44  ;;  %9634 = vmatpush3.bf16.msra.mxu1 %v9631_v43  ;;  %v12620_v44 = vld [vmem:[#allocation11_spill] sm:$0xff]  ;;  %v5255_v43 = vld [vmem:[#allocation3 + $0x398] sm:$0xff] }
 0x481   : > { %9636 = vmatprep.subr.bf16.mxu1 %v9635_v48  ;;  %v9651_v38 = vpack.c.bf16 %v5255_v43, %v5254_v60  ;;  %v4924_v43 = vld [vmem:[#allocation2 + $0xb0] sm:$0xff] }
 0x483   : > { %8783 = vmatmul.mubr.f32.gmra.mrb[26].mxu1 %v11959_v62  ;;  %v12621_v62 = vld [vmem:[#allocation12_spill] sm:$0xff] }
 0x484   : > { %8785 = vmatprep.mubr.f32.mxu1 %v11962_v13  ;;  %9638 = vmatpush3.bf16.msra.mxu1 %v9635_v48  ;;  %v12622_v13 = vld [vmem:[#allocation13_spill] sm:$0xff]  ;;  %v4914_v48 = vld [vmem:[#allocation2 + $0x38] sm:$0xff] }
 0x485   : > { %9640 = vmatprep.subr.bf16.mxu1 %v9639_v47 }
 0x487   : > { %8786 = vmatmul.mubr.f32.gmra.mrb[28].mxu1 %v11965_v59  ;;  %v12625_v59 = vld [vmem:[#allocation16_spill] sm:$0xff] }
 0x488   : > { %8788 = vmatprep.mubr.f32.mxu1 %v11968_v10  ;;  %9642 = vmatpush3.bf16.msra.mxu1 %v9639_v47  ;;  %v12626_v10 = vld [vmem:[#allocation17_spill] sm:$0xff]  ;;  %v4915_v47 = vld [vmem:[#allocation2 + $0x48] sm:$0xff] }
 0x489   : > { %9644 = vmatprep.subr.bf16.mxu1 %v9643_v49 }
 0x48b   : > { %8789 = vmatmul.mubr.f32.gmra.mrb[30].mxu1 %v11971_v30  ;;  %v12629_v30 = vld [vmem:[#allocation20_spill] sm:$0xff] }
 0x48c   : > { %8791 = vmatprep.mubr.f32.mxu1 %v12620_v44  ;;  %9646 = vmatpush3.bf16.msra.mxu1 %v9643_v49  ;;  %v5258_v49 = vld [vmem:[#allocation3 + $0x3b0] sm:$0xff] }
 0x48d   : > { %9648 = vmatprep.subr.bf16.mxu1 %v9647_v16  ;;  %v9659_v44 = vpack.c.bf16 %v5259_v15, %v5258_v49  ;;  %v4928_v15 = vld [vmem:[#allocation2 + $0xe0] sm:$0xff] }
 0x48f   : > { %8792 = vmatmul.mubr.f32.gmra.mrb[0].mxu1 %v12621_v62  ;;  %v4918_v62 = vld [vmem:[#allocation2 + $0x68] sm:$0xff] }
 0x490   : > { %8794 = vmatprep.mubr.f32.mxu1 %v12622_v13  ;;  %v5260_v13 = vld [vmem:[#allocation3 + $0x3c0] sm:$0xff] }
 0x493   : > { %8795 = vmatmul.mubr.f32.gmra.mrb[2].mxu1 %v12623_v50  ;;  %v5261_v50 = vld [vmem:[#allocation3 + $0x3c8] sm:$0xff] }
 0x494   : > { %8797 = vmatprep.mubr.f32.mxu1 %v12624_v39  ;;  %v4919_v39 = vld [vmem:[#allocation2 + $0x78] sm:$0xff] }
 0x497   : > { %8798 = vmatmul.mubr.f32.gmra.mrb[4].mxu1 %v12625_v59  ;;  %v4920_v59 = vld [vmem:[#allocation2 + $0x80] sm:$0xff] }
 0x498   : > { %8800 = vmatprep.mubr.f32.mxu1 %v12626_v10  ;;  %v5262_v10 = vld [vmem:[#allocation3 + $0x3d0] sm:$0xff] }
 0x49b   : > { %8801 = vmatmul.mubr.f32.gmra.mrb[6].mxu1 %v12627_v8  ;;  %v5263_v8 = vld [vmem:[#allocation3 + $0x3d8] sm:$0xff] }
 0x49c   : > { %8803 = vmatprep.mubr.f32.mxu1 %v12628_v35  ;;  %v4921_v35 = vld [vmem:[#allocation2 + $0x90] sm:$0xff] }
 0x49f   : > { %8804 = vmatmul.mubr.f32.gmra.mrb[8].mxu1 %v12629_v30  ;;  %v9667_v30 = vpack.c.bf16 %v5263_v8, %v5262_v10  ;;  %v4937_v10 = vld [vmem:[#allocation2 + $0x150] sm:$0xff]  ;;  %v4938_v8 = vld [vmem:[#allocation2 + $0x158] sm:$0xff] }
 0x4a0   : > { %8806 = vmatprep.mubr.f32.mxu1 %v12630_v0  ;;  %v4922_v0 = vld [vmem:[#allocation2 + $0x98] sm:$0xff] }
 0x4a3   : > { %8807 = vmatmul.mubr.f32.gmra.mrb[10].mxu1 %v12631_v45  ;;  %v5264_v45 = vld [vmem:[#allocation3 + $0x3e0] sm:$0xff] }
 0x4a4   : > { %8809 = vmatprep.mubr.f32.mxu1 %v12632_v46  ;;  %v5265_v46 = vld [vmem:[#allocation3 + $0x3e8] sm:$0xff] }
 0x4a5   : > { %v9671_v60 = vpack.c.bf16 %v5265_v46, %v5264_v45  ;;  %v5560_v45 = vld [vmem:[#allocation3 + $0x410] sm:$0xff]  ;;  %v5561_v46 = vld [vmem:[#allocation3 + $0x418] sm:$0xff] }
 0x4a7   : > { %8810 = vmatmul.mubr.f32.gmra.mrb[12].mxu1 %v12633_v1  ;;  %v4923_v1 = vld [vmem:[#allocation2 + $0xa8] sm:$0xff] }
 0x4a8   : > { %8812 = vmatprep.mubr.f32.mxu1 %v12186_v2 }
 0x4ab   : > { %8813 = vmatmul.mubr.f32.gmra.mrb[14].mxu1 %v12189_v4 }
 0x4ac   : > { %8847 = vmatprep.mubr.f32.mxu1 %v4913_v25  ;;  %v5266_v25 = vld [vmem:[#allocation3 + $0x3f0] sm:$0xff] }
 0x4af   : > { %8848 = vmatmul.mubr.f32.vlgmr.msra.gmra.mrb[16].mxu1 %v4914_v48  ;;  %v4925_v48 = vld [vmem:[#allocation2 + $0xc0] sm:$0xff] }
 0x4b0   : > { %8850 = vmatprep.mubr.f32.mxu1 %v4915_v47  ;;  %9650 = vmatpush3.bf16.msra.mxu1 %v9647_v16  ;;  %v9663_v16 = vpack.c.bf16 %v5261_v50, %v5260_v13  ;;  %v5558_v47 = vld [vmem:[#allocation3 + $0x400] sm:$0xff]  ;;  %v4933_v50 = vld [vmem:[#allocation2 + $0x120] sm:$0xff] }
 0x4b1   : > { %9652 = vmatprep.subr.bf16.mxu1 %v9651_v38  ;;  %v4932_v13 = vld [vmem:[#allocation2 + $0x110] sm:$0xff] }
 0x4b3   : > { %8851 = vmatmul.mubr.f32.gmra.mrb[18].mxu1 %v4916_v17  ;;  %v4927_v17 = vld [vmem:[#allocation2 + $0xd8] sm:$0xff] }
 0x4b4   : > { %8853 = vmatprep.mubr.f32.mxu1 %v4917_v21  ;;  %9654 = vmatpush3.bf16.msra.mxu1 %v9651_v38  ;;  %v5267_v38 = vld [vmem:[#allocation3 + $0x3f8] sm:$0xff]  ;;  %v4929_v21 = vld [vmem:[#allocation2 + $0xf0] sm:$0xff] }
 0x4b5   : > { %9656 = vmatprep.subr.bf16.mxu1 %v9655_v33  ;;  %v9675_v63 = vpack.c.bf16 %v5267_v38, %v5266_v25  ;;  %v5565_v38 = vld [vmem:[#allocation3 + $0x438] sm:$0xff] }
 0x4b7   : > { %8854 = vmatmul.mubr.f32.gmra.mrb[20].mxu1 %v4918_v62  ;;  %v4931_v62 = vld [vmem:[#allocation2 + $0x108] sm:$0xff] }
 0x4b8   : > { %8856 = vmatprep.mubr.f32.mxu1 %v4919_v39  ;;  %9658 = vmatpush3.bf16.msra.mxu1 %v9655_v33  ;;  %v5559_v33 = vld [vmem:[#allocation3 + $0x408] sm:$0xff]  ;;  %v4934_v39 = vld [vmem:[#allocation2 + $0x128] sm:$0xff] }
 0x4b9   : > { %9660 = vmatprep.subr.bf16.mxu1 %v9659_v44  ;;  %v9679_v49 = vpack.c.bf16 %v5559_v33, %v5558_v47  ;;  %v5573_v47 = vld [vmem:[#allocation3 + $0x478] sm:$0xff]  ;;  %v5905_v33 = vld [vmem:[%s12470_s5 + $0x18] sm:$0xff] }
 0x4bb   : > { %8857 = vmatmul.mubr.f32.gmra.mrb[22].mxu1 %v4920_v59  ;;  %v4936_v59 = vld [vmem:[#allocation2 + $0x140] sm:$0xff] }
 0x4bc   : > { %8859 = vmatprep.mubr.f32.mxu1 %v4921_v35  ;;  %9662 = vmatpush3.bf16.msra.mxu1 %v9659_v44  ;;  %v4930_v44 = vld [vmem:[#allocation2 + $0xf8] sm:$0xff]  ;;  %v4939_v35 = vld [vmem:[#allocation2 + $0x168] sm:$0xff] }
 0x4bd   : > { %9664 = vmatprep.subr.bf16.mxu1 %v9663_v16 }
 0x4bf   : > { %8860 = vmatmul.mubr.f32.gmra.mrb[24].mxu1 %v4922_v0  ;;  %v10423_v0 = vld [vmem:[#allocation2] sm:$0xff] }
 0x4c0   : > { %8862 = vmatprep.mubr.f32.mxu1 %v4923_v1  ;;  %9666 = vmatpush3.bf16.msra.mxu1 %v9663_v16  ;;  %v4935_v16 = vld [vmem:[#allocation2 + $0x138] sm:$0xff]  ;;  %v9683_v1 = vpack.c.bf16 %v5561_v46, %v5560_v45  ;;  %v5532_v46 = vld [vmem:[#allocation2 + $0x82] sm:$0xff] }
 0x4c1   : > { %9668 = vmatprep.subr.bf16.mxu1 %v9667_v30 }
 0x4c3   : > { %8863 = vmatmul.mubr.f32.gmra.mrb[26].mxu1 %v4924_v43  ;;  %v5563_v43 = vld [vmem:[#allocation3 + $0x428] sm:$0xff] }
 0x4c4   : > { %8865 = vmatprep.mubr.f32.mxu1 %v4925_v48  ;;  %9670 = vmatpush3.bf16.msra.mxu1 %v9667_v30  ;;  %v4940_v30 = vld [vmem:[#allocation2 + $0x170] sm:$0xff]  ;;  %v5567_v48 = vld [vmem:[#allocation3 + $0x448] sm:$0xff] }
 0x4c5   : > { %9672 = vmatprep.subr.bf16.mxu1 %v9671_v60 }
 0x4c7   : > { %8866 = vmatmul.mubr.f32.gmra.mrb[28].mxu1 %v4926_v26  ;;  %v5571_v26 = vld [vmem:[#allocation3 + $0x468] sm:$0xff] }
 0x4c8   : > { %8868 = vmatprep.mubr.f32.mxu1 %v4927_v17  ;;  %9674 = vmatpush3.bf16.msra.mxu1 %v9671_v60  ;;  %v5562_v60 = vld [vmem:[#allocation3 + $0x420] sm:$0xff] }
 0x4c9   : > { %9676 = vmatprep.subr.bf16.mxu1 %v9675_v63  ;;  %v9687_v25 = vpack.c.bf16 %v5563_v43, %v5562_v60  ;;  %v5525_v17 = vld [vmem:[#allocation2 + $0x32] sm:$0xff] }
 0x4ca   : > { %v5913_v60 = vld [vmem:[%s12470_s5 + $0x58] sm:$0xff] }
 0x4cb   : > { %8869 = vmatmul.mubr.f32.gmra.mrb[30].mxu1 %v4928_v15  ;;  %v5526_v15 = vld [vmem:[#allocation2 + $0x3a] sm:$0xff]  ;;  %v5533_v43 = vld [vmem:[#allocation2 + $0x92] sm:$0xff] }
 0x4cc   : > { %8871 = vmatprep.mubr.f32.mxu1 %v4929_v21  ;;  %9678 = vmatpush3.bf16.msra.mxu1 %v9675_v63  ;;  %v5569_v63 = vld [vmem:[#allocation3 + $0x458] sm:$0xff]  ;;  %v5906_v21 = vld [vmem:[%s12470_s5 + $0x20] sm:$0xff] }
 0x4cd   : > { %9680 = vmatprep.subr.bf16.mxu1 %v9679_v49 }
 0x4cf   : > { %8872 = vmatmul.mubr.f32.gmra.mrb[0].mxu1 %v4930_v44  ;;  %v5907_v44 = vld [vmem:[%s12470_s5 + $0x28] sm:$0xff] }
 0x4d0   : > { %8874 = vmatprep.mubr.f32.mxu1 %v4931_v62  ;;  %v5527_v62 = vld [vmem:[#allocation2 + $0x4a] sm:$0xff] }
 0x4d3   : > { %8875 = vmatmul.mubr.f32.gmra.mrb[2].mxu1 %v4932_v13  ;;  %v9719_v13 = vpack.c.bf16 %v5907_v44, %v5906_v21  ;;  %v6672_v21 = vld [vmem:[%s10673_s16 + $0x79] sm:$0xff]  ;;  %v6673_v44 = vld [vmem:[%s10673_s16 + $0x81] sm:$0xff] }
 0x4d4   : > { %8877 = vmatprep.mubr.f32.mxu1 %v4933_v50  ;;  %v5528_v50 = vld [vmem:[#allocation2 + $0x52] sm:$0xff] }
 0x4d7   : > { %8878 = vmatmul.mubr.f32.gmra.mrb[4].mxu1 %v4934_v39  ;;  %v5908_v39 = vld [vmem:[%s12470_s5 + $0x30] sm:$0xff] }
 0x4d8   : > { %8880 = vmatprep.mubr.f32.mxu1 %v4935_v16  ;;  %v5909_v16 = vld [vmem:[%s12470_s5 + $0x38] sm:$0xff] }
 0x4db   : > { %8881 = vmatmul.mubr.f32.gmra.mrb[6].mxu1 %v4936_v59  ;;  %v5529_v59 = vld [vmem:[#allocation2 + $0x62] sm:$0xff] }
 0x4dc   : > { %8883 = vmatprep.mubr.f32.mxu1 %v4937_v10  ;;  %v9723_v10 = vpack.c.bf16 %v5909_v16, %v5908_v39  ;;  %v6677_v39 = vld [vmem:[%s10673_s16 + $0xb1] sm:$0xff]  ;;  %v6678_v16 = vld [vmem:[%s10673_s16 + $0xc1] sm:$0xff] }
 0x4df   : > { %8884 = vmatmul.mubr.f32.gmra.mrb[8].mxu1 %v4938_v8  ;;  %v5530_v8 = vld [vmem:[#allocation2 + $0x6a] sm:$0xff] }
 0x4e0   : > { %8886 = vmatprep.mubr.f32.mxu1 %v4939_v35  ;;  %v5910_v35 = vld [vmem:[%s12470_s5 + $0x40] sm:$0xff] }
 0x4e3   : > { %8887 = vmatmul.mubr.f32.gmra.mrb[10].mxu1 %v4940_v30  ;;  %v5911_v30 = vld [vmem:[%s12470_s5 + $0x48] sm:$0xff] }
 0x4e4   : > { %8889 = vmatprep.mubr.f32.mxu1 %v12074_v51  ;;  %v5564_v51 = vld [vmem:[#allocation3 + $0x430] sm:$0xff]  ;;  %v9727_v45 = vpack.c.bf16 %v5911_v30, %v5910_v35  ;;  %v6682_v35 = vld [vmem:[%s10673_s16 + $0xf1] sm:$0xff] }
 0x4e5   : > { %v6683_v30 = vld [vmem:[%s10673_s16 + $0xf9] sm:$0xff] }
 0x4e7   : > { %8890 = vmatmul.mubr.f32.gmra.mrb[12].mxu1 %v12077_v18  ;;  %v9691_v18 = vpack.c.bf16 %v5565_v38, %v5564_v51  ;;  %v5534_v51 = vld [vmem:[#allocation2 + $0x9a] sm:$0xff] }
 0x4e8   : > { %8892 = vmatprep.mubr.f32.mxu1 %v10423_v0  ;;  %v5914_v38 = vld [vmem:[%s12470_s5 + $0x60] sm:$0xff] }
 0x4eb   : > { %8893 = vmatmul.mubr.f32.gmra.mrb[14].mxu1 %v10423_v0  ;;  %v5531_v0 = vld [vmem:[#allocation2 + $0x7a] sm:$0xff] }
 0x4ec   : > { %8927 = vmatprep.mubr.f32.mxu1 %v12080_v6  ;;  %v5566_v6 = vld [vmem:[#allocation3 + $0x440] sm:$0xff] }
 0x4ef   : > { %8928 = vmatmul.mubr.f32.vlgmr.msra.gmra.mrb[16].mxu1 %v12083_v52  ;;  %v9695_v52 = vpack.c.bf16 %v5567_v48, %v5566_v6  ;;  %v5535_v6 = vld [vmem:[#allocation2 + $0xaa] sm:$0xff] }
 0x4f0   : > { %8930 = vmatprep.mubr.f32.mxu1 %v12086_v3  ;;  %9682 = vmatpush3.bf16.msra.mxu1 %v9679_v49  ;;  %v5568_v3 = vld [vmem:[#allocation3 + $0x450] sm:$0xff] }
 0x4f1   : > { %9684 = vmatprep.subr.bf16.mxu1 %v9683_v1 }
 0x4f3   : > { %8931 = vmatmul.mubr.f32.gmra.mrb[18].mxu1 %v12089_v19  ;;  %v9699_v19 = vpack.c.bf16 %v5569_v63, %v5568_v3  ;;  %v5916_v3 = vld [vmem:[%s12470_s5 + $0x70] sm:$0xff]  ;;  %v5917_v63 = vld [vmem:[%s12470_s5 + $0x78] sm:$0xff] }
 0x4f4   : > { %8933 = vmatprep.mubr.f32.mxu1 %v12092_v34  ;;  %9686 = vmatpush3.bf16.msra.mxu1 %v9683_v1  ;;  %v5570_v34 = vld [vmem:[#allocation3 + $0x460] sm:$0xff] }
 0x4f5   : > { %9688 = vmatprep.subr.bf16.mxu1 %v9687_v25  ;;  %v5912_v1 = vld [vmem:[%s12470_s5 + $0x50] sm:$0xff] }
 0x4f7   : > { %8934 = vmatmul.mubr.f32.gmra.mrb[20].mxu1 %v12095_v37  ;;  %v9703_v37 = vpack.c.bf16 %v5571_v26, %v5570_v34  ;;  %v9739_v34 = vpack.c.bf16 %v5917_v63, %v5916_v3  ;;  %v5538_v26 = vld [vmem:[#allocation2 + $0xca] sm:$0xff] }
 0x4f8   : > { %8936 = vmatprep.mubr.f32.mxu1 %v12098_v32  ;;  %9690 = vmatpush3.bf16.msra.mxu1 %v9687_v25  ;;  %v5572_v32 = vld [vmem:[#allocation3 + $0x470] sm:$0xff]  ;;  %v9731_v25 = vpack.c.bf16 %v5913_v60, %v5912_v1  ;;  %v6687_v1 = vld [vmem:[%s10673_s16 + $0x129] sm:$0xff] }
 0x4f9   : > { %9692 = vmatprep.subr.bf16.mxu1 %v9691_v18  ;;  %v6688_v60 = vld [vmem:[%s10673_s16 + $0x139] sm:$0xff]  ;;  %v12634_v3 = vld [vmem:[#allocation9_spill] sm:$0xff] }
 0x4fb   : > { %8937 = vmatmul.mubr.f32.gmra.mrb[22].mxu1 %v12101_v55  ;;  %v9707_v55 = vpack.c.bf16 %v5573_v47, %v5572_v32  ;;  %v5540_v32 = vld [vmem:[#allocation2 + $0xe2] sm:$0xff]  ;;  %v5541_v47 = vld [vmem:[#allocation2 + $0xf2] sm:$0xff] }
 0x4fc   : > { %8939 = vmatprep.mubr.f32.mxu1 %v12104_v22  ;;  %9694 = vmatpush3.bf16.msra.mxu1 %v9691_v18  ;;  %v5902_v22 = vld [vmem:[%s12470_s5] sm:$0xff]  ;;  %v5915_v18 = vld [vmem:[%s12470_s5 + $0x68] sm:$0xff] }
 0x4fd   : > { %9696 = vmatprep.subr.bf16.mxu1 %v9695_v52  ;;  %v9735_v48 = vpack.c.bf16 %v5915_v18, %v5914_v38  ;;  %v6692_v38 = vld [vmem:[%s10673_s16 + $0x169] sm:$0xff]  ;;  %v6693_v18 = vld [vmem:[%s10673_s16 + $0x171] sm:$0xff] }
 0x4ff   : > { %8940 = vmatmul.mubr.f32.gmra.mrb[24].mxu1 %v12107_v54  ;;  %v5903_v54 = vld [vmem:[%s12470_s5 + $0x8] sm:$0xff] }
 0x500   : > { %8942 = vmatprep.mubr.f32.mxu1 %v12110_v7  ;;  %9698 = vmatpush3.bf16.msra.mxu1 %v9695_v52  ;;  %v9711_v7 = vpack.c.bf16 %v5903_v54, %v5902_v22  ;;  %v5536_v52 = vld [vmem:[#allocation2 + $0xb2] sm:$0xff]  ;;  %v5543_v22 = vld [vmem:[#allocation2 + $0x10a] sm:$0xff] }
 0x501   : > { %9700 = vmatprep.subr.bf16.mxu1 %v9699_v19  ;;  %v5544_v54 = vld [vmem:[#allocation2 + $0x112] sm:$0xff] }
 0x503   : > { %8943 = vmatmul.mubr.f32.gmra.mrb[26].mxu1 %v12113_v11  ;;  %v5241_v11 = vld [vmem:[#allocation2 + $0x139] sm:$0xff] }
 0x504   : > { %8945 = vmatprep.mubr.f32.mxu1 %v12116_v29  ;;  %9702 = vmatpush3.bf16.msra.mxu1 %v9699_v19  ;;  %v5242_v29 = vld [vmem:[#allocation2 + $0x141] sm:$0xff] }
 0x505   : > { %9704 = vmatprep.subr.bf16.mxu1 %v9703_v37  ;;  %v5537_v19 = vld [vmem:[#allocation2 + $0xc2] sm:$0xff] }
 0x507   : > { %8946 = vmatmul.mubr.f32.gmra.mrb[28].mxu1 %v12119_v9  ;;  %v5243_v9 = vld [vmem:[#allocation2 + $0x151] sm:$0xff] }
 0x508   : > { %8948 = vmatprep.mubr.f32.mxu1 %v12122_v57  ;;  %9706 = vmatpush3.bf16.msra.mxu1 %v9703_v37  ;;  %v5244_v57 = vld [vmem:[#allocation2 + $0x159] sm:$0xff] }
 0x509   : > { %9708 = vmatprep.subr.bf16.mxu1 %v9707_v55  ;;  %v5539_v37 = vld [vmem:[#allocation2 + $0xda] sm:$0xff] }
 0x50b   : > { %8949 = vmatmul.mubr.f32.gmra.mrb[30].mxu1 %v12125_v56  ;;  %v5245_v56 = vld [vmem:[#allocation2 + $0x169] sm:$0xff] }
 0x50c   : > { %8951 = vmatprep.mubr.f32.mxu1 %v12128_v61  ;;  %9710 = vmatpush3.bf16.msra.mxu1 %v9707_v55  ;;  %v5246_v61 = vld [vmem:[#allocation2 + $0x171] sm:$0xff]  ;;  %v5542_v55 = vld [vmem:[#allocation2 + $0xfa] sm:$0xff] }
 0x50d   : > { %9712 = vmatprep.subr.bf16.mxu1 %v9711_v7 }
 0x50f   : > { %8952 = vmatmul.mubr.f32.gmra.mrb[0].mxu1 %v12131_v5  ;;  %v5247_v5 = vld [vmem:[#allocation2 + $0x181] sm:$0xff] }
 0x510   : > { %8954 = vmatprep.mubr.f32.mxu1 %v12134_v14  ;;  %v5249_v14 = vld [vmem:[#allocation2 + $0x199] sm:$0xff] }
 0x513   : > { %8955 = vmatmul.mubr.f32.gmra.mrb[2].mxu1 %v12137_v42  ;;  %v5248_v42 = vld [vmem:[#allocation2 + $0x189] sm:$0xff] }
 0x514   : > { %8957 = vmatprep.mubr.f32.mxu1 %v12140_v58  ;;  %v5250_v58 = vld [vmem:[#allocation2 + $0x1a1] sm:$0xff] }
 0x517   : > { %8958 = vmatmul.mubr.f32.gmra.mrb[4].mxu1 %v12143_v24  ;;  %v5904_v24 = vld [vmem:[%s12470_s5 + $0x10] sm:$0xff] }
 0x518   : > { %8960 = vmatprep.mubr.f32.mxu1 %v5241_v11  ;;  %v9715_v49 = vpack.c.bf16 %v5905_v33, %v5904_v24  ;;  %v5546_v11 = vld [vmem:[#allocation2 + $0x12a] sm:$0xff]  ;;  %v6665_v24 = vld [vmem:[%s10673_s16 + $0x21] sm:$0xff] }
 0x519   : > { %v6666_v33 = vld [vmem:[%s10673_s16 + $0x31] sm:$0xff] }
 0x51b   : > { %8961 = vmatmul.mubr.f32.gmra.mrb[6].mxu1 %v5242_v29  ;;  %v5547_v29 = vld [vmem:[#allocation2 + $0x13a] sm:$0xff] }
 0x51c   : > { %8963 = vmatprep.mubr.f32.mxu1 %v5243_v9  ;;  %v5548_v9 = vld [vmem:[#allocation2 + $0x142] sm:$0xff] }
 0x51f   : > { %8964 = vmatmul.mubr.f32.gmra.mrb[8].mxu1 %v5244_v57  ;;  %v5549_v57 = vld [vmem:[#allocation2 + $0x152] sm:$0xff] }
 0x520   : > { %8966 = vmatprep.mubr.f32.mxu1 %v5245_v56  ;;  %v5550_v56 = vld [vmem:[#allocation2 + $0x15a] sm:$0xff] }
 0x523   : > { %8967 = vmatmul.mubr.f32.gmra.mrb[10].mxu1 %v5246_v61  ;;  %v5551_v61 = vld [vmem:[#allocation2 + $0x16a] sm:$0xff] }
 0x524   : > { %8969 = vmatprep.mubr.f32.mxu1 %v5247_v5  ;;  %v5552_v5 = vld [vmem:[#allocation2 + $0x172] sm:$0xff] }
 0x527   : > { %8970 = vmatmul.mubr.f32.gmra.mrb[12].mxu1 %v5248_v42  ;;  %v5556_v42 = vld [vmem:[#allocation2 + $0x1a2] sm:$0xff] }
 0x528   : > { %8972 = vmatprep.mubr.f32.mxu1 %v5249_v14  ;;  %v5555_v14 = vld [vmem:[#allocation2 + $0x19a] sm:$0xff] }
 0x52b   : > { %8973 = vmatmul.mubr.f32.gmra.mrb[14].mxu1 %v5250_v58  ;;  %v6664_v58 = vld [vmem:[%s10673_s16 + $0x19] sm:$0xff] }
 0x52c   : > { %9007 = vmatprep.mubr.f32.mxu1 %v5525_v17  ;;  %v6667_v17 = vld [vmem:[%s10673_s16 + $0x39] sm:$0xff] }
 0x52f   : > { %9008 = vmatmul.mubr.f32.vlgmr.msra.gmra.mrb[16].mxu1 %v5526_v15  ;;  %v6671_v15 = vld [vmem:[%s10673_s16 + $0x69] sm:$0xff] }
 0x530   : > { %9010 = vmatprep.mubr.f32.mxu1 %v5527_v62  ;;  %9714 = vmatpush3.bf16.msra.mxu1 %v9711_v7  ;;  %v5545_v7 = vld [vmem:[#allocation2 + $0x122] sm:$0xff]  ;;  %v6674_v62 = vld [vmem:[%s10673_s16 + $0x91] sm:$0xff] }
 0x531   : > { %9716 = vmatprep.subr.bf16.mxu1 %v9715_v49 }
 0x533   : > { %9011 = vmatmul.mubr.f32.gmra.mrb[18].mxu1 %v5528_v50  ;;  %v6676_v50 = vld [vmem:[%s10673_s16 + $0xa9] sm:$0xff] }
 0x534   : > { %9013 = vmatprep.mubr.f32.mxu1 %v5529_v59  ;;  %9718 = vmatpush3.bf16.msra.mxu1 %v9715_v49  ;;  %v6670_v49 = vld [vmem:[%s10673_s16 + $0x61] sm:$0xff]  ;;  %v6679_v59 = vld [vmem:[%s10673_s16 + $0xc9] sm:$0xff] }
 0x535   : > { %9720 = vmatprep.subr.bf16.mxu1 %v9719_v13 }
 0x537   : > { %9014 = vmatmul.mubr.f32.gmra.mrb[20].mxu1 %v5530_v8  ;;  %v6681_v8 = vld [vmem:[%s10673_s16 + $0xe1] sm:$0xff] }
 0x538   : > { %9016 = vmatprep.mubr.f32.mxu1 %v5531_v0  ;;  %9722 = vmatpush3.bf16.msra.mxu1 %v9719_v13  ;;  %v6675_v13 = vld [vmem:[%s10673_s16 + $0x99] sm:$0xff]  ;;  %v6684_v0 = vld [vmem:[%s10673_s16 + $0x109] sm:$0xff] }
 0x539   : > { %9724 = vmatprep.subr.bf16.mxu1 %v9723_v10 }
 0x53b   : > { %9017 = vmatmul.mubr.f32.gmra.mrb[22].mxu1 %v5532_v46  ;;  %v6686_v46 = vld [vmem:[%s10673_s16 + $0x121] sm:$0xff] }
 0x53c   : > { %9019 = vmatprep.mubr.f32.mxu1 %v5533_v43  ;;  %9726 = vmatpush3.bf16.msra.mxu1 %v9723_v10  ;;  %v6680_v10 = vld [vmem:[%s10673_s16 + $0xd9] sm:$0xff]  ;;  %v6689_v43 = vld [vmem:[%s10673_s16 + $0x141] sm:$0xff] }
 0x53d   : > { %9728 = vmatprep.subr.bf16.mxu1 %v9727_v45 }
 0x53f   : > { %9020 = vmatmul.mubr.f32.gmra.mrb[24].mxu1 %v5534_v51  ;;  %v6691_v51 = vld [vmem:[%s10673_s16 + $0x159] sm:$0xff] }
 0x540   : > { %9022 = vmatprep.mubr.f32.mxu1 %v5535_v6  ;;  %9730 = vmatpush3.bf16.msra.mxu1 %v9727_v45  ;;  %v6685_v45 = vld [vmem:[%s10673_s16 + $0x111] sm:$0xff]  ;;  %v6694_v6 = vld [vmem:[%s10673_s16 + $0x181] sm:$0xff] }
 0x541   : > { %9732 = vmatprep.subr.bf16.mxu1 %v9731_v25 }
 0x543   : > { %9023 = vmatmul.mubr.f32.gmra.mrb[26].mxu1 %v5536_v52  ;;  %v12301_v52 = vld [vmem:[%s12469_s4] ss:$0 sm:$0xff] }
 0x544   : > { %9025 = vmatprep.mubr.f32.mxu1 %v5537_v19  ;;  %9734 = vmatpush3.bf16.msra.mxu1 %v9731_v25  ;;  %v6690_v25 = vld [vmem:[%s10673_s16 + $0x151] sm:$0xff]  ;;  %v9759_v63 = vadd.f32 %v12634_v3, %v12301_v52 }
 0x545   : > { %9736 = vmatprep.subr.bf16.mxu1 %v9735_v48  ;;  %v12635_v19 = vld [vmem:[#allocation10_spill] sm:$0xff] }
 0x547   : > { %9026 = vmatmul.mubr.f32.gmra.mrb[28].mxu1 %v5538_v26  ;;  %v9765_v26 = vadd.f32 %v12029_v53, %v12301_v52 }
 0x548   : > { %9028 = vmatprep.mubr.f32.mxu1 %v5539_v37  ;;  %9738 = vmatpush3.bf16.msra.mxu1 %v9735_v48  ;;  %v6695_v48 = vld [vmem:[%s10673_s16 + $0x189] sm:$0xff]  ;;  %v9768_v37 = vadd.f32 %v12301_v52, %v12031_v28  ;;  %v9774_v28 = vadd.f32 %v12301_v52, %v12037_v31 }
 0x549   : > { %9740 = vmatprep.subr.bf16.mxu1 %v9739_v34 }
 0x54b   : > { %9029 = vmatmul.mubr.f32.gmra.mrb[30].mxu1 %v5540_v32 }
 0x54c   : > { %9031 = vmatprep.mubr.f32.mxu1 %v5541_v47  ;;  %9742 = vmatpush3.bf16.msra.mxu1 %v9739_v34  ;;  %v9762_v34 = vadd.f32 %v12301_v52, %v12635_v19  ;;  %v12315_v47 = vld [vmem:[%s12471_s6] ss:$0 sm:$0xff] }
 0x54d   : > { %v9766_v53 = vadd.f32 %v9765_v26, %v12315_v47  ;;  %v12638_v19 = vld [vmem:[#allocation27_spill] sm:$0xff] }
 0x54f   : > { %9032 = vmatmul.mubr.f32.gmra.mrb[0].mxu1 %v5542_v55 }
 0x550   : > { %9034 = vmatprep.mubr.f32.mxu1 %v5543_v22 }
 0x553   : > { %9035 = vmatmul.mubr.f32.gmra.mrb[2].mxu1 %v5544_v54 }
 0x554   : > { %9037 = vmatprep.mubr.f32.mxu1 %v5545_v7  ;;  %v9771_v7 = vadd.f32 %v12035_v23, %v12301_v52  ;;  %v9777_v23 = vadd.f32 %v12041_v36, %v12301_v52 }
 0x557   : > { %9038 = vmatmul.mubr.f32.gmra.mrb[4].mxu1 %v5546_v11 }
 0x558   : > { %9040 = vmatprep.mubr.f32.mxu1 %v5547_v29 }
 0x55b   : > { %9041 = vmatmul.mubr.f32.gmra.mrb[6].mxu1 %v5548_v9 }
 0x55c   : > { %9043 = vmatprep.mubr.f32.mxu1 %v5549_v57  ;;  %v9769_v57 = vadd.f32 %v9768_v37, %v12315_v47 }
 0x55f   : > { %9044 = vmatmul.mubr.f32.gmra.mrb[8].mxu1 %v5550_v56 }
 0x560   : > { %9046 = vmatprep.mubr.f32.mxu1 %v5551_v61 }
 0x563   : > { %9047 = vmatmul.mubr.f32.gmra.mrb[10].mxu1 %v5552_v5 }
 0x564   : > { %9049 = vmatprep.mubr.f32.mxu1 %v12186_v2  ;;  %v6668_v2 = vld [vmem:[%s10673_s16 + $0x49] sm:$0xff] }
 0x567   : > { %9050 = vmatmul.mubr.f32.gmra.mrb[12].mxu1 %v12189_v4  ;;  %v6669_v4 = vld [vmem:[%s10673_s16 + $0x51] sm:$0xff] }
 0x568   : > { %9052 = vmatprep.mubr.f32.mxu1 %v5555_v14 }
 0x56b   : > { %9053 = vmatmul.mubr.f32.gmra.mrb[14].mxu1 %v5556_v42 }
 0x56c   : > { %9087 = vmatprep.mubr.f32.mxu1 %v6664_v58  ;;  %v9772_v58 = vadd.f32 %v9771_v7, %v12315_v47 }
 0x56f   : > { %9088 = vmatmul.mubr.f32.vlgmr.msra.gmra.mrb[16].mxu1 %v6665_v24  ;;  %v9780_v24 = vadd.f32 %v12301_v52, %v12043_v20  ;;  %v9786_v20 = vadd.f32 %v12301_v52, %v12049_v40  ;;  %v9792_v40 = vadd.f32 %v12301_v52, %v12055_v27 }
 0x570   : > { %9090 = vmatprep.mubr.f32.mxu1 %v6666_v33 }
 0x573   : > { %9091 = vmatmul.mubr.f32.gmra.mrb[18].mxu1 %v6667_v17 }
 0x574   : > { %9093 = vmatprep.mubr.f32.mxu1 %v6668_v2  ;;  %v9775_v2 = vadd.f32 %v9774_v28, %v12315_v47 }
 0x577   : > { %9094 = vmatmul.mubr.f32.gmra.mrb[20].mxu1 %v6669_v4 }
 0x578   : > { %9096 = vmatprep.mubr.f32.mxu1 %v6670_v49 }
 0x57b   : > { %9097 = vmatmul.mubr.f32.gmra.mrb[22].mxu1 %v6671_v15  ;;  %v9783_v15 = vadd.f32 %v12047_v12, %v12301_v52  ;;  %v9789_v12 = vadd.f32 %v12053_v41, %v12301_v52 }
 0x57c   : > { %9099 = vmatprep.mubr.f32.mxu1 %v6672_v21 }
 0x57f   : > { %9100 = vmatmul.mubr.f32.gmra.mrb[24].mxu1 %v6673_v44  ;;  %v9778_v44 = vadd.f32 %v9777_v23, %v12315_v47 }
 0x580   : > { %9102 = vmatprep.mubr.f32.mxu1 %v6674_v62 }
 0x583   : > { %9103 = vmatmul.mubr.f32.gmra.mrb[26].mxu1 %v6675_v13 }
 0x584   : > { %9105 = vmatprep.mubr.f32.mxu1 %v6676_v50  ;;  %v9781_v50 = vadd.f32 %v9780_v24, %v12315_v47 }
 0x587   : > { %9106 = vmatmul.mubr.f32.gmra.mrb[28].mxu1 %v6677_v39 }
 0x588   : > { %9108 = vmatprep.mubr.f32.mxu1 %v6678_v16 }
 0x58b   : > { %9109 = vmatmul.mubr.f32.gmra.mrb[30].mxu1 %v6679_v59 }
 0x58c   : > { %9111 = vmatprep.mubr.f32.mxu1 %v6680_v10 }
 0x58f   : > { %9112 = vmatmul.mubr.f32.gmra.mrb[0].mxu1 %v6681_v8  ;;  %v9784_v8 = vadd.f32 %v9783_v15, %v12315_v47 }
 0x590   : > { %9114 = vmatprep.mubr.f32.mxu1 %v6682_v35 }
 0x593   : > { %9115 = vmatmul.mubr.f32.gmra.mrb[2].mxu1 %v6683_v30 }
 0x594   : > { %9117 = vmatprep.mubr.f32.mxu1 %v6684_v0  ;;  %v9787_v0 = vadd.f32 %v9786_v20, %v12315_v47 }
 0x597   : > { %9118 = vmatmul.mubr.f32.gmra.mrb[4].mxu1 %v6685_v45 }
 0x598   : > { %9120 = vmatprep.mubr.f32.mxu1 %v6686_v46 }
 0x59b   : > { %9121 = vmatmul.mubr.f32.gmra.mrb[6].mxu1 %v6687_v1 }
 0x59c   : > { %9123 = vmatprep.mubr.f32.mxu1 %v6688_v60  ;;  %v12636_v60 = vld [vmem:[#allocation25_spill] sm:$0xff] }
 0x59d   : > { %v9795_v41 = vadd.f32 %v12636_v60, %v12301_v52 }
 0x59f   : > { %9124 = vmatmul.mubr.f32.gmra.mrb[8].mxu1 %v6689_v43  ;;  %v9796_v37 = vadd.f32 %v9795_v41, %v12315_v47 }
 0x5a0   : > { %9126 = vmatprep.mubr.f32.mxu1 %v6690_v25  ;;  %v9790_v25 = vadd.f32 %v9789_v12, %v12315_v47 }
 0x5a3   : > { %9127 = vmatmul.mubr.f32.gmra.mrb[10].mxu1 %v6691_v51  ;;  %v12637_v51 = vld [vmem:[#allocation26_spill] sm:$0xff] }
 0x5a4   : > { %9129 = vmatprep.mubr.f32.mxu1 %v6692_v38  ;;  %v9798_v27 = vadd.f32 %v12301_v52, %v12637_v51 }
 0x5a6   : > { %v9799_v7 = vadd.f32 %v9798_v27, %v12315_v47 }
 0x5a7   : > { %9130 = vmatmul.mubr.f32.gmra.mrb[12].mxu1 %v6693_v18 }
 0x5a8   : > { %9132 = vmatprep.mubr.f32.mxu1 %v6694_v6  ;;  %v9793_v6 = vadd.f32 %v9792_v40, %v12315_v47 }
 0x5ab   : > { %9133 = vmatmul.mubr.f32.gmra.mrb[14].mxu1 %v6695_v48 }
 0x642   : > { %v9089_v32 = vpop.f32.mrb[16].mxu1 }
 0x643   : > { %v9760_v55 = vadd.f32 %v9759_v63, %v9089_v32  ;;  %v5991_v22 = vpop.f32.mrb[17].mxu1  ;;  %v12639_v32 = vld [vmem:[#allocation28_spill] sm:$0xff] }
 0x644   : > { %v9763_v54 = vadd.f32 %v9762_v34, %v5991_v22  ;;  %v9801_v34 = vadd.f32 %v12638_v19, %v12301_v52 }
 0x645   : > { %v9761_v11 = vadd.f32 %v9760_v55, %v12315_v47  ;;  %v9804_v55 = vadd.f32 %v12301_v52, %v12639_v32 }
 0x646   : > { %v9764_v29 = vadd.f32 %v9763_v54, %v12315_v47  ;;  %v9092_v9 = vpop.f32.mrb[18].mxu1 }
 0x647   : > { %v6183_v56 = vmax.f32 %v9761_v11, 0.0  ;;  %v9767_v61 = vadd.f32 %v9766_v53, %v9092_v9  ;;  %v6001_v5 = vpop.f32.mrb[19].mxu1  ;;  %v9802_v9 = vadd.f32 %v9801_v34, %v12315_v47 }
 0x648   : > { %v6182_v14 = vmax.f32 %v9764_v29, 0.0  ;;  %v9770_v42 = vadd.f32 %v9769_v57, %v6001_v5 }
 0x649   : > { %6215 = vst [vmem:[%s12329_s22 + $0x8] sm:$0xff] %v6183_v56  ;;  %v6185_v31 = vmax.f32 %v9767_v61, 0.0  ;;  %v9805_v61 = vadd.f32 %v9804_v55, %v12315_v47 }
 0x64a   : > { %6214 = vst [vmem:[%s12329_s22] sm:$0xff] %v6182_v14  ;;  %v6184_v33 = vmax.f32 %v9770_v42, 0.0  ;;  %v9095_v17 = vpop.f32.mrb[20].mxu1  ;;  %v12376_v42 = vadd.f32 %v12315_v47, %v12301_v52 }
 0x64b   : > { %6217 = vst [vmem:[%s12329_s22 + $0x18] sm:$0xff] %v6185_v31  ;;  %v9773_v36 = vadd.f32 %v9772_v58, %v9095_v17  ;;  %v6011_v4 = vpop.f32.mrb[21].mxu1 }
 0x64c   : > { %6216 = vst [vmem:[%s12329_s22 + $0x10] sm:$0xff] %v6184_v33  ;;  %v9776_v49 = vadd.f32 %v9775_v2, %v6011_v4 }
 0x64d   : > { %v6187_v21 = vmax.f32 %v9773_v36, 0.0 }
 0x64e   : > { %v6186_v62 = vmax.f32 %v9776_v49, 0.0  ;;  %v9098_v13 = vpop.f32.mrb[22].mxu1 }
 0x64f   : > { %6219 = vst [vmem:[%s12329_s22 + $0x28] sm:$0xff] %v6187_v21  ;;  %v9779_v39 = vadd.f32 %v9778_v44, %v9098_v13  ;;  %v6021_v16 = vpop.f32.mrb[23].mxu1 }
 0x650   : > { %6218 = vst [vmem:[%s12329_s22 + $0x20] sm:$0xff] %v6186_v62  ;;  %v9782_v59 = vadd.f32 %v9781_v50, %v6021_v16 }
 0x651   : > { %v6189_v10 = vmax.f32 %v9779_v39, 0.0 }
 0x652   : > { %v6188_v35 = vmax.f32 %v9782_v59, 0.0  ;;  %v9101_v30 = vpop.f32.mrb[24].mxu1 }
 0x653   : > { %6221 = vst [vmem:[%s12329_s22 + $0x38] sm:$0xff] %v6189_v10  ;;  %v9785_v45 = vadd.f32 %v9784_v8, %v9101_v30  ;;  %v6031_v46 = vpop.f32.mrb[25].mxu1 }
 0x654   : > { %6220 = vst [vmem:[%s12329_s22 + $0x30] sm:$0xff] %v6188_v35  ;;  %v9788_v1 = vadd.f32 %v9787_v0, %v6031_v46 }
 0x655   : > { %v6191_v43 = vmax.f32 %v9785_v45, 0.0 }
 0x656   : > { %v6190_v38 = vmax.f32 %v9788_v1, 0.0  ;;  %v9104_v18 = vpop.f32.mrb[26].mxu1 }
 0x657   : > { %6223 = vst [vmem:[%s12329_s22 + $0x48] sm:$0xff] %v6191_v43  ;;  %v9791_v48 = vadd.f32 %v9790_v25, %v9104_v18  ;;  %v6041_v3 = vpop.f32.mrb[27].mxu1 }
 0x658   : > { %6222 = vst [vmem:[%s12329_s22 + $0x40] sm:$0xff] %v6190_v38  ;;  %v9794_v63 = vadd.f32 %v9793_v6, %v6041_v3 }
 0x659   : > { %v6193_v26 = vmax.f32 %v9791_v48, 0.0 }
 0x65a   : > { %v6192_v22 = vmax.f32 %v9794_v63, 0.0  ;;  %v9107_v54 = vpop.f32.mrb[28].mxu1 }
 0x65b   : > { %6225 = vst [vmem:[%s12329_s22 + $0x58] sm:$0xff] %v6193_v26  ;;  %v9797_v11 = vadd.f32 %v9796_v37, %v9107_v54  ;;  %v6051_v53 = vpop.f32.mrb[29].mxu1 }
 0x65c   : > { %6224 = vst [vmem:[%s12329_s22 + $0x50] sm:$0xff] %v6192_v22  ;;  %v9800_v28 = vadd.f32 %v9799_v7, %v6051_v53 }
 0x65d   : > { %v6195_v29 = vmax.f32 %v9797_v11, 0.0 }
 0x65e   : > { %v6194_v57 = vmax.f32 %v9800_v28, 0.0  ;;  %v9110_v56 = vpop.f32.mrb[30].mxu1 }
 0x65f   : > { %6227 = vst [vmem:[%s12329_s22 + $0x68] sm:$0xff] %v6195_v29  ;;  %v9803_v5 = vadd.f32 %v9802_v9, %v9110_v56  ;;  %v6061_v14 = vpop.f32.mrb[31].mxu1 }
 0x660   : > { %6226 = vst [vmem:[%s12329_s22 + $0x60] sm:$0xff] %v6194_v57  ;;  %v9806_v23 = vadd.f32 %v9805_v61, %v6061_v14 }
 0x661   : > { %v6197_v31 = vmax.f32 %v9803_v5, 0.0 }
 0x662   : > { %v6196_v58 = vmax.f32 %v9806_v23, 0.0  ;;  %v9113_v24 = vpop.f32.mrb[0].mxu1 }
 0x663   : > { %6229 = vst [vmem:[%s12329_s22 + $0x78] sm:$0xff] %v6197_v31  ;;  %v9808_v33 = vadd.f32 %v12376_v42, %v9113_v24  ;;  %v6071_v17 = vpop.f32.mrb[1].mxu1 }
 0x664   : > { %6228 = vst [vmem:[%s12329_s22 + $0x70] sm:$0xff] %v6196_v58  ;;  %v9810_v2 = vadd.f32 %v12376_v42, %v6071_v17 }
 0x665   : > { %v6199_v36 = vmax.f32 %v9808_v33, 0.0 }
 0x666   : > { %v6198_v4 = vmax.f32 %v9810_v2, 0.0  ;;  %v9116_v49 = vpop.f32.mrb[2].mxu1 }
 0x667   : > { %6231 = vst [vmem:[%s12329_s22 + $0x88] sm:$0xff] %v6199_v36  ;;  %v9812_v52 = vadd.f32 %v12376_v42, %v9116_v49  ;;  %v6081_v47 = vpop.f32.mrb[3].mxu1 }
 0x668   : > { %6230 = vst [vmem:[%s12329_s22 + $0x80] sm:$0xff] %v6198_v4  ;;  %v9814_v15 = vadd.f32 %v12376_v42, %v6081_v47 }
 0x669   : > { %v6201_v21 = vmax.f32 %v9812_v52, 0.0 }
 0x66a   : > { %v6200_v44 = vmax.f32 %v9814_v15, 0.0  ;;  %v9119_v20 = vpop.f32.mrb[4].mxu1 }
 0x66b   : > { %6233 = vst [vmem:[%s12329_s22 + $0x98] sm:$0xff] %v6201_v21  ;;  %v9816_v62 = vadd.f32 %v12376_v42, %v9119_v20  ;;  %v6091_v13 = vpop.f32.mrb[5].mxu1 }
 0x66c   : > { %6232 = vst [vmem:[%s12329_s22 + $0x90] sm:$0xff] %v6200_v44  ;;  %v9818_v50 = vadd.f32 %v12376_v42, %v6091_v13 }
 0x66d   : > { %v6203_v39 = vmax.f32 %v9816_v62, 0.0 }
 0x66e   : > { %v6202_v16 = vmax.f32 %v9818_v50, 0.0  ;;  %v9122_v59 = vpop.f32.mrb[6].mxu1 }
 0x66f   : > { %6235 = vst [vmem:[%s12329_s22 + $0xa8] sm:$0xff] %v6203_v39  ;;  %v9820_v12 = vadd.f32 %v12376_v42, %v9122_v59  ;;  %v6101_v10 = vpop.f32.mrb[7].mxu1 }
 0x670   : > { %6234 = vst [vmem:[%s12329_s22 + $0xa0] sm:$0xff] %v6202_v16  ;;  %v9822_v8 = vadd.f32 %v12376_v42, %v6101_v10 }
 0x671   : > { %v6205_v40 = vmax.f32 %v9820_v12, 0.0 }
 0x672   : > { %v6204_v35 = vmax.f32 %v9822_v8, 0.0  ;;  %v9125_v30 = vpop.f32.mrb[8].mxu1 }
 0x673   : > { %6237 = vst [vmem:[%s12329_s22 + $0xb8] sm:$0xff] %v6205_v40  ;;  %v9824_v0 = vadd.f32 %v12376_v42, %v9125_v30  ;;  %v6111_v45 = vpop.f32.mrb[9].mxu1 }
 0x674   : > { %6236 = vst [vmem:[%s12329_s22 + $0xb0] sm:$0xff] %v6204_v35  ;;  %v9826_v46 = vadd.f32 %v12376_v42, %v6111_v45 }
 0x675   : > { %v6207_v1 = vmax.f32 %v9824_v0, 0.0 }
 0x676   : > { %v6206_v60 = vmax.f32 %v9826_v46, 0.0  ;;  %v9128_v41 = vpop.f32.mrb[10].mxu1 }
 0x677   : > { %6239 = vst [vmem:[%s12329_s22 + $0xc8] sm:$0xff] %v6207_v1  ;;  %v9828_v43 = vadd.f32 %v12376_v42, %v9128_v41  ;;  %v6121_v25 = vpop.f32.mrb[11].mxu1 }
 0x678   : > { %6238 = vst [vmem:[%s12329_s22 + $0xc0] sm:$0xff] %v6206_v60  ;;  %v9830_v51 = vadd.f32 %v12376_v42, %v6121_v25 }
 0x679   : > { %v6209_v27 = vmax.f32 %v9828_v43, 0.0 }
 0x67a   : > { %v6208_v38 = vmax.f32 %v9830_v51, 0.0  ;;  %v9131_v18 = vpop.f32.mrb[12].mxu1 }
 0x67b   : > { %6241 = vst [vmem:[%s12329_s22 + $0xd8] sm:$0xff] %v6209_v27  ;;  %v9832_v6 = vadd.f32 %v12376_v42, %v9131_v18  ;;  %v6131_v48 = vpop.f32.mrb[13].mxu1 }
 0x67c   : > { %6240 = vst [vmem:[%s12329_s22 + $0xd0] sm:$0xff] %v6208_v38  ;;  %v9834_v3 = vadd.f32 %v12376_v42, %v6131_v48 }
 0x67d   : > { %v6211_v63 = vmax.f32 %v9832_v6, 0.0 }
 0x67e   : > { %v6210_v19 = vmax.f32 %v9834_v3, 0.0  ;;  %v9134_v34 = vpop.f32.mrb[14].mxu1 }
 0x67f   : > { %6243 = vst [vmem:[%s12329_s22 + $0xe8] sm:$0xff] %v6211_v63  ;;  %v9836_v26 = vadd.f32 %v12376_v42, %v9134_v34  ;;  %v6141_v37 = vpop.f32.mrb[15].mxu1 }
 0x680   : > { %6242 = vst [vmem:[%s12329_s22 + $0xe0] sm:$0xff] %v6210_v19  ;;  %v9838_v32 = vadd.f32 %v12376_v42, %v6141_v37 }
 0x681   : > { %v6213_v55 = vmax.f32 %v9836_v26, 0.0 }
 0x682   : > { %v6212_v22 = vmax.f32 %v9838_v32, 0.0 }
 0x683   : > { %6245 = vst [vmem:[%s12329_s22 + $0xf8] sm:$0xff] %v6213_v55 }
 0x684   : > { %6244 = vst [vmem:[%s12329_s22 + $0xf0] sm:$0xff] %v6212_v22 }
 0x685   : > { %10465 = shalt.err (!%p10462_p7)
}
 0x686   : > { %s10466_s21 = scalar_lea.hbm %s12416_s9, 4096  ;;  %s10470_s13 = scalar_lea.hbm %s12472_s7, 8192 }
 0x687   : > { %p10467_p8 = scmp.ne.s32.totalorder %s12416_s9, %s10466_s21  ;;  %p10471_p1 = scmp.lt.u32.totalorder %s12416_s9, %s12472_s7 }
 0x688   : > { %p10472_p0 = scmp.lt.u32.totalorder %s10470_s13, %s10466_s21  ;;  %p10474_p6 = scmp.lt.u32.totalorder %s10466_s21, %s12416_s9 }
 0x689   : > { %p10468_p11 = pnand %p10467_p8, %p12640_p9 }
 0x68a   : > { %p10473_p5 = por %p10472_p0, %p10471_p1 }
 0x68b   : > { %p10469_p13 = pneg %p10468_p11 }
 0x68c   : > { %p10475_p10 = por %p10474_p6, %p10473_p5 }
 0x68e   : > { %p10476_p12 = pnand %p10475_p10, %p10469_p13 }
 0x690   : > { %10479 = shalt.err (!%p10476_p12)
}
 0x691   : > { %s10525_s29 = smov 128   ;;  %s10526_s8 = smov 8  }
 0x692   : > { %10372 = dma.vmem_to_hbm [thread:$0]  (%p12640_p9), %s12418_s23, 4096, %s12416_s9, %s12424_s28, %s10525_s29, %s10525_s29, %s10526_s8  }
 0x693 PF: > { %p10384_p2 = scmp.ge.s32.totalorder %s10518_s27, 2  ;;  %s6275_s14 = sand.u32 1, %s10506_s24  }
 0x694   : > { %p12641_p3 = scmp.ne.s32.totalorder %s12526_s12, 0  ;;  %s6276_s17 = scalar_lea.sflag [#allocation5], %s6275_s14 }
 0x696   : > { %p10379_p4 = pnand %p10384_p2, %p12641_p3 }
 0x698   : > { %10501 = dma.done.wait (!%p10379_p4), %s6276_s17, 4096  }
 0x699   : > { %10503 = vsyncadd (!%p10379_p4), %s6276_s17, 4294963200  ;;  %p18_p7 = scmp.ge.s32.totalorder %s10592_s30, 4   ;;  %s12642_s24 = smov %s10510_s25 }
 0x69a   : > { %s12643_s25 = smov %s10514_s26  ;;  %s12644_s26 = smov %s10603_s10 }
 0x69b   : > { %s12645_s27 = smov %s10592_s30  ;;  %20 = sbr.rel (!%p18_p7) target bundleno = 4 (0x4), region = 108 }
 0x6a2   :  { %6281 = vsyncpa [#allocation4], 1 }
 0x6a3   :  { %6283 = vsyncpa [#allocation4 + $0x1], 1 }
 0x6a4   :  { %6284 = vsyncpa [#allocation5], 1 }
 0x6a5   :  { %6286 = vsyncpa [#allocation5 + $0x1], 1 }

</bundles_post_ra>
